<compile_context>
chip_gen: v5e
topology: v5e:2x2
jax: 0.10.0
libtpu: 0.0.40
codegen_flags: <defaults>
</compile_context>

<pallas_src>
from functools import partial

import jax
import jax.numpy as jnp
from jax.experimental import pallas as pl
from jax.experimental.pallas import tpu as pltpu


def _round_up(n, m):
    return (n + m - 1) // m * m


def _conv_block_kernel(x_ref, g_ref, w_ref, sc_ref, sh_ref, o_ref, col_ref, *,
                       Wp, TH, KH, KW, C_in, C_out, eps):
    """One (batch, height-tile) step: channel-LN -> SiLU -> im2col conv -> FiLM."""
    x = x_ref[0, 0]                                        # (P_pad, C_in) f32, zero-padded
    P_pad = x.shape[0]

    # --- channel LayerNorm per pixel: one pass (mean, E[x^2]) + learnable gain ---------
    mean = jnp.mean(x, axis=-1, keepdims=True)
    ex2 = jnp.mean(x * x, axis=-1, keepdims=True)
    var = ex2 - mean * mean
    xn = (x - mean) * jax.lax.rsqrt(var + eps) * g_ref[...]

    # --- SiLU; divide runs on the EUP approx-reciprocal slot (dropout p=0 = identity) --
    a = xn * pl.reciprocal(1.0 + jnp.exp(-xn), approx=True)

    # --- im2col via XLU rolls: tap t=(kh,kw) is the activation advanced by kh*Wp+kw flat
    #     padded pixels.  Rolled/wrapped rows only feed positions cropped below / in the
    #     wrapper.  Each tap is written once into the VMEM scratch column buffer (bf16),
    #     keeping live ranges to one rolled temporary at a time. ------------------------
    for kh in range(KH):
        for kw in range(KW):
            off = kh * Wp + kw
            t = kh * KW + kw
            shifted = a if off == 0 else pltpu.roll(a, shift=(P_pad - off) % P_pad, axis=0)
            col_ref[:, t * C_in:(t + 1) * C_in] = shifted.astype(col_ref.dtype)

    # --- single deep-K MXU matmul: (P_pad, KH*KW*C_in) @ (KH*KW*C_in, C_out),
    #     bf16 operands, f32 accumulation ------------------------------------------------
    acc = jnp.dot(col_ref[...], w_ref[...], preferred_element_type=jnp.float32)

    # --- FiLM with wrapper-precomputed per-batch (scale, shift); keep the TH*Wp valid
    #     rows (pad columns are cropped in the wrapper) ----------------------------------
    valid = acc[:TH * Wp]
    out = valid * (1.0 + sc_ref[0]) + sh_ref[0]
    o_ref[0, 0] = out.astype(o_ref.dtype)


def _choose_tile_h(H, W, C_in, C_out, KH, KW, vmem_budget=8 << 20):
    """Largest divisor of H whose per-step working set fits a per-buffer VMEM budget."""
    ph, pw = KH // 2, KW // 2
    Wp = W + 2 * pw
    best = None
    for th in range(1, H + 1):
        if H % th:
            continue
        p = _round_up((th + 2 * ph) * Wp, 8)
        step = (2 * p * C_in * 4                 # x tile (f32, double-buffered)
                + p * KH * KW * C_in * 2         # im2col scratch (bf16)
                + 3 * p * C_in * 4               # xn / a temporaries
                + p * C_out * 4                  # f32 matmul result
                + 2 * th * Wp * C_out * 4)       # output tile (double-buffered)
        if best is None or step <= vmem_budget:
            best = th
    return best


def conv_block_2d(x, t_emb, params, *, eps=1e-5, tile_h=None):
    """Pallas equivalent of ConvBlock2D.forward (default config) in NCHW in/out.

    x:      (B, C_in, H, W) float32
    t_emb:  (B, emb_dim) float32  ('seq' embedding input)
    params: dict with
        'norm_g': (C_in,)                 channel LayerNorm gain
        'conv_w': (C_out, C_in, KH, KW)   conv weight, bias=False
        'emb_w':  (emb_dim, 2*C_out)      Linear weight (x @ W layout)
        'emb_b':  (2*C_out,)              Linear bias
    returns (B, C_out, H, W) float32
    """
    B, C_in, H, W = x.shape
    conv_w = params["conv_w"]
    C_out, _, KH, KW = conv_w.shape
    assert KH % 2 == 1 and KW % 2 == 1, "odd kernel assumed for padding='same'"

    ph, pw = KH // 2, KW // 2
    Wp = W + 2 * pw

    if tile_h is None:
        tile_h = _choose_tile_h(H, W, C_in, C_out, KH, KW)
    assert H % tile_h == 0, "tile_h must divide H"
    TH = tile_h
    NT = H // TH
    THp = TH + 2 * ph
    P = THp * Wp
    P_pad = _round_up(P, 8)                       # sublane-aligned row count
    K_cols = KH * KW * C_in
    rows_out = TH * Wp

    # ---- layout plumbing (XLA side) ----------------------------------------------------
    # NCHW -> NHWC, zero-pad spatial dims ('same'); zero pixels map to zero through LN+SiLU.
    x_nhwc = jnp.transpose(x, (0, 2, 3, 1)).astype(jnp.float32)
    x_pad = jnp.pad(x_nhwc, ((0, 0), (ph, ph), (pw, pw), (0, 0)))
    # Overlapping height tiles with halo rows, built XLA-side so in-kernel BlockSpecs stay
    # simple non-overlapping blocks (HBM duplication factor = (TH + 2*ph) / TH).
    tiles = jnp.stack([x_pad[:, t * TH: t * TH + THp] for t in range(NT)], axis=1)
    tiles = tiles.reshape(B, NT, P, C_in)
    if P_pad != P:
        tiles = jnp.pad(tiles, ((0, 0), (0, 0), (0, P_pad - P), (0, 0)))

    # Conv weight as an im2col matrix (KH*KW*C_in, C_out); bf16 MXU operand.
    w_cols = jnp.transpose(conv_w, (2, 3, 1, 0)).reshape(K_cols, C_out).astype(jnp.bfloat16)
    g = params["norm_g"].reshape(1, C_in).astype(jnp.float32)

    # FiLM head precomputed once per batch element in XLA (silu -> Linear -> split); the
    # kernel only applies per-batch scale/shift (no per-tile M=1 matmul / dynamic slice).
    te = t_emb.astype(jnp.float32)
    emb = jnp.dot(jax.nn.silu(te), params["emb_w"].astype(jnp.float32)) \
        + params["emb_b"].astype(jnp.float32)
    scale = emb[:, :C_out].reshape(B, 1, C_out)
    shift = emb[:, C_out:].reshape(B, 1, C_out)

    kernel = partial(_conv_block_kernel, Wp=Wp, TH=TH, KH=KH, KW=KW,
                     C_in=C_in, C_out=C_out, eps=eps)

    # Per-step VMEM estimate -> explicit scoped-VMEM limit (defaults: 16 MiB v5e / 32 MiB
    # v6e,v7x).  Clamped below v7x's 64 MiB physical VMEM.
    step_bytes = (2 * P_pad * C_in * 4 + P_pad * K_cols * 2 + 3 * P_pad * C_in * 4
                  + P_pad * C_out * 4 + 2 * rows_out * C_out * 4 + 2 * K_cols * C_out * 2)
    vmem_limit = int(min(max(2 * step_bytes, 16 << 20), 48 << 20))

    cost = pl.CostEstimate(
        flops=2 * B * NT * P_pad * K_cols * C_out,
        transcendentals=2 * B * NT * P_pad * C_in,
        bytes_accessed=4 * tiles.size + 2 * w_cols.size
                       + 4 * (g.size + scale.size + shift.size)
                       + 4 * B * NT * rows_out * C_out,
    )

    out_tiles = pl.pallas_call(
        kernel,
        out_shape=jax.ShapeDtypeStruct((B, NT, rows_out, C_out), jnp.float32),
        grid=(B, NT),
        in_specs=[
            pl.BlockSpec((1, 1, P_pad, C_in), lambda b, t: (b, t, 0, 0)),   # x tile (+halo)
            pl.BlockSpec((1, C_in), lambda b, t: (0, 0)),                   # LN gain (resident)
            pl.BlockSpec((K_cols, C_out), lambda b, t: (0, 0)),             # im2col weights
            pl.BlockSpec((1, 1, C_out), lambda b, t: (b, 0, 0)),            # FiLM scale
            pl.BlockSpec((1, 1, C_out), lambda b, t: (b, 0, 0)),            # FiLM shift
        ],
        out_specs=pl.BlockSpec((1, 1, rows_out, C_out), lambda b, t: (b, t, 0, 0)),
        scratch_shapes=[pltpu.VMEM((P_pad, K_cols), jnp.bfloat16)],         # im2col buffer
        compiler_params=pltpu.CompilerParams(
            dimension_semantics=("parallel", "parallel"),
            vmem_limit_bytes=vmem_limit),
        cost_estimate=cost,
    )(tiles, g, w_cols, scale, shift)

    # (B, NT, TH*Wp, C_out) -> drop pad columns -> (B, H, W, C_out) -> NCHW.
    out = out_tiles.reshape(B, NT, TH, Wp, C_out)[:, :, :, :W, :]
    return jnp.transpose(out.reshape(B, H, W, C_out), (0, 3, 1, 2))


def _reference(x, t_emb, params, eps=1e-5):
    """Pure-JAX reference mirroring the PyTorch module (default config)."""
    g = params["norm_g"].reshape(1, -1, 1, 1)
    mean = jnp.mean(x, axis=1, keepdims=True)
    var = jnp.var(x, axis=1, keepdims=True)                   # population variance
    xn = (x - mean) * jax.lax.rsqrt(var + eps) * g
    a = xn * jax.nn.sigmoid(xn)
    conv = jax.lax.conv_general_dilated(
        a, params["conv_w"], window_strides=(1, 1), padding="SAME",
        dimension_numbers=("NCHW", "OIHW", "NCHW"),
        precision=jax.lax.Precision.HIGHEST)
    te = t_emb * jax.nn.sigmoid(t_emb)
    emb = jnp.dot(te, params["emb_w"], precision=jax.lax.Precision.HIGHEST) + params["emb_b"]
    C_out = conv.shape[1]
    scale, shift = emb[:, :C_out], emb[:, C_out:]
    return conv * (1.0 + scale[:, :, None, None]) + shift[:, :, None, None]


if __name__ == "__main__":
    key = jax.random.PRNGKey(0)
    B, C_in, C_out, H, W, K, emb_dim = 2, 4, 8, 16, 16, 3, 32
    k1, k2, k3, k4, k5, k6 = jax.random.split(key, 6)

    x = jax.random.normal(k1, (B, C_in, H, W), dtype=jnp.float32)
    t_emb = jax.random.normal(k2, (B, emb_dim), dtype=jnp.float32)
    params = {
        "norm_g": 1.0 + 0.1 * jax.random.normal(k3, (C_in,), dtype=jnp.float32),
        "conv_w": 0.2 * jax.random.normal(k4, (C_out, C_in, K, K), dtype=jnp.float32),
        "emb_w": 0.2 * jax.random.normal(k5, (emb_dim, 2 * C_out), dtype=jnp.float32),
        "emb_b": 0.1 * jax.random.normal(k6, (2 * C_out,), dtype=jnp.float32),
    }

    # tile_h=8 -> grid (B, NT) = (2, 2): exercises the spatial tiling / halo path and
    # gives 4 parallel steps (enough for both v7x TensorCores).
    out = conv_block_2d(x, t_emb, params, tile_h=8)
    jax.block_until_ready(out)

    ref = _reference(x, t_emb, params)
    assert out.shape == (B, C_out, H, W)
    max_err = float(jnp.max(jnp.abs(out - ref)))
    # bf16 MXU operands with f32 accumulation -> slightly looser tolerance than pure f32.
    assert jnp.allclose(out, ref, atol=2e-2, rtol=2e-2), max_err

    print("KERNEL_OK")
</pallas_src>

<mosaic_0001>
module attributes {stable_mosaic.version = 11 : i64} {
  func.func @_conv_block_kernel(%arg0: i32, %arg1: i32, %arg2: memref<1x1x184x4xf32, #tpu.memory_space<vmem>>, %arg3: memref<1x4xf32, #tpu.memory_space<vmem>>, %arg4: memref<36x8xbf16, #tpu.memory_space<vmem>>, %arg5: memref<1x1x8xf32, #tpu.memory_space<vmem>>, %arg6: memref<1x1x8xf32, #tpu.memory_space<vmem>>, %arg7: memref<1x1x144x8xf32, #tpu.memory_space<vmem>>, %arg8: memref<184x36xbf16, #tpu.memory_space<vmem>>) attributes {dimension_semantics = [#tpu.dimension_semantics<parallel>, #tpu.dimension_semantics<parallel>], iteration_bounds = array<i64: 2, 2>, scalar_prefetch = 0 : i64, scratch_operands = 1 : i64, tpu.core_type = #tpu.core_type<tc>, window_params = [{transform_indices = @transform_0, window_bounds = array<i64: 1, 1, 184, 4>}, {pipeline_mode = #tpu.pipeline_mode<synchronous>, transform_indices = @transform_1, window_bounds = array<i64: 1, 4>}, {pipeline_mode = #tpu.pipeline_mode<synchronous>, transform_indices = @transform_2, window_bounds = array<i64: 36, 8>}, {transform_indices = @transform_3, window_bounds = array<i64: 1, 1, 8>}, {transform_indices = @transform_4, window_bounds = array<i64: 1, 1, 8>}, {transform_indices = @transform_5, window_bounds = array<i64: 1, 1, 144, 8>}]} {
    %c0 = arith.constant 0 : index
    %c0_0 = arith.constant 0 : index
    %c0_1 = arith.constant 0 : index
    %c0_2 = arith.constant 0 : index
    %0 = vector.load %arg2[%c0, %c0_0, %c0_1, %c0_2] : memref<1x1x184x4xf32, #tpu.memory_space<vmem>>, vector<1x1x184x4xf32>
    %1 = vector.shape_cast %0 : vector<1x1x184x4xf32> to vector<184x4xf32>
    %cst = arith.constant dense<0.000000e+00> : vector<184xf32>
    %2 = vector.multi_reduction <add>, %1, %cst [1] : vector<184x4xf32> to vector<184xf32>
    %3 = vector.shape_cast %2 : vector<184xf32> to vector<184x1xf32>
    %cst_3 = arith.constant 4.000000e+00 : f32
    %4 = vector.broadcast %cst_3 : f32 to vector<184x1xf32>
    %5 = arith.divf %3, %4 : vector<184x1xf32>
    %6 = arith.mulf %1, %1 : vector<184x4xf32>
    %cst_4 = arith.constant dense<0.000000e+00> : vector<184xf32>
    %7 = vector.multi_reduction <add>, %6, %cst_4 [1] : vector<184x4xf32> to vector<184xf32>
    %8 = vector.shape_cast %7 : vector<184xf32> to vector<184x1xf32>
    %cst_5 = arith.constant 4.000000e+00 : f32
    %9 = vector.broadcast %cst_5 : f32 to vector<184x1xf32>
    %10 = arith.divf %8, %9 : vector<184x1xf32>
    %11 = arith.mulf %5, %5 : vector<184x1xf32>
    %12 = arith.subf %10, %11 : vector<184x1xf32>
    %13 = vector.broadcast %5 : vector<184x1xf32> to vector<184x4xf32>
    %14 = arith.subf %1, %13 : vector<184x4xf32>
    %cst_6 = arith.constant 9.99999974E-6 : f32
    %15 = vector.broadcast %cst_6 : f32 to vector<184x1xf32>
    %16 = arith.addf %12, %15 : vector<184x1xf32>
    %17 = math.rsqrt %16 : vector<184x1xf32>
    %18 = vector.broadcast %17 : vector<184x1xf32> to vector<184x4xf32>
    %19 = arith.mulf %14, %18 : vector<184x4xf32>
    %c0_7 = arith.constant 0 : index
    %c0_8 = arith.constant 0 : index
    %20 = vector.load %arg3[%c0_7, %c0_8] : memref<1x4xf32, #tpu.memory_space<vmem>>, vector<1x4xf32>
    %21 = vector.broadcast %20 : vector<1x4xf32> to vector<184x4xf32>
    %22 = arith.mulf %19, %21 : vector<184x4xf32>
    %cst_9 = arith.constant 0.000000e+00 : f32
    %23 = vector.broadcast %cst_9 : f32 to vector<184x4xf32>
    %24 = arith.subf %23, %22 : vector<184x4xf32>
    %25 = math.exp %24 : vector<184x4xf32>
    %cst_10 = arith.constant 1.000000e+00 : f32
    %26 = vector.broadcast %cst_10 : f32 to vector<184x4xf32>
    %27 = arith.addf %26, %25 : vector<184x4xf32>
    %28 = tpu.reciprocal %27 {approx = true} : vector<184x4xf32> -> vector<184x4xf32>
    %29 = arith.mulf %22, %28 : vector<184x4xf32>
    %30 = arith.truncf %29 : vector<184x4xf32> to vector<184x4xbf16>
    %c0_11 = arith.constant 0 : index
    %c0_12 = arith.constant 0 : index
    %31 = vector.load %arg8[%c0_11, %c0_12] : memref<184x36xbf16, #tpu.memory_space<vmem>>, vector<184x4xbf16>
    tpu.vector_store %arg8[%c0_11, %c0_12], %30 {strides = array<i32>} : memref<184x36xbf16, #tpu.memory_space<vmem>>, vector<184x4xbf16>,
    %c183_i32 = arith.constant 183 : i32
    %32 = tpu.dynamic_rotate %29 by %c183_i32 dim 0 : vector<184x4xf32>, i32 -> vector<184x4xf32>
    %33 = arith.truncf %32 : vector<184x4xf32> to vector<184x4xbf16>
    %c0_13 = arith.constant 0 : index
    %c4 = arith.constant 4 : index
    %34 = vector.load %arg8[%c0_13, %c4] : memref<184x36xbf16, #tpu.memory_space<vmem>>, vector<184x4xbf16>
    tpu.vector_store %arg8[%c0_13, %c4], %33 {strides = array<i32>} : memref<184x36xbf16, #tpu.memory_space<vmem>>, vector<184x4xbf16>,
    %c182_i32 = arith.constant 182 : i32
    %35 = tpu.dynamic_rotate %29 by %c182_i32 dim 0 : vector<184x4xf32>, i32 -> vector<184x4xf32>
    %36 = arith.truncf %35 : vector<184x4xf32> to vector<184x4xbf16>
    %c0_14 = arith.constant 0 : index
    %c8 = arith.constant 8 : index
    %37 = vector.load %arg8[%c0_14, %c8] : memref<184x36xbf16, #tpu.memory_space<vmem>>, vector<184x4xbf16>
    tpu.vector_store %arg8[%c0_14, %c8], %36 {strides = array<i32>} : memref<184x36xbf16, #tpu.memory_space<vmem>>, vector<184x4xbf16>,
    %c166_i32 = arith.constant 166 : i32
    %38 = tpu.dynamic_rotate %29 by %c166_i32 dim 0 : vector<184x4xf32>, i32 -> vector<184x4xf32>
    %39 = arith.truncf %38 : vector<184x4xf32> to vector<184x4xbf16>
    %c0_15 = arith.constant 0 : index
    %c12 = arith.constant 12 : index
    %40 = vector.load %arg8[%c0_15, %c12] : memref<184x36xbf16, #tpu.memory_space<vmem>>, vector<184x4xbf16>
    tpu.vector_store %arg8[%c0_15, %c12], %39 {strides = array<i32>} : memref<184x36xbf16, #tpu.memory_space<vmem>>, vector<184x4xbf16>,
    %c165_i32 = arith.constant 165 : i32
    %41 = tpu.dynamic_rotate %29 by %c165_i32 dim 0 : vector<184x4xf32>, i32 -> vector<184x4xf32>
    %42 = arith.truncf %41 : vector<184x4xf32> to vector<184x4xbf16>
    %c0_16 = arith.constant 0 : index
    %c16 = arith.constant 16 : index
    %43 = vector.load %arg8[%c0_16, %c16] : memref<184x36xbf16, #tpu.memory_space<vmem>>, vector<184x4xbf16>
    tpu.vector_store %arg8[%c0_16, %c16], %42 {strides = array<i32>} : memref<184x36xbf16, #tpu.memory_space<vmem>>, vector<184x4xbf16>,
    %c164_i32 = arith.constant 164 : i32
    %44 = tpu.dynamic_rotate %29 by %c164_i32 dim 0 : vector<184x4xf32>, i32 -> vector<184x4xf32>
    %45 = arith.truncf %44 : vector<184x4xf32> to vector<184x4xbf16>
    %c0_17 = arith.constant 0 : index
    %c20 = arith.constant 20 : index
    %46 = vector.load %arg8[%c0_17, %c20] : memref<184x36xbf16, #tpu.memory_space<vmem>>, vector<184x4xbf16>
    tpu.vector_store %arg8[%c0_17, %c20], %45 {strides = array<i32>} : memref<184x36xbf16, #tpu.memory_space<vmem>>, vector<184x4xbf16>,
    %c148_i32 = arith.constant 148 : i32
    %47 = tpu.dynamic_rotate %29 by %c148_i32 dim 0 : vector<184x4xf32>, i32 -> vector<184x4xf32>
    %48 = arith.truncf %47 : vector<184x4xf32> to vector<184x4xbf16>
    %c0_18 = arith.constant 0 : index
    %c24 = arith.constant 24 : index
    %49 = vector.load %arg8[%c0_18, %c24] : memref<184x36xbf16, #tpu.memory_space<vmem>>, vector<184x4xbf16>
    tpu.vector_store %arg8[%c0_18, %c24], %48 {strides = array<i32>} : memref<184x36xbf16, #tpu.memory_space<vmem>>, vector<184x4xbf16>,
    %c147_i32 = arith.constant 147 : i32
    %50 = tpu.dynamic_rotate %29 by %c147_i32 dim 0 : vector<184x4xf32>, i32 -> vector<184x4xf32>
    %51 = arith.truncf %50 : vector<184x4xf32> to vector<184x4xbf16>
    %c0_19 = arith.constant 0 : index
    %c28 = arith.constant 28 : index
    %52 = vector.load %arg8[%c0_19, %c28] : memref<184x36xbf16, #tpu.memory_space<vmem>>, vector<184x4xbf16>
    tpu.vector_store %arg8[%c0_19, %c28], %51 {strides = array<i32>} : memref<184x36xbf16, #tpu.memory_space<vmem>>, vector<184x4xbf16>,
    %c146_i32 = arith.constant 146 : i32
    %53 = tpu.dynamic_rotate %29 by %c146_i32 dim 0 : vector<184x4xf32>, i32 -> vector<184x4xf32>
    %54 = arith.truncf %53 : vector<184x4xf32> to vector<184x4xbf16>
    %c0_20 = arith.constant 0 : index
    %c32 = arith.constant 32 : index
    %55 = vector.load %arg8[%c0_20, %c32] : memref<184x36xbf16, #tpu.memory_space<vmem>>, vector<184x4xbf16>
    tpu.vector_store %arg8[%c0_20, %c32], %54 {strides = array<i32>} : memref<184x36xbf16, #tpu.memory_space<vmem>>, vector<184x4xbf16>,
    %c0_21 = arith.constant 0 : index
    %c0_22 = arith.constant 0 : index
    %56 = vector.load %arg8[%c0_21, %c0_22] : memref<184x36xbf16, #tpu.memory_space<vmem>>, vector<184x36xbf16>
    %c0_23 = arith.constant 0 : index
    %c0_24 = arith.constant 0 : index
    %57 = vector.load %arg4[%c0_23, %c0_24] : memref<36x8xbf16, #tpu.memory_space<vmem>>, vector<36x8xbf16>
    %cst_25 = arith.constant dense<0.000000e+00> : vector<184x8xf32>
    %58 = tpu.matmul %56, %57, %cst_25 {dimension_numbers = #tpu.dot_dimension_numbers<[1], [0], [0], [1], [0, 0, 1, 1], [], []>} : vector<184x36xbf16>, vector<36x8xbf16>, vector<184x8xf32> -> vector<184x8xf32>
    %59 = vector.extract_strided_slice %58 {offsets = [0, 0], sizes = [144, 8], strides = [1, 1]} : vector<184x8xf32> to vector<144x8xf32>
    %c0_26 = arith.constant 0 : index
    %c0_27 = arith.constant 0 : index
    %c0_28 = arith.constant 0 : index
    %60 = vector.load %arg5[%c0_26, %c0_27, %c0_28] : memref<1x1x8xf32, #tpu.memory_space<vmem>>, vector<1x1x8xf32>
    %61 = vector.shape_cast %60 : vector<1x1x8xf32> to vector<1x8xf32>
    %cst_29 = arith.constant 1.000000e+00 : f32
    %62 = vector.broadcast %cst_29 : f32 to vector<1x8xf32>
    %63 = arith.addf %62, %61 : vector<1x8xf32>
    %64 = vector.broadcast %63 : vector<1x8xf32> to vector<144x8xf32>
    %65 = arith.mulf %59, %64 : vector<144x8xf32>
    %c0_30 = arith.constant 0 : index
    %c0_31 = arith.constant 0 : index
    %c0_32 = arith.constant 0 : index
    %66 = vector.load %arg6[%c0_30, %c0_31, %c0_32] : memref<1x1x8xf32, #tpu.memory_space<vmem>>, vector<1x1x8xf32>
    %67 = vector.shape_cast %66 : vector<1x1x8xf32> to vector<1x8xf32>
    %68 = vector.broadcast %67 : vector<1x8xf32> to vector<144x8xf32>
    %69 = arith.addf %65, %68 : vector<144x8xf32>
    %c0_33 = arith.constant 0 : index
    %c0_34 = arith.constant 0 : index
    %c0_35 = arith.constant 0 : index
    %c0_36 = arith.constant 0 : index
    %70 = vector.load %arg7[%c0_33, %c0_34, %c0_35, %c0_36] : memref<1x1x144x8xf32, #tpu.memory_space<vmem>>, vector<1x1x144x8xf32>
    %71 = vector.shape_cast %70 : vector<1x1x144x8xf32> to vector<144x8xf32>
    %72 = vector.shape_cast %69 : vector<144x8xf32> to vector<1x1x144x8xf32>
    tpu.vector_store %arg7[%c0_33, %c0_34, %c0_35, %c0_36], %72 {strides = array<i32>} : memref<1x1x144x8xf32, #tpu.memory_space<vmem>>, vector<1x1x144x8xf32>,
    return
  }
  func.func @transform_0(%arg0: i32, %arg1: i32) -> (i32, i32, i32, i32) {
    %c0_i32 = arith.constant 0 : i32
    %c0_i32_0 = arith.constant 0 : i32
    %c0_i32_1 = arith.constant 0 : i32
    return %arg0, %arg1, %c0_i32, %c0_i32_0 : i32, i32, i32, i32
  }
  func.func @transform_1(%arg0: i32, %arg1: i32) -> (i32, i32) {
    %c0_i32 = arith.constant 0 : i32
    %c0_i32_0 = arith.constant 0 : i32
    %c0_i32_1 = arith.constant 0 : i32
    return %c0_i32, %c0_i32_0 : i32, i32
  }
  func.func @transform_2(%arg0: i32, %arg1: i32) -> (i32, i32) {
    %c0_i32 = arith.constant 0 : i32
    %c0_i32_0 = arith.constant 0 : i32
    %c0_i32_1 = arith.constant 0 : i32
    return %c0_i32, %c0_i32_0 : i32, i32
  }
  func.func @transform_3(%arg0: i32, %arg1: i32) -> (i32, i32, i32) {
    %c0_i32 = arith.constant 0 : i32
    %c0_i32_0 = arith.constant 0 : i32
    %c0_i32_1 = arith.constant 0 : i32
    return %arg0, %c0_i32, %c0_i32_0 : i32, i32, i32
  }
  func.func @transform_4(%arg0: i32, %arg1: i32) -> (i32, i32, i32) {
    %c0_i32 = arith.constant 0 : i32
    %c0_i32_0 = arith.constant 0 : i32
    %c0_i32_1 = arith.constant 0 : i32
    return %arg0, %c0_i32, %c0_i32_0 : i32, i32, i32
  }
  func.func @transform_5(%arg0: i32, %arg1: i32) -> (i32, i32, i32, i32) {
    %c0_i32 = arith.constant 0 : i32
    %c0_i32_0 = arith.constant 0 : i32
    %c0_i32_1 = arith.constant 0 : i32
    return %arg0, %arg1, %c0_i32, %c0_i32_0 : i32, i32, i32, i32
  }
}

</mosaic_0001>

<bundles_post_ra>
// kernel: tpu_custom_call.1
= control target key start
LH: loop header
LB: loop body
LE: loop exit
PB: predicated region body
PF: predicated region fallthrough
CT: control target
= control target key end

     0   :  { %s3142_s18 = smov 0   ;;  %s3144_s19 = smov 0   ;;  %s5573_s0 = inlined_call_operand.vmem [shape: f32[2,2,184,4], index: 0, kind: input, shape index: {}]   ;;  %s5574_s1 = inlined_call_operand.vmem [shape: f32[1,4], index: 1, kind: input, shape index: {}]   ;;  %s5575_s2 = inlined_call_operand.vmem [shape: bf16[36,8], index: 2, kind: input, shape index: {}]   ;;  %s5576_s3 = inlined_call_operand.vmem [shape: f32[2,1,8], index: 3, kind: input, shape index: {}]   ;;  %s5577_s4 = inlined_call_operand.vmem [shape: f32[2,1,8], index: 4, kind: input, shape index: {}]   ;;  %s5578_s5 = inlined_call_operand.vmem [shape: f32[2,2,144,8], index: 5, kind: output, shape index: {}]  }
   0x1   :  { %s3146_s20 = smov 0   ;;  %s3148_s21 = smov 0  }
   0x2   :  { %s3150_s22 = smov 0  }
   0x3 LB: > { %s24_s23 = sadd.s32 1, %s3093_s20  ;;  %s27_s24 = sadd.s32 1, %s3097_s21  ;;  %s3101_s22 = sphi %s3150_s22, %s15_s22   ;;  %s3097_s21 = sphi %s3148_s21, %s5732_s21   ;;  %s3093_s20 = sphi %s3146_s20, %s5731_s20   ;;  %s3089_s19 = sphi %s3144_s19, %s5730_s19   ;;  %s3085_s18 = sphi %s3142_s18, %s5729_s18  }
   0x4   : > { %p25_p0 = scmp.ge.s32.totalorder %s24_s23, 2  ;;  %p2775_p1 = scmp.ge.s32.totalorder %s3101_s22, 1 }
   0x5   : > { %p223_p2 = scmp.lt.s32.totalorder %s3101_s22, 5 }
   0x6   : > { %s5734_s23 = smov (%p25_p0, %s24_s23), 0  ;;  %s5736_s24 = smov (!%p25_p0, %s27_s24), %s3097_s21 }
   0x7   : > { %p224_p3 = pnand %p2775_p1, %p223_p2  ;;  %p29_p4 = scmp.ge.s32.totalorder %s5736_s24, 2 }
   0x9   : > { %s5738_s24 = smov (%p29_p4, %s5736_s24), 0  ;;  %227 = sbr.rel (%p224_p3) target bundleno = 1062 (0x426), region = 40 }
   0xe   : > { %p265_p5 = scmp.lt.s32.totalorder %s3089_s19, 1  ;;  %p267_p6 = scmp.lt.s32.totalorder %s3085_s18, 1  ;;  %vm313_vm0 = vcmask 31744  }
   0xf   : > { %s3104_s12 = smov 4   ;;  %s3105_s15 = smov 8  }
  0x10   : > { %s5740_s19 = smov (!%p265_p5, %s3089_s19), 1  ;;  %s5742_s18 = smov (!%p267_p6, %s3085_s18), 1 }
  0x11   : > { %s2867_s25 = smul.u32 46, %s5740_s19  ;;  %s279_s29 = scalar_lea.vmem %s5577_s4, %s5740_s19 }
  0x12   : > { %s2866_s26 = smul.u32 23, %s5742_s18  ;;  %s3106_s16 = smov 12  }
  0x13   : > { %s3107_s17 = smov 16   ;;  %s3110_s27 = smov 32  }
  0x14   : > { %s271_s30 = sadd.s32 %s2867_s25, %s2866_s26  ;;  %s3108_s25 = smov 20  }
  0x15   : > { %s2776_s6 = sshll.u32 %s271_s30, 3  ;;  %s3109_s26 = smov 24  }
  0x16   : > { %s3185_s9 = scalar_lea.vmem %s5573_s0, %s2776_s6  ;;  %s3111_s28 = smov 28  }
  0x17   : > { %v3188_v0 = vld [vmem:[%s3185_s9 + $0x20] sm:$0xff]  ;;  %v3191_v1 = vld [vmem:[%s3185_s9 + $0x10] sm:$0xff]  ;;  %v3203_v6 = vld [vmem:[%s3185_s9 + $0x28] sm:$0xff]  ;;  %s276_s13 = scalar_lea.vmem %s5576_s3, %s5740_s19  ;;  %s2868_s14 = smul.u32 18, %s5742_s18 }
  0x18   : > { %v3194_v2 = vld [vmem:[%s3185_s9] sm:$0xff]  ;;  %v326_v3 = vsel %vm313_vm0, %v3188_v0, 0.0  ;;  %v320_v4 = vsel %vm313_vm0, %v3191_v1, 0.0  ;;  %v3206_v7 = vld [vmem:[%s3185_s9 + $0x18] sm:$0xff]  ;;  %v3209_v8 = vld [vmem:[%s3185_s9 + $0x8] sm:$0xff]  ;;  %v329_v9 = vsel %vm313_vm0, %v3203_v6, 0.0  ;;  %v415_v48 = vmul.f32 %v3191_v1, %v3191_v1 }
  0x19   : > { %v314_v5 = vsel %vm313_vm0, %v3194_v2, 0.0  ;;  %327 = vadd.xlane.f32.xlu2 %v326_v3  ;;  %321 = vadd.xlane.f32.xlu1 %v320_v4  ;;  %v323_v10 = vsel %vm313_vm0, %v3206_v7, 0.0  ;;  %v317_v11 = vsel %vm313_vm0, %v3209_v8, 0.0  ;;  %v3218_v12 = vld [vmem:[%s3185_s9 + $0x40] sm:$0xff]  ;;  %v3221_v13 = vld [vmem:[%s3185_s9 + $0x38] sm:$0xff]  ;;  %v3224_v14 = vld [vmem:[%s3185_s9 + $0x30] sm:$0xff]  ;;  %v413_v42 = vmul.f32 %v3194_v2, %v3194_v2 }
  0x1a   : > { %315 = vadd.xlane.f32.xlu0 %v314_v5  ;;  %5620 = vst [vmem:[#allocation3_spill] sm:$0xff] %v3221_v13  ;;  %v338_v15 = vsel %vm313_vm0, %v3218_v12, 0.0  ;;  %v335_v16 = vsel %vm313_vm0, %v3221_v13, 0.0  ;;  %v332_v17 = vsel %vm313_vm0, %v3224_v14, 0.0  ;;  %v3233_v18 = vld [vmem:[%s3185_s9 + $0x58] sm:$0xff]  ;;  %v3236_v19 = vld [vmem:[%s3185_s9 + $0x50] sm:$0xff]  ;;  %v416_v49 = vmul.f32 %v3206_v7, %v3206_v7 }
  0x1b   : > { %5621 = vst [vmem:[#allocation4_spill] sm:$0xff] %v3233_v18  ;;  %v3239_v20 = vld [vmem:[%s3185_s9 + $0x48] sm:$0xff]  ;;  %v347_v21 = vsel %vm313_vm0, %v3233_v18, 0.0  ;;  %v344_v22 = vsel %vm313_vm0, %v3236_v19, 0.0  ;;  %v3248_v24 = vld [vmem:[%s3185_s9 + $0x70] sm:$0xff]  ;;  %v3254_v26 = vld [vmem:[%s3185_s9 + $0x60] sm:$0xff]  ;;  %v414_v50 = vmul.f32 %v3209_v8, %v3209_v8  ;;  %v418_v54 = vmul.f32 %v3203_v6, %v3203_v6 }
  0x1c   : > { %5622 = vst [vmem:[#allocation5_spill] sm:$0xff] %v3236_v19  ;;  %v341_v23 = vsel %vm313_vm0, %v3239_v20, 0.0  ;;  %v3251_v25 = vld [vmem:[%s3185_s9 + $0x68] sm:$0xff]  ;;  %v356_v27 = vsel %vm313_vm0, %v3248_v24, 0.0  ;;  %v350_v29 = vsel %vm313_vm0, %v3254_v26, 0.0  ;;  %v3266_v31 = vld [vmem:[%s3185_s9 + $0x80] sm:$0xff]  ;;  %v419_v55 = vmul.f32 %v3224_v14, %v3224_v14 }
  0x1d   : > { %5623 = vst [vmem:[#allocation6_spill] sm:$0xff] %v3248_v24  ;;  %v353_v28 = vsel %vm313_vm0, %v3251_v25, 0.0  ;;  %v3263_v30 = vld [vmem:[%s3185_s9 + $0x88] sm:$0xff]  ;;  %v3269_v32 = vld [vmem:[%s3185_s9 + $0x78] sm:$0xff]  ;;  %v362_v34 = vsel %vm313_vm0, %v3266_v31, 0.0  ;;  %v3278_v36 = vld [vmem:[%s3185_s9 + $0xa0] sm:$0xff]  ;;  %v417_v56 = vmul.f32 %v3188_v0, %v3188_v0  ;;  %v421_v60 = vmul.f32 %v3218_v12, %v3218_v12 }
  0x1e   : > { %5624 = vst [vmem:[#allocation7_spill] sm:$0xff] %v3251_v25  ;;  %v365_v33 = vsel %vm313_vm0, %v3263_v30, 0.0  ;;  %v359_v35 = vsel %vm313_vm0, %v3269_v32, 0.0  ;;  %v3281_v37 = vld [vmem:[%s3185_s9 + $0x98] sm:$0xff]  ;;  %v3284_v38 = vld [vmem:[%s3185_s9 + $0x90] sm:$0xff]  ;;  %v374_v39 = vsel %vm313_vm0, %v3278_v36, 0.0  ;;  %v422_v61 = vmul.f32 %v3239_v20, %v3239_v20 }
  0x1f   : > { %5625 = vst [vmem:[#allocation8_spill] sm:$0xff] %v3263_v30  ;;  %v371_v40 = vsel %vm313_vm0, %v3281_v37, 0.0  ;;  %v368_v41 = vsel %vm313_vm0, %v3284_v38, 0.0  ;;  %v3295_v43 = vld [vmem:[%s3185_s9 + $0xb0] sm:$0xff]  ;;  %v3298_v44 = vld [vmem:[%s3185_s9 + $0xa8] sm:$0xff]  ;;  %v436_v46 = vsel %vm313_vm0, %v413_v42, 0.0  ;;  %v420_v62 = vmul.f32 %v3221_v13, %v3221_v13 }
  0x20   : > { %5626 = vst [vmem:[#allocation9_spill] sm:$0xff] %v3266_v31  ;;  %v380_v45 = vsel %vm313_vm0, %v3295_v43, 0.0  ;;  %v377_v47 = vsel %vm313_vm0, %v3298_v44, 0.0  ;;  %v442_v51 = vsel %vm313_vm0, %v415_v48, 0.0  ;;  %v445_v52 = vsel %vm313_vm0, %v416_v49, 0.0 }
  0x21   : > { %330 = vadd.xlane.f32.xlu2 %v329_v9  ;;  %324 = vadd.xlane.f32.xlu1 %v323_v10  ;;  %5627 = vst [vmem:[#allocation10_spill] sm:$0xff] %v3278_v36  ;;  %v439_v53 = vsel %vm313_vm0, %v414_v50, 0.0  ;;  %v451_v57 = vsel %vm313_vm0, %v418_v54, 0.0  ;;  %v454_v58 = vsel %vm313_vm0, %v419_v55, 0.0  ;;  %v448_v59 = vsel %vm313_vm0, %v417_v56, 0.0 }
  0x22   : > { %318 = vadd.xlane.f32.xlu0 %v317_v11  ;;  %5628 = vst [vmem:[#allocation11_spill] sm:$0xff] %v3298_v44  ;;  %v460_v63 = vsel %vm313_vm0, %v421_v60, 0.0  ;;  %v463_v3 = vsel %vm313_vm0, %v422_v61, 0.0  ;;  %v457_v4 = vsel %vm313_vm0, %v420_v62, 0.0  ;;  %v424_v5 = vmul.f32 %v3233_v18, %v3233_v18 }
  0x23   : > { %v425_v9 = vmul.f32 %v3254_v26, %v3254_v26  ;;  %v423_v10 = vmul.f32 %v3236_v19, %v3236_v19  ;;  %v434_v42 = vmul.f32 %v3298_v44, %v3298_v44  ;;  %v435_v49 = vmul.f32 %v3295_v43, %v3295_v43 }
  0x24   : > { %v469_v11 = vsel %vm313_vm0, %v424_v5, 0.0  ;;  %v3103_v62 = vmov 4.0  }
  0x25   : > { %2921 = vrcp.f32 %v3103_v62 }
  0x29   : > { %339 = vadd.xlane.f32.xlu2 %v338_v15  ;;  %336 = vadd.xlane.f32.xlu1 %v335_v16  ;;  %v472_v15 = vsel %vm313_vm0, %v425_v9, 0.0  ;;  %v466_v16 = vsel %vm313_vm0, %v423_v10, 0.0 }
  0x2a   : > { %333 = vadd.xlane.f32.xlu0 %v332_v17  ;;  %v427_v17 = vmul.f32 %v3248_v24, %v3248_v24 }
  0x31   : > { %348 = vadd.xlane.f32.xlu2 %v347_v21  ;;  %345 = vadd.xlane.f32.xlu1 %v344_v22  ;;  %v428_v21 = vmul.f32 %v3269_v32, %v3269_v32  ;;  %v426_v22 = vmul.f32 %v3251_v25, %v3251_v25 }
  0x32   : > { %342 = vadd.xlane.f32.xlu0 %v341_v23  ;;  %v478_v23 = vsel %vm313_vm0, %v427_v17, 0.0 }
  0x39   : > { %357 = vadd.xlane.f32.xlu2 %v356_v27  ;;  %354 = vadd.xlane.f32.xlu1 %v353_v28  ;;  %v481_v27 = vsel %vm313_vm0, %v428_v21, 0.0  ;;  %v475_v28 = vsel %vm313_vm0, %v426_v22, 0.0 }
  0x3a   : > { %351 = vadd.xlane.f32.xlu0 %v350_v29  ;;  %v430_v29 = vmul.f32 %v3263_v30, %v3263_v30 }
  0x41   : > { %366 = vadd.xlane.f32.xlu2 %v365_v33  ;;  %363 = vadd.xlane.f32.xlu1 %v362_v34  ;;  %v431_v33 = vmul.f32 %v3284_v38, %v3284_v38  ;;  %v429_v34 = vmul.f32 %v3266_v31, %v3266_v31 }
  0x42   : > { %360 = vadd.xlane.f32.xlu0 %v359_v35  ;;  %v487_v35 = vsel %vm313_vm0, %v430_v29, 0.0 }
  0x49   : > { %375 = vadd.xlane.f32.xlu2 %v374_v39  ;;  %372 = vadd.xlane.f32.xlu1 %v371_v40  ;;  %v490_v39 = vsel %vm313_vm0, %v431_v33, 0.0  ;;  %v484_v40 = vsel %vm313_vm0, %v429_v34, 0.0 }
  0x4a   : > { %369 = vadd.xlane.f32.xlu0 %v368_v41  ;;  %v433_v41 = vmul.f32 %v3278_v36, %v3278_v36 }
  0x51   : > { %381 = vadd.xlane.f32.xlu1 %v380_v45  ;;  %437 = vadd.xlane.f32.xlu2 %v436_v46  ;;  %v432_v45 = vmul.f32 %v3281_v37, %v3281_v37  ;;  %v496_v46 = vsel %vm313_vm0, %v433_v41, 0.0 }
  0x52   : > { %378 = vadd.xlane.f32.xlu0 %v377_v47  ;;  %v499_v47 = vsel %vm313_vm0, %v434_v42, 0.0 }
  0x53   : > { %v493_v48 = vsel %vm313_vm0, %v432_v45, 0.0 }
  0x59   : > { %443 = vadd.xlane.f32.xlu1 %v442_v51  ;;  %446 = vadd.xlane.f32.xlu2 %v445_v52 }
  0x5a   : > { %440 = vadd.xlane.f32.xlu0 %v439_v53  ;;  %v502_v53 = vsel %vm313_vm0, %v435_v49, 0.0 }
  0x61   : > { %452 = vadd.xlane.f32.xlu1 %v451_v57  ;;  %455 = vadd.xlane.f32.xlu2 %v454_v58 }
  0x62   : > { %449 = vadd.xlane.f32.xlu0 %v448_v59 }
  0x69   : > { %461 = vadd.xlane.f32.xlu1 %v460_v63  ;;  %464 = vadd.xlane.f32.xlu2 %v463_v3  ;;  %v2922_v3 = vpop.eup %2921 }
  0x6a   : > { %458 = vadd.xlane.f32.xlu0 %v457_v4  ;;  %v384_v9 = vmul.f32 4.0, %v2922_v3  ;;  %vm388_vm1 = vweird.f32 %v2922_v3 }
  0x6c   : > { %v385_v10 = vsub.f32 1.0, %v384_v9 }
  0x6e   : > { %v386_v17 = vmul.f32 %v2922_v3, %v385_v10 }
  0x70   : > { %v387_v21 = vadd.f32 %v2922_v3, %v386_v17 }
  0x71   : > { %470 = vadd.xlane.f32.xlu1 %v469_v11  ;;  %473 = vadd.xlane.f32.xlu2 %v472_v15 }
  0x72   : > { %467 = vadd.xlane.f32.xlu0 %v466_v16 }
  0x79   : > { %479 = vadd.xlane.f32.xlu1 %v478_v23  ;;  %482 = vadd.xlane.f32.xlu2 %v481_v27 }
  0x7a   : > { %476 = vadd.xlane.f32.xlu0 %v475_v28  ;;  %v3383_v28 = vsel %vm388_vm1, %v2922_v3, %v387_v21 }
  0x81   : > { %488 = vadd.xlane.f32.xlu1 %v487_v35  ;;  %491 = vadd.xlane.f32.xlu2 %v490_v39 }
  0x82   : > { %485 = vadd.xlane.f32.xlu0 %v484_v40 }
  0x89   : > { %497 = vadd.xlane.f32.xlu1 %v496_v46  ;;  %500 = vadd.xlane.f32.xlu2 %v499_v47 }
  0x8a   : > { %494 = vadd.xlane.f32.xlu0 %v493_v48 }
  0x8c   : > { %v328_v50 = vpop.xlane.xlu2 %327  ;;  %v322_v51 = vpop.xlane.xlu1 %321 }
  0x8d   : > { %v316_v52 = vpop.xlane.xlu0 %315  ;;  %v3389_v33 = vmul.f32 %v3383_v28, %v328_v50  ;;  %v3392_v34 = vmul.f32 %v3383_v28, %v322_v51 }
  0x8e   : > { %v3386_v29 = vmul.f32 %v3383_v28, %v316_v52 }
  0x8f   : > { %v3409_v47 = vmul.f32 %v3389_v33, %v3389_v33  ;;  %v530_v50 = vmul.f32 %v3392_v34, %v3392_v34 }
  0x90   : > { %v528_v40 = vmul.f32 %v3386_v29, %v3386_v29 }
  0x92   : > { %503 = vadd.xlane.f32.xlu0 %v502_v53 }
  0x94   : > { %v331_v54 = vpop.xlane.xlu2 %330  ;;  %v325_v55 = vpop.xlane.xlu1 %324 }
  0x95   : > { %v319_v56 = vpop.xlane.xlu0 %318  ;;  %v3399_v41 = vmul.f32 %v3383_v28, %v331_v54  ;;  %v3402_v42 = vmul.f32 %v3383_v28, %v325_v55 }
  0x96   : > { %v3412_v48 = vmul.f32 %v3383_v28, %v319_v56 }
  0x97   : > { %v3433_v62 = vmul.f32 %v3399_v41, %v3399_v41  ;;  %v531_v3 = vmul.f32 %v3402_v42, %v3402_v42 }
  0x9c   : > { %v340_v57 = vpop.xlane.xlu2 %339  ;;  %v337_v58 = vpop.xlane.xlu1 %336 }
  0x9d   : > { %v334_v59 = vpop.xlane.xlu0 %333  ;;  %v3419_v51 = vmul.f32 %v3383_v28, %v340_v57  ;;  %v3426_v55 = vmul.f32 %v3383_v28, %v337_v58  ;;  %v529_v58 = vmul.f32 %v3412_v48, %v3412_v48 }
  0x9e   : > { %v3429_v56 = vmul.f32 %v3383_v28, %v334_v59 }
  0x9f   : > { %5629 = vst [vmem:[#allocation12_spill] sm:$0xff] %v3426_v55 }
  0xa4   : > { %v349_v60 = vpop.xlane.xlu2 %348  ;;  %v346_v61 = vpop.xlane.xlu1 %345 }
  0xa5   : > { %v343_v63 = vpop.xlane.xlu0 %342  ;;  %v3446_v59 = vmul.f32 %v3383_v28, %v349_v60  ;;  %v3449_v17 = vmul.f32 %v3383_v28, %v346_v61  ;;  %v534_v61 = vmul.f32 %v3429_v56, %v3429_v56 }
  0xa7   : > { %5630 = vst [vmem:[#allocation13_spill] sm:$0xff] %v3446_v59  ;;  %v3480_v60 = vmul.f32 %v3446_v59, %v3446_v59 }
  0xa8   : > { %5631 = vst [vmem:[#allocation14_spill] sm:$0xff] %v3449_v17 }
  0xac   : > { %v358_v4 = vpop.xlane.xlu2 %357  ;;  %v355_v43 = vpop.xlane.xlu1 %354 }
  0xad   : > { %v352_v5 = vpop.xlane.xlu0 %351  ;;  %v3474_v21 = vmul.f32 %v3383_v28, %v358_v4  ;;  %v3490_v4 = vmul.f32 %v3383_v28, %v355_v43 }
  0xaf   : > { %5632 = vst [vmem:[#allocation15_spill] sm:$0xff] %v3474_v21  ;;  %v3505_v43 = vmul.f32 %v3474_v21, %v3474_v21  ;;  %v3526_v44 = vmul.f32 %v3490_v4, %v3490_v4 }
  0xb0   : > { %5633 = vst [vmem:[#allocation16_spill] sm:$0xff] %v3490_v4 }
  0xb4   : > { %v3371_v11 = vpop.xlane.xlu2 %366  ;;  %v3373_v15 = vpop.xlane.xlu1 %363 }
  0xb5   : > { %v3375_v16 = vpop.xlane.xlu0 %360 }
  0xbc   : > { %v3377_v22 = vpop.xlane.xlu2 %375  ;;  %v3379_v23 = vpop.xlane.xlu1 %372 }
  0xbd   : > { %v3381_v27 = vpop.xlane.xlu0 %369  ;;  %v3560_v19 = vmul.f32 %v3383_v28, %v3377_v22 }
  0xbf   : > { %5638 = vst [vmem:[#allocation21_spill] sm:$0xff] %v3560_v19 }
  0xc4   : > { %v3394_v35 = vpop.xlane.xlu1 %381  ;;  %v438_v39 = vpop.xlane.xlu2 %437 }
  0xc5   : > { %v505_v45 = vmul.f32 %v438_v39, %v3383_v28  ;;  %v3405_v46 = vpop.xlane.xlu0 %378  ;;  %v3455_v39 = vmul.f32 %v3419_v51, %v3419_v51 }
  0xc7   : > { %v551_v52 = vsub.f32 %v505_v45, %v528_v40  ;;  %v3462_v45 = vmul.f32 %v3426_v55, %v3426_v55  ;;  %v3486_v55 = vmul.f32 %v3449_v17, %v3449_v17  ;;  %v3572_v17 = vmul.f32 %v3383_v28, %v3379_v23 }
  0xc8   : > { %v3588_v23 = vmul.f32 %v3383_v28, %v3381_v27  ;;  %v3603_v27 = vld [vmem:[%s5574_s1] ss:$0 sm:$0xff] }
  0xc9   : > { %v3439_v9 = vadd.f32 1e-05, %v551_v52  ;;  %v3469_v52 = vmul.f32 %v3383_v28, %v343_v63  ;;  %v3598_v31 = vmul.f32 %v3572_v17, %v3572_v17 }
  0xcb   : > { %2923 = vrsqrt.f32 %v3439_v9  ;;  %v3499_v63 = vmul.f32 %v3469_v52, %v3469_v52  ;;  %vm626_vm3 = vweird.f32 %v3439_v9  ;;  %5640 = vst [vmem:[#allocation23_spill] sm:$0xff] %v3598_v31 }
  0xcc   : > { %v444_v49 = vpop.xlane.xlu1 %443  ;;  %v447_v57 = vpop.xlane.xlu2 %446 }
  0xcd   : > { %v507_v10 = vmul.f32 %v444_v49, %v3383_v28  ;;  %v508_v53 = vmul.f32 %v447_v57, %v3383_v28  ;;  %v441_v54 = vpop.xlane.xlu0 %440  ;;  %v3493_v49 = vmul.f32 %v3383_v28, %v352_v5  ;;  %v3509_v5 = vmul.f32 %v3383_v28, %v3371_v11 }
  0xce   : > { %v506_v40 = vmul.f32 %v441_v54, %v3383_v28 }
  0xcf   : > { %v553_v57 = vsub.f32 %v507_v10, %v530_v50  ;;  %v554_v13 = vsub.f32 %v508_v53, %v531_v3  ;;  %5634 = vst [vmem:[#allocation17_spill] sm:$0xff] %v3509_v5  ;;  %v3519_v10 = vmul.f32 %v3383_v28, %v3373_v15  ;;  %v3544_v11 = vmul.f32 %v3509_v5, %v3509_v5 }
  0xd0   : > { %v552_v18 = vsub.f32 %v506_v40, %v529_v58 }
  0xd1   : > { %v2924_v54 = vpop.eup %2923  ;;  %v3511_v50 = vadd.f32 1e-05, %v553_v57  ;;  %v3513_v53 = vadd.f32 1e-05, %v554_v13  ;;  %5635 = vst [vmem:[#allocation18_spill] sm:$0xff] %v3519_v10  ;;  %v3532_v13 = vmul.f32 %v3493_v49, %v3493_v49 }
  0xd2   : > { %v621_v58 = vmul.f32 %v2924_v54, %v3439_v9  ;;  %v3522_v40 = vadd.f32 1e-05, %v552_v18  ;;  %v3539_v18 = vmul.f32 %v3383_v28, %v3375_v16  ;;  %vm627_vm2 = vweird.f32 %v2924_v54 }
  0xd3   : > { %2925 = vrsqrt.f32 %v3511_v50  ;;  %vm628_vm4 = vmor %vm626_vm3, %vm627_vm2  ;;  %vm646_vm5 = vweird.f32 %v3511_v50  ;;  %vm656_vm6 = vweird.f32 %v3513_v53 }
  0xd4   : > { %5636 = vst [vmem:[#allocation19_spill] sm:$0xff] %v3539_v18  ;;  %v622_v57 = vmul.f32 %v2924_v54, %v621_v58  ;;  %2927 = vrsqrt.f32 %v3513_v53  ;;  %v453_v3 = vpop.xlane.xlu1 %452  ;;  %v456_v59 = vpop.xlane.xlu2 %455  ;;  %v3553_v58 = vmul.f32 %v3519_v10, %v3519_v10  ;;  %v3565_v16 = vmul.f32 %v3539_v18, %v3539_v18 }
  0xd5   : > { %2929 = vrsqrt.f32 %v3522_v40  ;;  %v510_v4 = vmul.f32 %v453_v3, %v3383_v28  ;;  %v511_v25 = vmul.f32 %v456_v59, %v3383_v28  ;;  %v450_v15 = vpop.xlane.xlu0 %449  ;;  %vm636_vm11 = vweird.f32 %v3522_v40 }
  0xd6   : > { %5637 = vst [vmem:[#allocation20_spill] sm:$0xff] %v3553_v58  ;;  %v623_v21 = vmul.f32 0.5, %v622_v57  ;;  %v509_v24 = vmul.f32 %v450_v15, %v3383_v28 }
  0xd7   : > { %v556_v59 = vsub.f32 %v510_v4, %v3433_v62  ;;  %v557_v3 = vsub.f32 %v511_v25, %v534_v61 }
  0xd8   : > { %v624_v5 = vsub.f32 1.5, %v623_v21  ;;  %v555_v57 = vsub.f32 %v509_v24, %v3409_v47  ;;  %v3584_v47 = vmul.f32 %v3560_v19, %v3560_v19 }
  0xd9   : > { %v2926_v30 = vpop.eup %2925  ;;  %v3574_v22 = vadd.f32 1e-05, %v556_v59  ;;  %v3576_v62 = vadd.f32 1e-05, %v557_v3 }
  0xda   : > { %v2928_v25 = vpop.eup %2927  ;;  %v625_v61 = vmul.f32 %v2924_v54, %v624_v5  ;;  %v641_v21 = vmul.f32 %v2926_v30, %v3511_v50  ;;  %v3580_v4 = vadd.f32 1e-05, %v555_v57  ;;  %5639 = vst [vmem:[#allocation22_spill] sm:$0xff] %v3584_v47  ;;  %v5641_v47 = vsub.f32 %v3194_v2, %v3386_v29 }
  0xdb   : > { %v2930_v24 = vpop.eup %2929  ;;  %v651_v59 = vmul.f32 %v2928_v25, %v3513_v53  ;;  %2931 = vrsqrt.f32 %v3574_v22  ;;  %vm647_vm7 = vweird.f32 %v2926_v30  ;;  %vm657_vm8 = vweird.f32 %v2928_v25 }
  0xdc   : > { %v629_v5 = vsel %vm628_vm4, %v2924_v54, %v625_v61  ;;  %v642_v3 = vmul.f32 %v2926_v30, %v641_v21  ;;  %v631_v57 = vmul.f32 %v2930_v24, %v3522_v40  ;;  %v462_v15 = vpop.xlane.xlu1 %461  ;;  %v465_v10 = vpop.xlane.xlu2 %464  ;;  %2933 = vrsqrt.f32 %v3576_v62  ;;  %vm648_vm10 = vmor %vm646_vm5, %vm647_vm7 }
  0xdd   : > { %v850_v58 = vmul.f32 %v629_v5, %v5641_v47  ;;  %v652_v9 = vmul.f32 %v2928_v25, %v651_v59  ;;  %2935 = vrsqrt.f32 %v3580_v4  ;;  %v513_v19 = vmul.f32 %v462_v15, %v3383_v28  ;;  %vm658_vm13 = vmor %vm656_vm6, %vm657_vm8 }
  0xde   : > { %v643_v54 = vmul.f32 0.5, %v642_v3  ;;  %v632_v61 = vmul.f32 %v2930_v24, %v631_v57  ;;  %v514_v36 = vmul.f32 %v465_v10, %v3383_v28  ;;  %vm637_vm9 = vweird.f32 %v2930_v24 }
  0xdf   : > { %v653_v21 = vmul.f32 0.5, %v652_v9  ;;  %v3615_v47 = vmul.f32 %v3603_v27, %v850_v58  ;;  %v559_v5 = vsub.f32 %v513_v19, %v3455_v39  ;;  %vm676_vm12 = vweird.f32 %v3574_v22  ;;  %vm638_vm14 = vmor %vm636_vm11, %vm637_vm9 }
  0xe0   : > { %v644_v31 = vsub.f32 1.5, %v643_v54  ;;  %v633_v2 = vmul.f32 0.5, %v632_v61  ;;  %v560_v3 = vsub.f32 %v514_v36, %v3499_v63  ;;  %v5642_v50 = vsub.f32 %v3191_v1, %v3392_v34 }
  0xe1   : > { %v2932_v29 = vpop.eup %2931  ;;  %v654_v59 = vsub.f32 1.5, %v653_v21  ;;  %v3624_v58 = vadd.f32 1e-05, %v559_v5  ;;  %v900_v63 = vsub.f32 0.0, %v3615_v47  ;;  %v5644_v1 = vsub.f32 %v3209_v8, %v3412_v48 }
  0xe2   : > { %v645_v9 = vmul.f32 %v2926_v30, %v644_v31  ;;  %v634_v57 = vsub.f32 1.5, %v633_v2  ;;  %v671_v15 = vmul.f32 %v2932_v29, %v3574_v22  ;;  %v2934_v18 = vpop.eup %2933  ;;  %v3637_v21 = vadd.f32 1e-05, %v560_v3 }
  0xe3   : > { %v655_v10 = vmul.f32 %v2928_v25, %v654_v59  ;;  %v3626_v54 = vpop.eup %2935  ;;  %v681_v39 = vmul.f32 %v2934_v18, %v3576_v62  ;;  %vm677_vm15 = vweird.f32 %v2932_v29  ;;  %2937 = vrsqrt.f32 %v3624_v58 }
  0xe4   : > { %v649_v19 = vsel %vm648_vm10, %v2926_v30, %v645_v9  ;;  %v635_v31 = vmul.f32 %v2930_v24, %v634_v57  ;;  %v672_v36 = vmul.f32 %v2932_v29, %v671_v15  ;;  %v5643_v30 = vsub.f32 %v3206_v7, %v3402_v42  ;;  %v459_v9 = vpop.xlane.xlu0 %458  ;;  %vm678_vm1 = vmor %vm676_vm12, %vm677_vm15  ;;  %v471_v22 = vpop.xlane.xlu1 %470 }
  0xe5   : > { %v852_v40 = vmul.f32 %v649_v19, %v5642_v50  ;;  %v659_v61 = vsel %vm658_vm13, %v2928_v25, %v655_v10  ;;  %v682_v5 = vmul.f32 %v2934_v18, %v681_v39  ;;  %v661_v25 = vmul.f32 %v3626_v54, %v3580_v4 }
  0xe6   : > { %v853_v53 = vmul.f32 %v659_v61, %v5643_v30  ;;  %v639_v2 = vsel %vm638_vm14, %v2930_v24, %v635_v31  ;;  %v673_v59 = vmul.f32 0.5, %v672_v36  ;;  %v923_v24 = vmul.f32 1.442695, %v900_v63 }
  0xe7   : > { %v3643_v57 = vmul.f32 %v3603_v27, %v852_v40  ;;  %v851_v34 = vmul.f32 %v639_v2, %v5644_v1  ;;  %v683_v42 = vmul.f32 0.5, %v682_v5  ;;  %vm687_vm0 = vweird.f32 %v2934_v18 }
  0xe8   : > { %v3651_v3 = vmul.f32 %v3603_v27, %v853_v53  ;;  %v674_v7 = vsub.f32 1.5, %v673_v59  ;;  %v662_v15 = vmul.f32 %v3626_v54, %v661_v25  ;;  %v512_v10 = vmul.f32 %v459_v9, %v3383_v28 }
  0xe9   : > { %v902_v8 = vsub.f32 0.0, %v3643_v57  ;;  %v684_v19 = vsub.f32 1.5, %v683_v42  ;;  %2939 = vrsqrt.f32 %v3637_v21  ;;  %v593_v31 = vsub.f32 %v3281_v37, %v3572_v17  ;;  %v3678_v59 = vpop.eup %2937 }
  0xea   : > { %v675_v48 = vmul.f32 %v2932_v29, %v674_v7  ;;  %v3662_v36 = vmul.f32 %v3588_v23, %v3588_v23  ;;  %v3665_v39 = vmul.f32 %v3603_v27, %v851_v34  ;;  %v663_v63 = vmul.f32 0.5, %v662_v15 }
  0xeb   : > { %v903_v50 = vsub.f32 0.0, %v3651_v3  ;;  %v685_v61 = vmul.f32 %v2934_v18, %v684_v19  ;;  %vm686_vm2 = vweird.f32 %v3576_v62  ;;  %v5645_v30 = vsub.f32 %v3203_v6, %v3399_v41 }
  0xec   : > { %v679_v40 = vsel %vm678_vm1, %v2932_v29, %v675_v48  ;;  %vm688_vm3 = vmor %vm686_vm2, %vm687_vm0  ;;  %v664_v2 = vsub.f32 1.5, %v663_v63  ;;  %vm666_vm4 = vweird.f32 %v3580_v4  ;;  %vm667_vm5 = vweird.f32 %v3626_v54 }
  0xed   : > { %v855_v53 = vmul.f32 %v679_v40, %v5645_v30  ;;  %2941 = vpow2.f32 %v923_v24  ;;  %v927_v5 = vmul.f32 1.442695, %v902_v8  ;;  %v689_v29 = vsel %vm688_vm3, %v2934_v18, %v685_v61  ;;  %vm668_vm6 = vmor %vm666_vm4, %vm667_vm5 }
  0xee   : > { %v558_v9 = vsub.f32 %v512_v10, %v3462_v45  ;;  %v901_v62 = vsub.f32 0.0, %v3665_v39  ;;  %v5646_v41 = vsub.f32 %v3224_v14, %v3429_v56  ;;  %v665_v4 = vmul.f32 %v3626_v54, %v664_v2  ;;  %v474_v2 = vpop.xlane.xlu2 %473 }
  0xef   : > { %v3683_v6 = vmul.f32 %v3603_v27, %v855_v53  ;;  %v2940_v34 = vpop.eup %2939  ;;  %v929_v25 = vmul.f32 1.442695, %v903_v50  ;;  %v701_v7 = vmul.f32 %v3678_v59, %v3624_v58  ;;  %v516_v45 = vmul.f32 %v471_v22, %v3383_v28 }
  0xf0   : > { %v856_v1 = vmul.f32 %v689_v29, %v5646_v41  ;;  %v3691_v18 = vadd.f32 1e-05, %v558_v9  ;;  %v669_v14 = vsel %vm668_vm6, %v3626_v54, %v665_v4  ;;  %v711_v56 = vmul.f32 %v2940_v34, %v3637_v21 }
  0xf1   : > { %v905_v42 = vsub.f32 0.0, %v3683_v6  ;;  %v3702_v15 = vmul.f32 %v3383_v28, %v3394_v35  ;;  %v5647_v10 = vsub.f32 %v3188_v0, %v3389_v33  ;;  %v702_v48 = vmul.f32 %v3678_v59, %v701_v7  ;;  %v468_v7 = vpop.xlane.xlu0 %467 }
  0xf2   : > { %v3696_v24 = vmul.f32 %v3603_v27, %v856_v1  ;;  %2943 = vrsqrt.f32 %v3691_v18  ;;  %v592_v19 = vsub.f32 %v3284_v38, %v3588_v23  ;;  %v925_v63 = vmul.f32 1.442695, %v901_v62 }
  0xf3   : > { %v854_v8 = vmul.f32 %v669_v14, %v5647_v10  ;;  %v712_v50 = vmul.f32 %v2940_v34, %v711_v56  ;;  %v2942_v40 = vpop.eup %2941  ;;  %2945 = vpow2.f32 %v927_v5  ;;  %v703_v61 = vmul.f32 0.5, %v702_v48  ;;  %v480_v56 = vpop.xlane.xlu1 %479 }
  0xf4   : > { %v906_v54 = vsub.f32 0.0, %v3696_v24  ;;  %v562_v0 = vsub.f32 %v516_v45, %v3480_v60  ;;  %v3718_v33 = vmul.f32 %v3383_v28, %v3405_v46  ;;  %2947 = vpow2.f32 %v929_v25 }
  0xf5   : > { %v3713_v35 = vmul.f32 %v3603_v27, %v854_v8  ;;  %v933_v30 = vmul.f32 1.442695, %v905_v42  ;;  %v713_v53 = vmul.f32 0.5, %v712_v50  ;;  %v3722_v22 = vmul.f32 %v3702_v15, %v3702_v15 }
  0xf6   : > { %v935_v29 = vmul.f32 1.442695, %v906_v54  ;;  %v704_v5 = vsub.f32 1.5, %v703_v61  ;;  %vm707_vm7 = vweird.f32 %v3678_v59  ;;  %2949 = vpow2.f32 %v925_v63 }
  0xf7   : > { %v714_v9 = vsub.f32 1.5, %v713_v53  ;;  %vm717_vm8 = vweird.f32 %v2940_v34  ;;  %v3725_v60 = vadd.f32 1e-05, %v562_v0  ;;  %v904_v46 = vsub.f32 0.0, %v3713_v35 }
  0xf8   : > { %v3727_v62 = vpop.eup %2943  ;;  %v705_v41 = vmul.f32 %v3678_v59, %v704_v5  ;;  %vm706_vm9 = vweird.f32 %v3624_v58  ;;  %v517_v1 = vmul.f32 %v474_v2, %v3383_v28  ;;  %2951 = vpow2.f32 %v933_v30 }
  0xf9   : > { %vm708_vm10 = vmor %vm706_vm9, %vm707_vm7  ;;  %v715_v4 = vmul.f32 %v2940_v34, %v714_v9  ;;  %vm716_vm11 = vweird.f32 %v3637_v21  ;;  %v691_v25 = vmul.f32 %v3727_v62, %v3691_v18  ;;  %v2946_v45 = vpop.eup %2945  ;;  %v969_v42 = vadd.f32 1.0, %v2942_v40 }
  0xfa   : > { %2953 = vpow2.f32 %v935_v29  ;;  %v709_v14 = vsel %vm708_vm10, %v3678_v59, %v705_v41  ;;  %vm718_vm12 = vmor %vm716_vm11, %vm717_vm8  ;;  %v563_v58 = vsub.f32 %v517_v1, %v3532_v13  ;;  %v2948_v10 = vpop.eup %2947  ;;  %v5648_v8 = vsub.f32 %v3218_v12, %v3419_v51  ;;  %v483_v1 = vpop.xlane.xlu2 %482 }
  0xfb   : > { %v719_v21 = vsel %vm718_vm12, %v2940_v34, %v715_v4  ;;  %v692_v63 = vmul.f32 %v3727_v62, %v691_v25  ;;  %2955 = vrsqrt.f32 %v3725_v60  ;;  %v931_v54 = vmul.f32 1.442695, %v904_v46 }
  0xfc   : > { %v858_v48 = vmul.f32 %v709_v14, %v5648_v8  ;;  %v5649_v50 = vsub.f32 %v3239_v20, %v3469_v52  ;;  %v3747_v40 = vadd.f32 1e-05, %v563_v58  ;;  %v515_v13 = vmul.f32 %v468_v7, %v3383_v28  ;;  %v2950_v61 = vpop.eup %2949 }
  0xfd   : > { %v3752_v0 = vmul.f32 %v3718_v33, %v3718_v33  ;;  %v693_v51 = vmul.f32 0.5, %v692_v63  ;;  %v519_v34 = vmul.f32 %v480_v56, %v3383_v28  ;;  %2957 = vrcp.f32 %v969_v42  ;;  %v5650_v42 = vld [vmem:[#allocation11_spill] sm:$0xff] }
  0xfe   : > { %v859_v59 = vmul.f32 %v719_v21, %v5649_v50  ;;  %v3755_v12 = vmul.f32 %v3603_v27, %v858_v48  ;;  %v971_v30 = vadd.f32 1.0, %v2946_v45  ;;  %v972_v53 = vadd.f32 1.0, %v2948_v10  ;;  %v2952_v52 = vpop.eup %2951  ;;  %v5652_v48 = vld [vmem:[#allocation12_spill] sm:$0xff] }
  0xff   : > { %v694_v29 = vsub.f32 1.5, %v693_v51  ;;  %vm697_vm13 = vweird.f32 %v3727_v62  ;;  %2959 = vrsqrt.f32 %v3747_v40  ;;  %v970_v9 = vadd.f32 1.0, %v2950_v61 }
 0x100   : > { %v3759_v20 = vmul.f32 %v3603_v27, %v859_v59  ;;  %v908_v2 = vsub.f32 0.0, %v3755_v12  ;;  %v2954_v5 = vpop.eup %2953  ;;  %2961 = vpow2.f32 %v931_v54  ;;  %v561_v41 = vsub.f32 %v515_v13, %v3486_v55  ;;  %v477_v59 = vpop.xlane.xlu0 %476 }
 0x101   : > { %v3766_v4 = vpop.eup %2955  ;;  %v695_v7 = vmul.f32 %v3727_v62, %v694_v29  ;;  %vm696_vm14 = vweird.f32 %v3691_v18  ;;  %v565_v45 = vsub.f32 %v519_v34, %v3505_v43  ;;  %v595_v14 = vsub.f32 %v5650_v42, %v3718_v33  ;;  %v5651_v43 = vld [vmem:[#allocation3_spill] sm:$0xff]  ;;  %v489_v29 = vpop.xlane.xlu1 %488 }
 0x102   : > { %v909_v46 = vsub.f32 0.0, %v3759_v20  ;;  %v939_v25 = vmul.f32 1.442695, %v908_v2  ;;  %2963 = vrcp.f32 %v971_v30  ;;  %vm698_vm15 = vmor %vm696_vm14, %vm697_vm13  ;;  %v731_v55 = vmul.f32 %v3766_v4, %v3725_v60 }
 0x103   : > { %2965 = vrcp.f32 %v972_v53  ;;  %v699_v56 = vsel %vm698_vm15, %v3727_v62, %v695_v7  ;;  %v3778_v10 = vadd.f32 1e-05, %v561_v41  ;;  %v520_v18 = vmul.f32 %v483_v1, %v3383_v28  ;;  %v2958_v8 = vpop.eup %2957 }
 0x104   : > { %v941_v58 = vmul.f32 1.442695, %v909_v46  ;;  %2967 = vrcp.f32 %v970_v9  ;;  %v5653_v21 = vsub.f32 %v5651_v43, %v5652_v48  ;;  %v732_v54 = vmul.f32 %v3766_v4, %v731_v55 }
 0x105   : > { %v3785_v50 = vadd.f32 1e-05, %v565_v45  ;;  %v3787_v13 = vpop.eup %2959  ;;  %v974_v61 = vadd.f32 1.0, %v2952_v52  ;;  %v975_v51 = vadd.f32 1.0, %v2954_v5  ;;  %2969 = vpow2.f32 %v939_v25 }
 0x106   : > { %v857_v63 = vmul.f32 %v699_v56, %v5653_v21  ;;  %v566_v62 = vsub.f32 %v520_v18, %v3565_v16  ;;  %v2962_v34 = vpop.eup %2961  ;;  %2971 = vpow2.f32 %v941_v58  ;;  %v733_v53 = vmul.f32 0.5, %v732_v54  ;;  %v492_v21 = vpop.xlane.xlu2 %491 }
 0x107   : > { %v741_v2 = vmul.f32 %v3787_v13, %v3747_v40  ;;  %vm737_vm0 = vweird.f32 %v3766_v4  ;;  %2973 = vrsqrt.f32 %v3778_v10  ;;  %v518_v52 = vmul.f32 %v477_v59, %v3383_v28 }
 0x108   : > { %v3791_v30 = vmul.f32 %v3603_v27, %v857_v63  ;;  %v3797_v9 = vadd.f32 1e-05, %v566_v62  ;;  %v3800_v5 = vpop.eup %2963  ;;  %v734_v46 = vsub.f32 1.5, %v733_v53  ;;  %2975 = vrsqrt.f32 %v3785_v50 }
 0x109   : > { %v742_v41 = vmul.f32 %v3787_v13, %v741_v2  ;;  %v3805_v1 = vpop.eup %2965  ;;  %v973_v25 = vadd.f32 1.0, %v2962_v34  ;;  %v564_v7 = vsub.f32 %v518_v52, %v3526_v44  ;;  %v522_v45 = vmul.f32 %v489_v29, %v3383_v28 }
 0x10a   : > { %v907_v16 = vsub.f32 0.0, %v3791_v30  ;;  %2977 = vrsqrt.f32 %v3797_v9  ;;  %v3810_v58 = vpop.eup %2967  ;;  %v735_v55 = vmul.f32 %v3766_v4, %v734_v46  ;;  %vm736_vm1 = vweird.f32 %v3725_v60 }
 0x10b   : > { %2979 = vrcp.f32 %v974_v61  ;;  %v743_v56 = vmul.f32 0.5, %v742_v41  ;;  %v2970_v18 = vpop.eup %2969  ;;  %v3815_v43 = vmul.f32 %v2958_v8, %v3615_v47  ;;  %vm738_vm2 = vmor %vm736_vm1, %vm737_vm0  ;;  %v3819_v48 = vadd.f32 1e-05, %v564_v7  ;;  %v5654_v47 = vld [vmem:[#allocation4_spill] sm:$0xff]  ;;  %v5655_v8 = vld [vmem:[#allocation13_spill] sm:$0xff] }
 0x10c   : > { %2981 = vrcp.f32 %v975_v51  ;;  %v568_v44 = vsub.f32 %v522_v45, %v3544_v11  ;;  %v2972_v63 = vpop.eup %2971  ;;  %v937_v54 = vmul.f32 1.442695, %v907_v16  ;;  %v739_v59 = vsel %vm738_vm2, %v3766_v4, %v735_v55 }
 0x10d   : > { %v744_v61 = vsub.f32 1.5, %v743_v56  ;;  %vm747_vm3 = vweird.f32 %v3787_v13  ;;  %v3824_v60 = vpop.eup %2973  ;;  %2983 = vrcp.f32 %v973_v25  ;;  %v5656_v51 = vsub.f32 %v5654_v47, %v5655_v8 }
 0x10e   : > { %vm746_vm4 = vweird.f32 %v3747_v40  ;;  %v3830_v34 = vadd.f32 1e-05, %v568_v44  ;;  %v3832_v11 = vpop.eup %2975  ;;  %v977_v53 = vadd.f32 1.0, %v2970_v18  ;;  %v721_v4 = vmul.f32 %v3824_v60, %v3778_v10 }
 0x10f   : > { %v861_v62 = vmul.f32 %v739_v59, %v5656_v51  ;;  %v745_v2 = vmul.f32 %v3787_v13, %v744_v61  ;;  %vm726_vm5 = vweird.f32 %v3778_v10  ;;  %v523_v29 = vmul.f32 %v492_v21, %v3383_v28  ;;  %vm748_vm6 = vmor %vm746_vm4, %vm747_vm3 }
 0x110   : > { %v3839_v52 = vpop.eup %2977  ;;  %v978_v16 = vadd.f32 1.0, %v2972_v63  ;;  %v761_v40 = vmul.f32 %v3832_v11, %v3785_v50  ;;  %vm766_vm7 = vweird.f32 %v3785_v50  ;;  %2985 = vrsqrt.f32 %v3819_v48  ;;  %v5661_v50 = vld [vmem:[#allocation6_spill] sm:$0xff] }
 0x111   : > { %v3842_v46 = vmul.f32 %v3603_v27, %v861_v62  ;;  %v3850_v41 = vpop.eup %2979  ;;  %2987 = vpow2.f32 %v937_v54  ;;  %v749_v25 = vsel %vm748_vm6, %v3787_v13, %v745_v2  ;;  %v722_v7 = vmul.f32 %v3824_v60, %v721_v4 }
 0x112   : > { %v771_v45 = vmul.f32 %v3839_v52, %v3797_v9  ;;  %vm776_vm8 = vweird.f32 %v3797_v9  ;;  %v3857_v55 = vpop.eup %2981  ;;  %v5657_v18 = vsub.f32 %v3254_v26, %v3493_v49  ;;  %v762_v21 = vmul.f32 %v3832_v11, %v761_v40 }
 0x113   : > { %v911_v56 = vsub.f32 0.0, %v3842_v46  ;;  %2989 = vrsqrt.f32 %v3830_v34  ;;  %v723_v13 = vmul.f32 0.5, %v722_v7  ;;  %v569_v54 = vsub.f32 %v523_v29, %v3662_v36  ;;  %v3867_v59 = vpop.eup %2983 }
 0x114   : > { %v862_v44 = vmul.f32 %v749_v25, %v5657_v18  ;;  %2991 = vrcp.f32 %v977_v53  ;;  %v772_v63 = vmul.f32 %v3839_v52, %v771_v45  ;;  %v763_v8 = vmul.f32 0.5, %v762_v21  ;;  %v486_v21 = vpop.xlane.xlu0 %485 }
 0x115   : > { %2993 = vrcp.f32 %v978_v16  ;;  %v945_v61 = vmul.f32 1.442695, %v911_v56  ;;  %v724_v26 = vsub.f32 1.5, %v723_v13  ;;  %vm727_vm9 = vweird.f32 %v3824_v60 }
 0x116   : > { %v3870_v47 = vmul.f32 %v3603_v27, %v862_v44  ;;  %v773_v49 = vmul.f32 0.5, %v772_v63  ;;  %v3873_v51 = vadd.f32 1e-05, %v569_v54  ;;  %v3875_v62 = vpop.eup %2985  ;;  %v764_v2 = vsub.f32 1.5, %v763_v8  ;;  %vm728_vm12 = vmor %vm726_vm5, %vm727_vm9  ;;  %v5658_v54 = vld [vmem:[#allocation5_spill] sm:$0xff] }
 0x117   : > { %vm767_vm10 = vweird.f32 %v3832_v11  ;;  %vm777_vm11 = vweird.f32 %v3839_v52  ;;  %v2988_v36 = vpop.eup %2987  ;;  %2995 = vpow2.f32 %v945_v61  ;;  %v725_v4 = vmul.f32 %v3824_v60, %v724_v26  ;;  %v5659_v61 = vld [vmem:[#allocation14_spill] sm:$0xff] }
 0x118   : > { %v912_v53 = vsub.f32 0.0, %v3870_v47  ;;  %v774_v29 = vsub.f32 1.5, %v773_v49  ;;  %v751_v16 = vmul.f32 %v3875_v62, %v3819_v48  ;;  %v765_v7 = vmul.f32 %v3832_v11, %v764_v2  ;;  %vm768_vm14 = vmor %vm766_vm7, %vm767_vm10  ;;  %v5662_v49 = vld [vmem:[#allocation15_spill] sm:$0xff] }
 0x119   : > { %v3883_v40 = vpop.eup %2989  ;;  %vm756_vm13 = vweird.f32 %v3819_v48  ;;  %2997 = vrsqrt.f32 %v3873_v51  ;;  %v729_v56 = vsel %vm728_vm12, %v3824_v60, %v725_v4  ;;  %v976_v63 = vadd.f32 1.0, %v2988_v36  ;;  %vm778_vm15 = vmor %vm776_vm8, %vm777_vm11 }
 0x11a   : > { %v947_v25 = vmul.f32 1.442695, %v912_v53  ;;  %v3892_v45 = vpop.eup %2991  ;;  %v775_v18 = vmul.f32 %v3839_v52, %v774_v29  ;;  %v752_v10 = vmul.f32 %v3875_v62, %v751_v16  ;;  %v791_v44 = vmul.f32 %v3883_v40, %v3830_v34 }
 0x11b   : > { %v3903_v13 = vpop.eup %2993  ;;  %v5660_v60 = vsub.f32 %v5658_v54, %v5659_v61  ;;  %v769_v26 = vsel %vm768_vm14, %v3832_v11, %v765_v7  ;;  %v5663_v53 = vsub.f32 %v5661_v50, %v5662_v49  ;;  %vm757_vm0 = vweird.f32 %v3875_v62 }
 0x11c   : > { %2999 = vpow2.f32 %v947_v25  ;;  %v779_v4 = vsel %vm778_vm15, %v3839_v52, %v775_v18  ;;  %v753_v29 = vmul.f32 0.5, %v752_v10  ;;  %v792_v36 = vmul.f32 %v3883_v40, %v791_v44  ;;  %v5664_v25 = vld [vmem:[#allocation19_spill] sm:$0xff]  ;;  %vm758_vm2 = vmor %vm756_vm13, %vm757_vm0 }
 0x11d   : > { %v860_v8 = vmul.f32 %v729_v56, %v5660_v60  ;;  %v864_v2 = vmul.f32 %v769_v26, %v5663_v53  ;;  %v5665_v11 = vsub.f32 %v3269_v32, %v5664_v25  ;;  %v521_v9 = vmul.f32 %v486_v21, %v3383_v28  ;;  %v2996_v56 = vpop.eup %2995  ;;  %v5666_v60 = vld [vmem:[#allocation20_spill] sm:$0xff] }
 0x11e   : > { %v754_v61 = vsub.f32 1.5, %v753_v29  ;;  %v793_v52 = vmul.f32 0.5, %v792_v36  ;;  %vm797_vm1 = vweird.f32 %v3883_v40  ;;  %v980_v10 = vadd.f32 1.0, %v2996_v56  ;;  %v498_v29 = vpop.xlane.xlu1 %497 }
 0x11f   : > { %v3919_v16 = vmul.f32 %v3603_v27, %v860_v8  ;;  %v865_v7 = vmul.f32 %v779_v4, %v5665_v11  ;;  %v3927_v54 = vmul.f32 %v3603_v27, %v864_v2  ;;  %v3930_v18 = vpop.eup %2997  ;;  %v567_v8 = vsub.f32 %v521_v9, %v5666_v60  ;;  %v5668_v9 = vld [vmem:[#allocation16_spill] sm:$0xff] }
 0x120   : > { %v755_v26 = vmul.f32 %v3875_v62, %v754_v61  ;;  %v794_v50 = vsub.f32 1.5, %v793_v52  ;;  %v801_v49 = vmul.f32 %v3930_v18, %v3873_v51  ;;  %3001 = vrcp.f32 %v976_v63  ;;  %v5667_v63 = vld [vmem:[#allocation7_spill] sm:$0xff]  ;;  %v501_v52 = vpop.xlane.xlu2 %500 }
 0x121   : > { %v910_v44 = vsub.f32 0.0, %v3919_v16  ;;  %v3934_v32 = vmul.f32 %v3603_v27, %v865_v7  ;;  %v914_v21 = vsub.f32 0.0, %v3927_v54  ;;  %vm796_vm3 = vweird.f32 %v3830_v34 }
 0x122   : > { %v3000_v53 = vpop.eup %2999  ;;  %3003 = vrcp.f32 %v980_v10  ;;  %v759_v25 = vsel %vm758_vm2, %v3875_v62, %v755_v26  ;;  %v795_v11 = vmul.f32 %v3883_v40, %v794_v50  ;;  %v5669_v56 = vsub.f32 %v5667_v63, %v5668_v9  ;;  %vm798_vm4 = vmor %vm796_vm3, %vm797_vm1  ;;  %v5671_v26 = vld [vmem:[#allocation17_spill] sm:$0xff] }
 0x123   : > { %v943_v2 = vmul.f32 1.442695, %v910_v44  ;;  %v915_v4 = vsub.f32 0.0, %v3934_v32  ;;  %v951_v36 = vmul.f32 1.442695, %v914_v21  ;;  %v802_v48 = vmul.f32 %v3930_v18, %v801_v49  ;;  %v5670_v21 = vld [vmem:[#allocation8_spill] sm:$0xff] }
 0x124   : > { %v863_v61 = vmul.f32 %v759_v25, %v5669_v56  ;;  %v981_v34 = vadd.f32 1.0, %v3000_v53  ;;  %v799_v10 = vsel %vm798_vm4, %v3883_v40, %v795_v11  ;;  %v3956_v44 = vadd.f32 1e-05, %v567_v8  ;;  %v5673_v49 = vld [vmem:[#allocation22_spill] sm:$0xff]  ;;  %v495_v8 = vpop.xlane.xlu0 %494 }
 0x125   : > { %3005 = vpow2.f32 %v943_v2  ;;  %v953_v7 = vmul.f32 1.442695, %v915_v4  ;;  %v525_v62 = vmul.f32 %v498_v29, %v3383_v28  ;;  %v5672_v50 = vsub.f32 %v5670_v21, %v5671_v26 }
 0x126   : > { %3007 = vpow2.f32 %v951_v36  ;;  %v3960_v60 = vmul.f32 %v3603_v27, %v863_v61  ;;  %v803_v4 = vmul.f32 0.5, %v802_v48  ;;  %vm807_vm5 = vweird.f32 %v3930_v18  ;;  %v3002_v25 = vpop.eup %3001 }
 0x127   : > { %v867_v2 = vmul.f32 %v799_v10, %v5672_v50  ;;  %3009 = vpow2.f32 %v953_v7  ;;  %v571_v53 = vsub.f32 %v525_v62, %v5673_v49  ;;  %v526_v40 = vmul.f32 %v501_v52, %v3383_v28 }
 0x128   : > { %v913_v29 = vsub.f32 0.0, %v3960_v60  ;;  %v804_v11 = vsub.f32 1.5, %v803_v4  ;;  %3011 = vrsqrt.f32 %v3956_v44  ;;  %v3004_v63 = vpop.eup %3003  ;;  %v3975_v7 = vmul.f32 %v3800_v5, %v3643_v57 }
 0x129   : > { %v3970_v36 = vmul.f32 %v3603_v27, %v867_v2  ;;  %vm806_vm6 = vweird.f32 %v3873_v51  ;;  %v3978_v9 = vadd.f32 1e-05, %v571_v53  ;;  %v572_v56 = vsub.f32 %v526_v40, %v3752_v0 }
 0x12a   : > { %3013 = vrcp.f32 %v981_v34  ;;  %v949_v48 = vmul.f32 1.442695, %v913_v29  ;;  %v805_v52 = vmul.f32 %v3930_v18, %v804_v11  ;;  %v524_v10 = vmul.f32 %v495_v8, %v3383_v28  ;;  %vm808_vm7 = vmor %vm806_vm6, %vm807_vm5 }
 0x12b   : > { %v3006_v61 = vpop.eup %3005  ;;  %v3985_v62 = vmul.f32 %v3805_v1, %v3651_v3  ;;  %v917_v57 = vsub.f32 0.0, %v3970_v36  ;;  %3015 = vrsqrt.f32 %v3978_v9  ;;  %v3993_v5 = vmul.f32 %v3810_v58, %v3665_v39 }
 0x12c   : > { %v979_v21 = vadd.f32 1.0, %v3006_v61  ;;  %v3008_v0 = vpop.eup %3007  ;;  %v3997_v51 = vmul.f32 %v3850_v41, %v3683_v6  ;;  %v4001_v3 = vmul.f32 %v3857_v55, %v3696_v24  ;;  %v809_v1 = vsel %vm808_vm7, %v3930_v18, %v805_v52 }
 0x12d   : > { %v3010_v34 = vpop.eup %3009  ;;  %v4006_v26 = vmul.f32 %v3867_v59, %v3713_v35  ;;  %v4010_v50 = vmul.f32 %v3892_v45, %v3755_v12  ;;  %v868_v39 = vmul.f32 %v809_v1, %v592_v19  ;;  %v4015_v6 = vadd.f32 1e-05, %v572_v56  ;;  %v5674_v35 = vld [vmem:[#allocation23_spill] sm:$0xff]  ;;  %v504_v56 = vpop.xlane.xlu0 %503 }
 0x12e   : > { %v4017_v58 = vpop.eup %3011  ;;  %v4021_v24 = vmul.f32 %v3903_v13, %v3759_v20  ;;  %v4024_v41 = vmul.f32 %v3002_v25, %v3791_v30  ;;  %3017 = vpow2.f32 %v949_v48  ;;  %v570_v55 = vsub.f32 %v524_v10, %v5674_v35 }
 0x12f   : > { %v4028_v12 = vmul.f32 %v3004_v63, %v3842_v46  ;;  %3019 = vrcp.f32 %v979_v21  ;;  %v957_v38 = vmul.f32 1.442695, %v917_v57  ;;  %v781_v23 = vmul.f32 %v4017_v58, %v3956_v44 }
 0x130   : > { %vm786_vm8 = vweird.f32 %v3956_v44  ;;  %v3014_v19 = vpop.eup %3013  ;;  %v983_v59 = vadd.f32 1.0, %v3008_v0  ;;  %v4034_v20 = vmul.f32 %v3603_v27, %v868_v39  ;;  %v4036_v30 = vadd.f32 1e-05, %v570_v55 }
 0x131   : > { %v1108_v45 = vlaneseq  ;;  %v4038_v13 = vpop.eup %3015  ;;  %v984_v18 = vadd.f32 1.0, %v3010_v34  ;;  %v782_v46 = vmul.f32 %v4017_v58, %v781_v23  ;;  %3021 = vrsqrt.f32 %v4015_v6 }
 0x132   : > { %v1087_v2 = vrot.slane %v3975_v7, 1  ;;  %v821_v4 = vmul.f32 %v4038_v13, %v3978_v9  ;;  %vm826_vm9 = vweird.f32 %v3978_v9  ;;  %3023 = vrsqrt.f32 %v4036_v30  ;;  %v5679_v9 = vld [vmem:[#allocation21_spill] sm:$0xff] }
 0x133   : > { %v1088_v49 = vrot.slane %v3985_v62, 1  ;;  %v4049_v53 = vmul.f32 %v3014_v19, %v3870_v47  ;;  %3025 = vpow2.f32 %v957_v38  ;;  %v783_v40 = vmul.f32 0.5, %v782_v46  ;;  %v5675_v46 = vld [vmem:[#allocation9_spill] sm:$0xff] }
 0x134   : > { %v4051_v8 = vshrl.u32 %v1108_v45, 7  ;;  %v3018_v25 = vpop.eup %3017  ;;  %3027 = vrcp.f32 %v983_v59  ;;  %v918_v29 = vsub.f32 0.0, %v4034_v20  ;;  %v822_v11 = vmul.f32 %v4038_v13, %v821_v4  ;;  %v5676_v4 = vld [vmem:[#allocation18_spill] sm:$0xff] }
 0x135   : > { %v1086_v63 = vrot.slane %v3993_v5, 1  ;;  %v4056_v61 = vpop.eup %3019  ;;  %3029 = vrcp.f32 %v984_v18  ;;  %v784_v48 = vsub.f32 1.5, %v783_v40  ;;  %vm787_vm10 = vweird.f32 %v4017_v58 }
 0x136   : > { %vm1110_vm11 = vcmp.lt.s32.totalorder %v4051_v8, 7  ;;  %v823_v47 = vmul.f32 0.5, %v822_v11  ;;  %vm827_vm12 = vweird.f32 %v4038_v13  ;;  %v1085_v10 = vrot.slane %v3815_v43, 1  ;;  %vm788_vm13 = vmor %vm786_vm8, %vm787_vm10 }
 0x137   : > { %v1130_v52 = vsel %vm1110_vm11, %v1087_v2, %v1088_v49  ;;  %v4066_v21 = vpop.eup %3021  ;;  %v982_v57 = vadd.f32 1.0, %v3018_v25  ;;  %v785_v0 = vmul.f32 %v4017_v58, %v784_v48  ;;  %v527_v34 = vmul.f32 %v504_v56, %v3383_v28  ;;  %vm828_vm0 = vmor %vm826_vm9, %vm827_vm12 }
 0x138   : > { %v1136_v1 = vpack.c.bf16 %v1130_v52, %v1130_v52  ;;  %v4070_v39 = vpop.eup %3023  ;;  %v959_v35 = vmul.f32 1.442695, %v918_v29  ;;  %v824_v55 = vsub.f32 1.5, %v823_v47  ;;  %v831_v38 = vmul.f32 %v4066_v21, %v4015_v6 }
 0x139   : > { %vm836_vm14 = vweird.f32 %v4015_v6  ;;  %v1132_v23 = vsel %vm1110_vm11, %v1085_v10, %v1086_v63  ;;  %v3026_v19 = vpop.eup %3025  ;;  %v789_v28 = vsel %vm788_vm13, %v4017_v58, %v785_v0  ;;  %v811_v59 = vmul.f32 %v4070_v39, %v4036_v30 }
 0x13a   : > { %vm816_vm15 = vweird.f32 %v4036_v30  ;;  %1184 = vrot.lane.b32.xlu0 %v1136_v1, %s3104_s12  ;;  %v1134_v44 = vpack.c.bf16 %v1132_v23, %v1132_v23  ;;  %v1090_v45 = vrot.slane %v3997_v51, 1  ;;  %v4087_v18 = vpop.eup %3027  ;;  %v5677_v40 = vsub.f32 %v5675_v46, %v5676_v4 }
 0x13b   : > { %v825_v29 = vmul.f32 %v4038_v13, %v824_v55  ;;  %v832_v58 = vmul.f32 %v4066_v21, %v831_v38  ;;  %v1131_v11 = vsel %vm1110_vm11, %v1086_v63, %v1087_v2  ;;  %v4096_v56 = vpop.eup %3029  ;;  %v812_v48 = vmul.f32 %v4070_v39, %v811_v59  ;;  %v5678_v55 = vld [vmem:[#allocation10_spill] sm:$0xff] }
 0x13c   : > { %v866_v25 = vmul.f32 %v789_v28, %v5677_v40  ;;  %1180 = vrot.lane.b32.xlu1 %v1134_v44, %s3104_s12  ;;  %v1135_v47 = vpack.c.bf16 %v1131_v11, %v1131_v11  ;;  %v573_v52 = vsub.f32 %v527_v34, %v3722_v22  ;;  %v1091_v0 = vrot.slane %v4001_v3, 1 }
 0x13d   : > { %3031 = vpow2.f32 %v959_v35  ;;  %v829_v2 = vsel %vm828_vm0, %v4038_v13, %v825_v29  ;;  %v833_v63 = vmul.f32 0.5, %v832_v58  ;;  %v5680_v38 = vsub.f32 %v5678_v55, %v5679_v9 }
 0x13e   : > { %v4107_v1 = vmul.f32 %v3603_v27, %v866_v25  ;;  %3033 = vrcp.f32 %v982_v57  ;;  %v813_v28 = vmul.f32 0.5, %v812_v48  ;;  %1182 = vrot.lane.b32.xlu2 %v1135_v47, %s3104_s12  ;;  %v4114_v59 = vadd.f32 1e-05, %v573_v52 }
 0x13f   : > { %v870_v23 = vmul.f32 %v829_v2, %v5680_v38  ;;  %v834_v34 = vsub.f32 1.5, %v833_v63  ;;  %vm837_vm1 = vweird.f32 %v4066_v21  ;;  %v1127_v35 = vsel %vm1110_vm11, %v1090_v45, %v1091_v0 }
 0x140   : > { %v916_v22 = vsub.f32 0.0, %v4107_v1  ;;  %v986_v13 = vadd.f32 1.0, %v3026_v19  ;;  %v814_v44 = vsub.f32 1.5, %v813_v28  ;;  %vm817_vm2 = vweird.f32 %v4070_v39  ;;  %vm838_vm3 = vmor %vm836_vm14, %vm837_vm1 }
 0x141   : > { %v4121_v57 = vmul.f32 %v3603_v27, %v870_v23  ;;  %v835_v4 = vmul.f32 %v4066_v21, %v834_v34  ;;  %3035 = vrsqrt.f32 %v4114_v59  ;;  %v1139_v40 = vpack.c.bf16 %v1127_v35, %v1127_v35  ;;  %vm818_vm4 = vmor %vm816_vm15, %vm817_vm2 }
 0x142   : > { %v955_v46 = vmul.f32 1.442695, %v916_v22  ;;  %v815_v29 = vmul.f32 %v4070_v39, %v814_v44  ;;  %v1089_v19 = vrot.slane %v4006_v26, 1  ;;  %v1093_v58 = vrot.slane %v4010_v50, 1 }
 0x143   : > { %v920_v25 = vsub.f32 0.0, %v4121_v57  ;;  %v3032_v11 = vpop.eup %3031  ;;  %v839_v48 = vsel %vm838_vm3, %v4066_v21, %v835_v4  ;;  %1190 = vrot.lane.b32.xlu0 %v1139_v40, %s3104_s12  ;;  %v1094_v47 = vrot.slane %v4021_v24, 1  ;;  %v1092_v6 = vrot.slane %v4024_v41, 1 }
 0x144   : > { %3037 = vpow2.f32 %v955_v46  ;;  %v3034_v52 = vpop.eup %3033  ;;  %v871_v63 = vmul.f32 %v839_v48, %v595_v14  ;;  %v819_v55 = vsel %vm818_vm4, %v4070_v39, %v815_v29  ;;  %v1129_v30 = vsel %vm1110_vm11, %v1088_v49, %v1089_v19 }
 0x145   : > { %v963_v2 = vmul.f32 1.442695, %v920_v25  ;;  %v869_v21 = vmul.f32 %v819_v55, %v593_v31  ;;  %v1137_v9 = vpack.c.bf16 %v1129_v30, %v1129_v30  ;;  %v1128_v38 = vsel %vm1110_vm11, %v1089_v19, %v1090_v45 }
 0x146   : > { %v1124_v23 = vsel %vm1110_vm11, %v1093_v58, %v1094_v47  ;;  %v987_v33 = vadd.f32 1.0, %v3032_v11  ;;  %v4154_v42 = vmul.f32 %v3603_v27, %v871_v63  ;;  %v1138_v14 = vpack.c.bf16 %v1128_v38, %v1128_v38 }
 0x147   : > { %3039 = vpow2.f32 %v963_v2  ;;  %v3036_v39 = vpop.eup %3035  ;;  %v4158_v49 = vmul.f32 %v4056_v61, %v3919_v16  ;;  %v4161_v37 = vmul.f32 %v3603_v27, %v869_v21  ;;  %1186 = vrot.lane.b32.xlu2 %v1137_v9, %s3104_s12  ;;  %v1142_v17 = vpack.c.bf16 %v1124_v23, %v1124_v23  ;;  %v3061_v21 = vld [vmem:[%s3185_s9 + $0xb0] sm:$0xff] }
 0x148   : > { %3041 = vrcp.f32 %v986_v13  ;;  %v921_v31 = vsub.f32 0.0, %v4154_v42  ;;  %v841_v45 = vmul.f32 %v3036_v39, %v4114_v59  ;;  %1188 = vrot.lane.b32.xlu1 %v1138_v14, %s3104_s12  ;;  %v1126_v28 = vsel %vm1110_vm11, %v1091_v0, %v1092_v6 }
 0x149   : > { %v919_v16 = vsub.f32 0.0, %v4161_v37  ;;  %v1125_v27 = vsel %vm1110_vm11, %v1092_v6, %v1093_v58  ;;  %v1096_v61 = vrot.slane %v4028_v12, 1  ;;  %v1097_v34 = vrot.slane %v4049_v53, 1 }
 0x14a   : > { %v3038_v22 = vpop.eup %3037  ;;  %v4176_v35 = vmul.f32 %v4087_v18, %v3927_v54  ;;  %3043 = vrcp.f32 %v987_v33  ;;  %v965_v13 = vmul.f32 1.442695, %v921_v31  ;;  %v842_v44 = vmul.f32 %v3036_v39, %v841_v45 }
 0x14b   : > { %v4180_v0 = vmul.f32 %v4096_v56, %v3934_v32  ;;  %v985_v46 = vadd.f32 1.0, %v3038_v22  ;;  %v961_v4 = vmul.f32 1.442695, %v919_v16  ;;  %1196 = vrot.lane.b32.xlu0 %v1142_v17, %s3104_s12  ;;  %v1140_v40 = vpack.c.bf16 %v1126_v28, %v1126_v28 }
 0x14c   : > { %v843_v29 = vmul.f32 0.5, %v842_v44  ;;  %v1141_v19 = vpack.c.bf16 %v1125_v27, %v1125_v27  ;;  %v1121_v58 = vsel %vm1110_vm11, %v1096_v61, %v1097_v34  ;;  %v1095_v54 = vrot.slane %v4158_v49, 1 }
 0x14d   : > { %v3040_v25 = vpop.eup %3039  ;;  %3045 = vpow2.f32 %v965_v13  ;;  %vm847_vm5 = vweird.f32 %v3036_v39  ;;  %v4187_v56 = vmul.f32 %v3034_v52, %v3960_v60  ;;  %vm846_vm6 = vweird.f32 %v4114_v59 }
 0x14e   : > { %v3042_v18 = vpop.eup %3041  ;;  %v989_v11 = vadd.f32 1.0, %v3040_v25  ;;  %3047 = vpow2.f32 %v961_v4  ;;  %v844_v32 = vsub.f32 1.5, %v843_v29  ;;  %v1145_v48 = vpack.c.bf16 %v1121_v58, %v1121_v58  ;;  %vm848_vm7 = vmor %vm846_vm6, %vm847_vm5 }
 0x14f   : > { %3049 = vrcp.f32 %v985_v46  ;;  %1192 = vrot.lane.b32.xlu2 %v1140_v40, %s3104_s12  ;;  %v1123_v63 = vsel %vm1110_vm11, %v1094_v47, %v1095_v54  ;;  %v1099_v55 = vrot.slane %v4176_v35, 1  ;;  %v1100_v30 = vrot.slane %v4180_v0, 1 }
 0x150   : > { %v3044_v6 = vpop.eup %3043  ;;  %v845_v2 = vmul.f32 %v3036_v39, %v844_v32  ;;  %1194 = vrot.lane.b32.xlu1 %v1141_v19, %s3104_s12  ;;  %v596_v60 = vsub.f32 %v3061_v21, %v3702_v15  ;;  %v1122_v59 = vsel %vm1110_vm11, %v1095_v54, %v1096_v61  ;;  %3051 = vrcp.f32 %v989_v11 }
 0x151   : > { %v4201_v38 = vmul.f32 %v3042_v18, %v3970_v36  ;;  %v4204_v23 = vmul.f32 %v3044_v6, %v4034_v20  ;;  %v1143_v33 = vpack.c.bf16 %v1123_v63, %v1123_v63  ;;  %v1144_v15 = vpack.c.bf16 %v1122_v59, %v1122_v59  ;;  %v3062_v36 = vld [vmem:[%s5574_s1] ss:$0 sm:$0xff] }
 0x152   : > { %v849_v52 = vsel %vm848_vm7, %v3036_v39, %v845_v2  ;;  %v1118_v31 = vsel %vm1110_vm11, %v1099_v55, %v1100_v30  ;;  %v1098_v45 = vrot.slane %v4187_v56, 1  ;;  %vm1061_vm8 = vcmask 27648  }
 0x153   : > { %v3046_v9 = vpop.eup %3045  ;;  %v872_v47 = vmul.f32 %v849_v52, %v596_v60  ;;  %1202 = vrot.lane.b32.xlu0 %v1145_v48, %s3104_s12  ;;  %v1148_v16 = vpack.c.bf16 %v1118_v31, %v1118_v31  ;;  %v1102_v44 = vrot.slane %v4201_v38, 1  ;;  %v1103_v46 = vrot.slane %v4204_v23, 1 }
 0x154   : > { %v3048_v14 = vpop.eup %3047  ;;  %v990_v17 = vadd.f32 1.0, %v3046_v9  ;;  %v1120_v13 = vsel %vm1110_vm11, %v1097_v34, %v1098_v45  ;;  %v1119_v40 = vsel %vm1110_vm11, %v1098_v45, %v1099_v55  ;;  %v1041_v59 = vpack.c.bf16 %v3985_v62, %v3985_v62 }
 0x155   : > { %v3050_v39 = vpop.eup %3049  ;;  %v988_v28 = vadd.f32 1.0, %v3048_v14  ;;  %v4213_v20 = vmul.f32 %v3062_v36, %v872_v47  ;;  %v1147_v19 = vpack.c.bf16 %v1119_v40, %v1119_v40  ;;  %v1115_v34 = vsel %vm1110_vm11, %v1102_v44, %v1103_v46 }
 0x156   : > { %3053 = vrcp.f32 %v990_v17  ;;  %v3052_v27 = vpop.eup %3051  ;;  %v4218_v61 = vmul.f32 %v3050_v39, %v4107_v1  ;;  %v1146_v1 = vpack.c.bf16 %v1120_v13, %v1120_v13  ;;  %v1044_v52 = vpack.c.bf16 %v4001_v3, %v4001_v3  ;;  %1065 = vst.msk [vmem:[#allocation2 + $0xc] sm:$0xf] %vm1061_vm8, %v1041_v59 }
 0x157   : > { %3055 = vrcp.f32 %v988_v28  ;;  %v922_v22 = vsub.f32 0.0, %v4213_v20  ;;  %1198 = vrot.lane.b32.xlu2 %v1143_v33, %s3104_s12  ;;  %v4228_v25 = vmul.f32 %v3052_v27, %v4121_v57  ;;  %v1151_v57 = vpack.c.bf16 %v1115_v34, %v1115_v34 }
 0x158   : > { %1200 = vrot.lane.b32.xlu1 %v1144_v15, %s3104_s12  ;;  %v1101_v58 = vrot.slane %v4218_v61, 1  ;;  %v1038_v9 = vpack.c.bf16 %v3815_v43, %v3815_v43  ;;  %v1047_v47 = vpack.c.bf16 %v4021_v24, %v4021_v24  ;;  %v1040_v33 = vpack.c.bf16 %v3975_v7, %v3975_v7  ;;  %1068 = vst.msk [vmem:[#allocation2 + $0x18] sm:$0xf] %vm1061_vm8, %v1044_v52 }
 0x159   : > { %v967_v4 = vmul.f32 1.442695, %v922_v22  ;;  %v1105_v32 = vrot.slane %v4228_v25, 1  ;;  %v1042_v17 = vpack.c.bf16 %v4006_v26, %v4006_v26  ;;  %v1050_v31 = vpack.c.bf16 %v4049_v53, %v4049_v53 }
 0x15a   : > { %v1117_v6 = vsel %vm1110_vm11, %v1100_v30, %v1101_v58  ;;  %v1116_v2 = vsel %vm1110_vm11, %v1101_v58, %v1102_v44  ;;  %1062 = vst.msk [vmem:[#allocation2] sm:$0xf] %vm1061_vm8, %v1038_v9  ;;  %v1043_v39 = vpack.c.bf16 %v3997_v51, %v3997_v51  ;;  %v1274_v36 = vrot.slane %v3993_v5, 2 }
 0x15b   : > { %3057 = vpow2.f32 %v967_v4  ;;  %1208 = vrot.lane.b32.xlu0 %v1148_v16, %s3104_s12  ;;  %v1149_v55 = vpack.c.bf16 %v1117_v6, %v1117_v6  ;;  %v1150_v21 = vpack.c.bf16 %v1116_v2, %v1116_v2  ;;  %1071 = vst.msk [vmem:[#allocation2 + $0x24] sm:$0xf] %vm1061_vm8, %v1047_v47  ;;  %v1045_v22 = vpack.c.bf16 %v4024_v41, %v4024_v41 }
 0x15c   : > { %v3054_v29 = vpop.eup %3053  ;;  %1064 = vst.msk [vmem:[#allocation2 + $0x8] sm:$0xf] %vm1061_vm8, %v1040_v33  ;;  %vm1296_vm9 = vcmp.lt.s32.totalorder %v4051_v8, 6  ;;  %v1046_v13 = vpack.c.bf16 %v4010_v50, %v4010_v50  ;;  %v1052_v58 = vpack.c.bf16 %v4176_v35, %v4176_v35  ;;  %v1276_v2 = vrot.slane %v3985_v62, 2 }
 0x15d   : > { %v3056_v54 = vpop.eup %3055  ;;  %v4235_v18 = vmul.f32 %v3054_v29, %v4154_v42  ;;  %v1039_v42 = vpack.c.bf16 %v3993_v5, %v3993_v5  ;;  %1066 = vst.msk [vmem:[#allocation2 + $0x10] sm:$0xf] %vm1061_vm8, %v1042_v17  ;;  %v1049_v29 = vpack.c.bf16 %v4028_v12, %v4028_v12  ;;  %v1280_v59 = vrot.slane %v4024_v41, 2 }
 0x15e   : > { %v4238_v11 = vmul.f32 %v3056_v54, %v4161_v37  ;;  %1074 = vst.msk [vmem:[#allocation2 + $0x30] sm:$0xf] %vm1061_vm8, %v1050_v31  ;;  %v1279_v52 = vrot.slane %v4001_v3, 2  ;;  %v1278_v33 = vrot.slane %v3997_v51, 2  ;;  %v1058_v31 = vpack.c.bf16 %v4228_v25, %v4228_v25 }
 0x15f   : > { %1204 = vrot.lane.b32.xlu2 %v1146_v1, %s3104_s12  ;;  %v1106_v48 = vrot.slane %v4235_v18, 1  ;;  %1063 = vst.msk [vmem:[#allocation2 + $0x4] sm:$0xf] %vm1061_vm8, %v1039_v42  ;;  %v1053_v1 = vpack.c.bf16 %v4180_v0, %v4180_v0  ;;  %v1059_v17 = vpack.c.bf16 %v4235_v18, %v4235_v18  ;;  %vm1249_vm10 = vcmask 60448  }
 0x160   : > { %1206 = vrot.lane.b32.xlu1 %v1147_v19, %s3104_s12  ;;  %v1104_v30 = vrot.slane %v4238_v11, 1  ;;  %1067 = vst.msk [vmem:[#allocation2 + $0x14] sm:$0xf] %vm1061_vm8, %v1043_v39  ;;  %v1051_v19 = vpack.c.bf16 %v4187_v56, %v4187_v56  ;;  %vm2040_vm12 = vcmp.lt.s32.totalorder %v4051_v8, 3  ;;  %vm2226_vm13 = vcmp.lt.s32.totalorder %v4051_v8, 2 }
 0x161   : > { %v3058_v37 = vpop.eup %3057  ;;  %v1112_v60 = vsel %vm1110_vm11, %v1105_v32, %v1106_v48  ;;  %1069 = vst.msk [vmem:[#allocation2 + $0x1c] sm:$0xf] %vm1061_vm8, %v1045_v22  ;;  %v1282_v22 = vrot.slane %v4021_v24, 2  ;;  %vm1435_vm14 = vcmask 93248   ;;  %vm1575_vm15 = vcmp.lt.s32.totalorder %v4051_v8, 5 }
 0x162   : > { %v991_v63 = vadd.f32 1.0, %v3058_v37  ;;  %v1154_v14 = vpack.c.bf16 %v1112_v60, %v1112_v60  ;;  %v1114_v15 = vsel %vm1110_vm11, %v1103_v46, %v1104_v30  ;;  %v1113_v45 = vsel %vm1110_vm11, %v1104_v30, %v1105_v32  ;;  %1070 = vst.msk [vmem:[#allocation2 + $0x20] sm:$0xf] %vm1061_vm8, %v1046_v13 }
 0x163   : > { %1214 = vrot.lane.b32.xlu0 %v1151_v57, %s3104_s12  ;;  %v1152_v27 = vpack.c.bf16 %v1114_v15, %v1114_v15  ;;  %v1153_v44 = vpack.c.bf16 %v1113_v45, %v1113_v45  ;;  %v1273_v46 = vrot.slane %v3815_v43, 2  ;;  %1077 = vst.msk [vmem:[#allocation2 + $0x3c] sm:$0xf] %vm1061_vm8, %v1053_v1  ;;  %v1277_v32 = vrot.slane %v4006_v26, 2 }
 0x164   : > { %3059 = vrcp.f32 %v991_v63  ;;  %1073 = vst.msk [vmem:[#allocation2 + $0x2c] sm:$0xf] %vm1061_vm8, %v1049_v29  ;;  %v1056_v37 = vpack.c.bf16 %v4204_v23, %v4204_v23  ;;  %v1054_v63 = vpack.c.bf16 %v4218_v61, %v4218_v61  ;;  %v1057_v15 = vpack.c.bf16 %v4238_v11, %v4238_v11 }
 0x165   : > { %v1318_v40 = vsel %vm1296_vm9, %v1273_v46, %v1274_v36  ;;  %1075 = vst.msk [vmem:[#allocation2 + $0x34] sm:$0xf] %vm1061_vm8, %v1051_v19  ;;  %v1315_v42 = vsel %vm1296_vm9, %v1276_v2, %v1277_v32  ;;  %v1314_v39 = vsel %vm1296_vm9, %v1277_v32, %v1278_v33  ;;  %vm1528_vm0 = vcmask 126048  }
 0x166   : > { %v4318_v54 = vpack.c.bf16 %v1318_v40, %v1318_v40  ;;  %1076 = vst.msk [vmem:[#allocation2 + $0x38] sm:$0xf] %vm1061_vm8, %v1052_v58  ;;  %v4387_v13 = vpack.c.bf16 %v1314_v39, %v1314_v39  ;;  %vm1714_vm1 = vcmask 158848   ;;  %vm1900_vm2 = vcmask 191648  }
 0x167   : > { %1210 = vrot.lane.b32.xlu2 %v1149_v55, %s3104_s12  ;;  %v1055_v55 = vpack.c.bf16 %v4201_v38, %v4201_v38  ;;  %1080 = vst.msk [vmem:[#allocation2 + $0x48] sm:$0xf] %vm1061_vm8, %v1056_v37  ;;  %vm2527_vm3 = vcmask 1041408   ;;  %vm1993_vm4 = vcmask 224448   ;;  %vm2179_vm5 = vcmask 257248  }
 0x168   : > { %1212 = vrot.lane.b32.xlu1 %v1150_v21, %s3104_s12  ;;  %v4344_v21 = vpack.c.bf16 %v1315_v42, %v1315_v42  ;;  %1078 = vst.msk [vmem:[#allocation2 + $0x40] sm:$0xf] %vm1061_vm8, %v1054_v63  ;;  %v1289_v42 = vrot.slane %v4218_v61, 2  ;;  %v1288_v63 = vrot.slane %v4180_v0, 2  ;;  %vm2365_vm6 = vcmask 290048  }
 0x169   : > { %1079 = vst.msk [vmem:[#allocation2 + $0x44] sm:$0xf] %vm1061_vm8, %v1055_v55  ;;  %vm2490_vm7 = vcmask 293888  }
 0x16a   : > { %v3060_v28 = vpop.eup %3059  ;;  %1083 = vst.msk [vmem:[#allocation2 + $0x54] sm:$0xf] %vm1061_vm8, %v1059_v17  ;;  %v5604_v17 = vrot.slane %v3993_v5, 4 }
 0x16b   : > { %v4286_v16 = vmul.f32 %v3060_v28, %v4213_v20  ;;  %1220 = vrot.lane.b32.xlu0 %v1154_v14, %s3104_s12  ;;  %v1048_v20 = vpack.c.bf16 %v4158_v49, %v4158_v49  ;;  %v1312_v14 = vsel %vm1296_vm9, %v1279_v52, %v1280_v59  ;;  %1081 = vst.msk [vmem:[#allocation2 + $0x4c] sm:$0xf] %vm1061_vm8, %v1057_v15  ;;  %v1283_v28 = vrot.slane %v4158_v49, 2 }
 0x16c   : > { %v4374_v45 = vpack.c.bf16 %v1312_v14, %v1312_v14  ;;  %1082 = vst.msk [vmem:[#allocation2 + $0x50] sm:$0xf] %vm1061_vm8, %v1058_v31  ;;  %v5605_v14 = vrot.slane %v3975_v7, 4  ;;  %v1292_v31 = vrot.slane %v4238_v11, 2 }
 0x16d   : > { %v1107_v4 = vrot.slane %v4286_v16, 1  ;;  %1072 = vst.msk [vmem:[#allocation2 + $0x28] sm:$0xf] %vm1061_vm8, %v1048_v20  ;;  %v1281_v20 = vrot.slane %v4010_v50, 2  ;;  %v1060_v40 = vpack.c.bf16 %v4286_v16, %v4286_v16 }
 0x16f   : > { %1216 = vrot.lane.b32.xlu2 %v1152_v27, %s3104_s12  ;;  %v1111_v34 = vsel %vm1110_vm11, %v1106_v48, %v1107_v4  ;;  %v1133_v57 = vsel %vm1110_vm11, %v1107_v4, %v1085_v10  ;;  %v1275_v10 = vrot.slane %v3975_v7, 2  ;;  %v1295_v27 = vrot.slane %v4286_v16, 2  ;;  %1084 = vst.msk [vmem:[#allocation2 + $0x58] sm:$0xf] %vm1061_vm8, %v1060_v40 }
 0x170   : > { %1218 = vrot.lane.b32.xlu1 %v1153_v44, %s3104_s12  ;;  %v1155_v48 = vpack.c.bf16 %v1111_v34, %v1111_v34  ;;  %v1156_v6 = vpack.c.bf16 %v1133_v57, %v1133_v57  ;;  %v1309_v4 = vsel %vm1296_vm9, %v1282_v22, %v1283_v28  ;;  %v1311_v19 = vsel %vm1296_vm9, %v1280_v59, %v1281_v20 }
 0x171   : > { %v1316_v60 = vsel %vm1296_vm9, %v1275_v10, %v1276_v2  ;;  %v1317_v30 = vsel %vm1296_vm9, %v1274_v36, %v1275_v10  ;;  %v1313_v36 = vsel %vm1296_vm9, %v1278_v33, %v1279_v52  ;;  %v4406_v1 = vsel %vm1296_vm9, %v1295_v27, %v1273_v46 }
 0x172   : > { %v4356_v9 = vpack.c.bf16 %v1316_v60, %v1316_v60  ;;  %v4358_v47 = vpack.c.bf16 %v1317_v30, %v1317_v30  ;;  %v4389_v44 = vpack.c.bf16 %v1313_v36, %v1313_v36  ;;  %v4409_v29 = vpack.c.bf16 %v1309_v4, %v1309_v4 }
 0x173   : > { %1366 = vrot.lane.b32.xlu0 %v4318_v54, %s3105_s15  ;;  %v1286_v34 = vrot.slane %v4187_v56, 2  ;;  %v1310_v58 = vsel %vm1296_vm9, %v1281_v20, %v1282_v22  ;;  %v1285_v57 = vrot.slane %v4049_v53, 2  ;;  %v4419_v32 = vpack.c.bf16 %v1311_v19, %v1311_v19 }
 0x174   : > { %v4421_v46 = vpack.c.bf16 %v1310_v58, %v1310_v58  ;;  %v1303_v30 = vsel %vm1296_vm9, %v1288_v63, %v1289_v42  ;;  %v1287_v59 = vrot.slane %v4176_v35, 2  ;;  %vm1761_vm11 = vcmp.lt.s32.totalorder %v4051_v8, 4 }
 0x175   : > { %v4452_v33 = vpack.c.bf16 %v1303_v30, %v1303_v30  ;;  %v1290_v36 = vrot.slane %v4201_v38, 2  ;;  %v4474_v4 = vsel %vm1761_vm11, %v5604_v17, %v5605_v14  ;;  %v5598_v58 = vrot.slane %v4024_v41, 5 }
 0x176   : > { %v1305_v15 = vsel %vm1296_vm9, %v1286_v34, %v1287_v59  ;;  %v1304_v39 = vsel %vm1296_vm9, %v1287_v59, %v1288_v63  ;;  %v1294_v63 = vrot.slane %v4235_v18, 2  ;;  %v5603_v30 = vrot.slane %v4049_v53, 5 }
 0x177   : > { %1222 = vrot.lane.b32.xlu2 %v1155_v48, %s3104_s12  ;;  %v1306_v48 = vsel %vm1296_vm9, %v1285_v57, %v1286_v34  ;;  %v4466_v22 = vpack.c.bf16 %v1305_v15, %v1305_v15  ;;  %v4476_v20 = vpack.c.bf16 %v1304_v39, %v1304_v39  ;;  %v5600_v34 = vrot.slane %v4001_v3, 5 }
 0x178   : > { %1224 = vrot.lane.b32.xlu1 %v1156_v6, %s3104_s12  ;;  %v1284_v6 = vrot.slane %v4028_v12, 2  ;;  %v4430_v2 = vpack.c.bf16 %v1306_v48, %v1306_v48  ;;  %v5599_v59 = vrot.slane %v4187_v56, 5  ;;  %v5602_v15 = vrot.slane %v4001_v3, 6 }
 0x179   : > { %v5601_v39 = vrot.slane %v4024_v41, 6  ;;  %vm2639_vm8 = vcmask 64512  }
 0x17a   : > { %v1308_v10 = vsel %vm1296_vm9, %v1283_v28, %v1284_v6  ;;  %v1307_v37 = vsel %vm1296_vm9, %v1284_v6, %v1285_v57  ;;  %v1291_v28 = vrot.slane %v4204_v23, 2  ;;  %v1302_v6 = vsel %vm1296_vm9, %v1289_v42, %v1290_v36 }
 0x17b   : > { %1372 = vrot.lane.b32.xlu0 %v4344_v21, %s3105_s15  ;;  %v4440_v55 = vpack.c.bf16 %v1308_v10, %v1308_v10  ;;  %v4442_v60 = vpack.c.bf16 %v1307_v37, %v1307_v37  ;;  %v4500_v10 = vsel %vm2040_vm12, %v5600_v34, %v5598_v58  ;;  %v5609_v42 = vrot.slane %v4006_v26, 5 }
 0x17c   : > { %v1300_v40 = vsel %vm1296_vm9, %v1291_v28, %v1292_v31  ;;  %v1301_v19 = vsel %vm1296_vm9, %v1290_v36, %v1291_v28  ;;  %v4513_v28 = vpack.c.bf16 %v1302_v6, %v1302_v6  ;;  %v1293_v36 = vrot.slane %v4228_v25, 2 }
 0x17d   : > { %v4488_v48 = vpack.c.bf16 %v1300_v40, %v1300_v40  ;;  %v4504_v37 = vpack.c.bf16 %v1301_v19, %v1301_v19  ;;  %v4523_v40 = vsel %vm2040_vm12, %v5603_v30, %v5599_v59  ;;  %v1297_v19 = vsel %vm1296_vm9, %v1294_v63, %v1295_v27 }
 0x17e   : > { %v4536_v6 = vsel %vm2226_vm13, %v5602_v15, %v5601_v39  ;;  %v5607_v58 = vrot.slane %v3985_v62, 6  ;;  %v5611_v59 = vrot.slane %v4049_v53, 6  ;;  %v5610_v34 = vrot.slane %v4187_v56, 6 }
 0x17f   : > { %1368 = vrot.lane.b32.xlu2 %v4358_v47, %s3105_s15  ;;  %v4561_v30 = vpack.c.bf16 %v1297_v19, %v1297_v19  ;;  %v2212_v19 = vrot.slane %v4021_v24, 6 }
 0x180   : > { %1370 = vrot.lane.b32.xlu1 %v4356_v9, %s3105_s15 }
 0x183   : > { %1378 = vrot.lane.b32.xlu0 %v4374_v45, %s3105_s15 }
 0x187   : > { %1374 = vrot.lane.b32.xlu2 %v4387_v13, %s3105_s15 }
 0x188   : > { %1376 = vrot.lane.b32.xlu1 %v4389_v44, %s3105_s15 }
 0x18b   : > { %1384 = vrot.lane.b32.xlu0 %v4409_v29, %s3105_s15 }
 0x18f   : > { %1380 = vrot.lane.b32.xlu2 %v4419_v32, %s3105_s15 }
 0x190   : > { %1382 = vrot.lane.b32.xlu1 %v4421_v46, %s3105_s15 }
 0x193   : > { %1390 = vrot.lane.b32.xlu0 %v4430_v2, %s3105_s15 }
 0x197   : > { %1386 = vrot.lane.b32.xlu2 %v4440_v55, %s3105_s15 }
 0x198   : > { %1388 = vrot.lane.b32.xlu1 %v4442_v60, %s3105_s15  ;;  %v1183_v52 = vpop.permute.xlu2 %1182 }
 0x199   : > { %1251 = vst.msk [vmem:[#allocation2 + $0x4] sm:$0xf] %vm1249_vm10, %v1183_v52  ;;  %v5608_v52 = vrot.slane %v4006_v26, 6 }
 0x19b   : > { %1396 = vrot.lane.b32.xlu0 %v4452_v33, %s3105_s15  ;;  %v4559_v39 = vsel %vm2226_vm13, %v5607_v58, %v5608_v52  ;;  %v1299_v58 = vsel %vm1296_vm9, %v1292_v31, %v1293_v36  ;;  %v2032_v31 = vrot.slane %v4180_v0, 5 }
 0x19c   : > { %5682 = vst [vmem:[#allocation3_spill] sm:$0xff] %v4559_v39  ;;  %v4588_v52 = vpack.c.bf16 %v1299_v58, %v1299_v58  ;;  %v5683_v39 = vrot.slane %v4010_v50, 5  ;;  %v5686_v58 = vrot.slane %v4176_v35, 5 }
 0x19f   : > { %1392 = vrot.lane.b32.xlu2 %v4466_v22, %s3105_s15 }
 0x1a0   : > { %1394 = vrot.lane.b32.xlu1 %v4476_v20, %s3105_s15 }
 0x1a1   : > { %v1187_v57 = vpop.permute.xlu2 %1186 }
 0x1a2   : > { %1253 = vst.msk [vmem:[#allocation2 + $0xc] sm:$0xf] %vm1249_vm10, %v1187_v57  ;;  %v5606_v57 = vrot.slane %v3985_v62, 5 }
 0x1a3   : > { %1402 = vrot.lane.b32.xlu0 %v4488_v48, %s3105_s15 }
 0x1a4   : > { %v4551_v27 = vsel %vm2040_vm12, %v5606_v57, %v5609_v42  ;;  %v4571_v57 = vsel %vm2226_vm13, %v5611_v59, %v5610_v34  ;;  %v1298_v42 = vsel %vm1296_vm9, %v1293_v36, %v1294_v63  ;;  %v2026_v34 = vrot.slane %v4021_v24, 5 }
 0x1a5   : > { %5681 = vst [vmem:[#allocation11_spill] sm:$0xff] %v4551_v27  ;;  %v5685_v36 = vrot.slane %v4158_v49, 5  ;;  %v4603_v14 = vpack.c.bf16 %v1298_v42, %v1298_v42  ;;  %v5687_v27 = vrot.slane %v4158_v49, 6 }
 0x1a6   : > { %v4595_v63 = vsel %vm2040_vm12, %v5683_v39, %v2026_v34 }
 0x1a7   : > { %1398 = vrot.lane.b32.xlu2 %v4513_v28, %s3105_s15  ;;  %5684 = vst [vmem:[#allocation12_spill] sm:$0xff] %v4595_v63  ;;  %v4615_v39 = vsel %vm2226_vm13, %v2212_v19, %v5687_v27  ;;  %v5612_v63 = vrot.slane %v4180_v0, 6 }
 0x1a8   : > { %1400 = vrot.lane.b32.xlu1 %v4504_v37, %s3105_s15  ;;  %5688 = vst [vmem:[#allocation4_spill] sm:$0xff] %v4615_v39 }
 0x1a9   : > { %v1193_v15 = vpop.permute.xlu2 %1192 }
 0x1aa   : > { %1256 = vst.msk [vmem:[#allocation2 + $0x18] sm:$0xf] %vm1249_vm10, %v1193_v15  ;;  %v4601_v15 = vsel %vm2040_vm12, %v2026_v34, %v5685_v36  ;;  %v5689_v34 = vrot.slane %v4010_v50, 6  ;;  %v5691_v36 = vrot.slane %v4218_v61, 5 }
 0x1ab   : > { %1408 = vrot.lane.b32.xlu0 %v4561_v30, %s3105_s15 }
 0x1ac   : > { %v1185_v59 = vpop.permute.xlu0 %1184  ;;  %v4625_v42 = vsel %vm2226_vm13, %v5689_v34, %v2212_v19  ;;  %v4633_v27 = vsel %vm2040_vm12, %v2032_v31, %v5691_v36  ;;  %v5614_v19 = vrot.slane %v4238_v11, 4  ;;  %v5613_v34 = vrot.slane %v4228_v25, 4 }
 0x1ad   : > { %1252 = vst.msk [vmem:[#allocation2 + $0x8] sm:$0xf] %vm1249_vm10, %v1185_v59  ;;  %v4609_v59 = vsel %vm2040_vm12, %v5686_v58, %v2032_v31  ;;  %v5692_v58 = vrot.slane %v4218_v61, 6  ;;  %v5616_v31 = vrot.slane %v4204_v23, 6  ;;  %v5615_v36 = vrot.slane %v4238_v11, 6 }
 0x1ae   : > { %v1181_v17 = vpop.permute.xlu1 %1180  ;;  %5690 = vst [vmem:[#allocation13_spill] sm:$0xff] %v4625_v42  ;;  %v4652_v42 = vpack.c.bf16 %v4406_v1, %v4406_v1  ;;  %v2224_v1 = vrot.slane %v4235_v18, 6 }
 0x1af   : > { %1404 = vrot.lane.b32.xlu2 %v4588_v52, %s3105_s15  ;;  %1250 = vst.msk [vmem:[#allocation2] sm:$0xf] %vm1249_vm10, %v1181_v17  ;;  %v4641_v17 = vsel %vm2226_vm13, %v5612_v63, %v5692_v58  ;;  %v5618_v63 = vrot.slane %v4228_v25, 6 }
 0x1b0   : > { %1406 = vrot.lane.b32.xlu1 %v4603_v14, %s3105_s15  ;;  %5693 = vst [vmem:[#allocation5_spill] sm:$0xff] %v4641_v17 }
 0x1b1   : > { %v1199_v39 = vpop.permute.xlu2 %1198 }
 0x1b2   : > { %1259 = vst.msk [vmem:[#allocation2 + $0x24] sm:$0xf] %vm1249_vm10, %v1199_v39  ;;  %v4660_v39 = vsel %vm1761_vm11, %v5614_v19, %v5613_v34  ;;  %v4681_v19 = vsel %vm2226_vm13, %v5618_v63, %v2224_v1 }
 0x1b3   : > { %1461 = vrot.lane.b32.xlu0 %v4344_v21, %s3106_s16  ;;  %v4669_v21 = vsel %vm2226_vm13, %v5616_v31, %v5615_v36  ;;  %v5619_v36 = vrot.slane %v4286_v16, 6  ;;  %v5617_v31 = vrot.slane %v4235_v18, 5 }
 0x1b5   : > { %v1191_v58 = vpop.permute.xlu0 %1190 }
 0x1b6   : > { %1255 = vst.msk [vmem:[#allocation2 + $0x14] sm:$0xf] %vm1249_vm10, %v1191_v58  ;;  %v2039_v58 = vrot.slane %v4286_v16, 5 }
 0x1b7   : > { %1410 = vrot.lane.b32.xlu2 %v4652_v42, %s3105_s15  ;;  %s2869_s15 = smul.u32 36, %s5740_s19 }
 0x1b8   : > { %1459 = vrot.lane.b32.xlu1 %v4356_v9, %s3106_s16 }
 0x1b9   : > { %v1205_v34 = vpop.permute.xlu2 %1204 }
 0x1ba   : > { %v1189_v17 = vpop.permute.xlu1 %1188  ;;  %1262 = vst.msk [vmem:[#allocation2 + $0x30] sm:$0xf] %vm1249_vm10, %v1205_v34 }
 0x1bb   : > { %1254 = vst.msk [vmem:[#allocation2 + $0x10] sm:$0xf] %vm1249_vm10, %v1189_v17  ;;  %1467 = vrot.lane.b32.xlu0 %v4374_v45, %s3106_s16  ;;  %v4701_v45 = vsel %vm2040_vm12, %v5617_v31, %v2039_v58  ;;  %v4707_v17 = vsel %vm2226_vm13, %v2224_v1, %v5619_v36 }
 0x1bd   : > { %v1197_v9 = vpop.permute.xlu0 %1196 }
 0x1be   : > { %1258 = vst.msk [vmem:[#allocation2 + $0x20] sm:$0xf] %vm1249_vm10, %v1197_v9 }
 0x1bf   : > { %1463 = vrot.lane.b32.xlu2 %v4387_v13, %s3106_s16 }
 0x1c0   : > { %1465 = vrot.lane.b32.xlu1 %v4389_v44, %s3106_s16 }
 0x1c1   : > { %v1211_v34 = vpop.permute.xlu2 %1210 }
 0x1c2   : > { %v1195_v9 = vpop.permute.xlu1 %1194  ;;  %1265 = vst.msk [vmem:[#allocation2 + $0x3c] sm:$0xf] %vm1249_vm10, %v1211_v34 }
 0x1c3   : > { %1257 = vst.msk [vmem:[#allocation2 + $0x1c] sm:$0xf] %vm1249_vm10, %v1195_v9  ;;  %1473 = vrot.lane.b32.xlu0 %v4409_v29, %s3106_s16  ;;  %v1557_v9 = vrot.slane %v3997_v51, 3 }
 0x1c5   : > { %v1203_v13 = vpop.permute.xlu0 %1202 }
 0x1c6   : > { %1261 = vst.msk [vmem:[#allocation2 + $0x2c] sm:$0xf] %vm1249_vm10, %v1203_v13  ;;  %v1554_v13 = vrot.slane %v3975_v7, 3 }
 0x1c7   : > { %1469 = vrot.lane.b32.xlu2 %v4419_v32, %s3106_s16 }
 0x1c8   : > { %1471 = vrot.lane.b32.xlu1 %v4421_v46, %s3106_s16 }
 0x1c9   : > { %v1217_v44 = vpop.permute.xlu2 %1216 }
 0x1ca   : > { %v1201_v1 = vpop.permute.xlu1 %1200  ;;  %1268 = vst.msk [vmem:[#allocation2 + $0x48] sm:$0xf] %vm1249_vm10, %v1217_v44 }
 0x1cb   : > { %1260 = vst.msk [vmem:[#allocation2 + $0x28] sm:$0xf] %vm1249_vm10, %v1201_v1  ;;  %1479 = vrot.lane.b32.xlu0 %v4430_v2, %s3106_s16 }
 0x1cd   : > { %v1209_v34 = vpop.permute.xlu0 %1208 }
 0x1ce   : > { %1264 = vst.msk [vmem:[#allocation2 + $0x38] sm:$0xf] %vm1249_vm10, %v1209_v34 }
 0x1cf   : > { %1475 = vrot.lane.b32.xlu2 %v4440_v55, %s3106_s16 }
 0x1d0   : > { %1477 = vrot.lane.b32.xlu1 %v4442_v60, %s3106_s16 }
 0x1d1   : > { %v1223_v29 = vpop.permute.xlu2 %1222 }
 0x1d2   : > { %v1207_v32 = vpop.permute.xlu1 %1206  ;;  %1271 = vst.msk [vmem:[#allocation2 + $0x54] sm:$0xf] %vm1249_vm10, %v1223_v29  ;;  %v1559_v29 = vrot.slane %v4024_v41, 3 }
 0x1d3   : > { %1263 = vst.msk [vmem:[#allocation2 + $0x34] sm:$0xf] %vm1249_vm10, %v1207_v32  ;;  %1485 = vrot.lane.b32.xlu0 %v4452_v33, %s3106_s16  ;;  %v1560_v32 = vrot.slane %v4010_v50, 3 }
 0x1d5   : > { %v1215_v46 = vpop.permute.xlu0 %1214 }
 0x1d6   : > { %1267 = vst.msk [vmem:[#allocation2 + $0x44] sm:$0xf] %vm1249_vm10, %v1215_v46 }
 0x1d7   : > { %1481 = vrot.lane.b32.xlu2 %v4466_v22, %s3106_s16 }
 0x1d8   : > { %1483 = vrot.lane.b32.xlu1 %v4476_v20, %s3106_s16 }
 0x1d9   : > { %v1369_v2 = vpop.permute.xlu2 %1368 }
 0x1da   : > { %v1213_v55 = vpop.permute.xlu1 %1212  ;;  %1437 = vst.msk [vmem:[#allocation2 + $0x4] sm:$0xf] %vm1435_vm14, %v1369_v2 }
 0x1db   : > { %1266 = vst.msk [vmem:[#allocation2 + $0x40] sm:$0xf] %vm1249_vm10, %v1213_v55  ;;  %1491 = vrot.lane.b32.xlu0 %v4488_v48, %s3106_s16  ;;  %v1590_v55 = vsel %vm1575_vm15, %v1559_v29, %v1560_v32 }
 0x1dd   : > { %v1221_v60 = vpop.permute.xlu0 %1220 }
 0x1de   : > { %1270 = vst.msk [vmem:[#allocation2 + $0x50] sm:$0xf] %vm1249_vm10, %v1221_v60  ;;  %v1558_v60 = vrot.slane %v4001_v3, 3 }
 0x1df   : > { %1487 = vrot.lane.b32.xlu2 %v4513_v28, %s3106_s16  ;;  %v1556_v28 = vrot.slane %v4006_v26, 3 }
 0x1e0   : > { %1489 = vrot.lane.b32.xlu1 %v4504_v37, %s3106_s16 }
 0x1e1   : > { %v1375_v33 = vpop.permute.xlu2 %1374 }
 0x1e2   : > { %v1219_v22 = vpop.permute.xlu1 %1218  ;;  %1440 = vst.msk [vmem:[#allocation2 + $0x10] sm:$0xf] %vm1435_vm14, %v1375_v33 }
 0x1e3   : > { %1269 = vst.msk [vmem:[#allocation2 + $0x4c] sm:$0xf] %vm1249_vm10, %v1219_v22  ;;  %1497 = vrot.lane.b32.xlu0 %v4561_v30, %s3106_s16  ;;  %v1604_v22 = vpack.c.bf16 %v1590_v55, %v1590_v55 }
 0x1e5   : > { %v1367_v20 = vpop.permute.xlu0 %1366 }
 0x1e6   : > { %1436 = vst.msk [vmem:[#allocation2] sm:$0xf] %vm1435_vm14, %v1367_v20 }
 0x1e7   : > { %1493 = vrot.lane.b32.xlu2 %v4588_v52, %s3106_s16  ;;  %v1555_v52 = vrot.slane %v3985_v62, 3 }
 0x1e8   : > { %1495 = vrot.lane.b32.xlu1 %v4603_v14, %s3106_s16  ;;  %v1593_v14 = vsel %vm1575_vm15, %v1556_v28, %v1557_v9 }
 0x1e9   : > { %v1381_v48 = vpop.permute.xlu2 %1380  ;;  %v1595_v34 = vsel %vm1575_vm15, %v1554_v13, %v1555_v52 }
 0x1ea   : > { %v1225_v37 = vpop.permute.xlu1 %1224  ;;  %1443 = vst.msk [vmem:[#allocation2 + $0x1c] sm:$0xf] %vm1435_vm14, %v1381_v48  ;;  %v1592_v48 = vsel %vm1575_vm15, %v1557_v9, %v1558_v60  ;;  %v1561_v9 = vrot.slane %v4021_v24, 3 }
 0x1eb   : > { %1272 = vst.msk [vmem:[#allocation2 + $0x58] sm:$0xf] %vm1249_vm10, %v1225_v37  ;;  %1503 = vrot.lane.b32.xlu0 %v4358_v47, %s3106_s16  ;;  %v1601_v47 = vpack.c.bf16 %v1593_v14, %v1593_v14  ;;  %v1562_v37 = vrot.slane %v4158_v49, 3  ;;  %v1602_v14 = vpack.c.bf16 %v1592_v48, %v1592_v48 }
 0x1ed   : > { %v1373_v30 = vpop.permute.xlu0 %1372 }
 0x1ee   : > { %1439 = vst.msk [vmem:[#allocation2 + $0xc] sm:$0xf] %vm1435_vm14, %v1373_v30  ;;  %v1591_v30 = vsel %vm1575_vm15, %v1558_v60, %v1559_v29  ;;  %v1589_v29 = vsel %vm1575_vm15, %v1560_v32, %v1561_v9  ;;  %v1564_v32 = vrot.slane %v4049_v53, 3 }
 0x1ef   : > { %1499 = vrot.lane.b32.xlu2 %v4652_v42, %s3106_s16  ;;  %v1599_v42 = vpack.c.bf16 %v1595_v34, %v1595_v34  ;;  %v1605_v55 = vpack.c.bf16 %v1589_v29, %v1589_v29 }
 0x1f0   : > { %1501 = vrot.lane.b32.xlu1 %v4318_v54, %s3106_s16  ;;  %v1594_v54 = vsel %vm1575_vm15, %v1555_v52, %v1556_v28  ;;  %v1563_v28 = vrot.slane %v4028_v12, 3  ;;  %s286_s16 = sadd.s32 %s2869_s15, %s2868_s14 }
 0x1f1   : > { %v1387_v44 = vpop.permute.xlu2 %1386  ;;  %v1600_v2 = vpack.c.bf16 %v1594_v54, %v1594_v54 }
 0x1f2   : > { %v1371_v1 = vpop.permute.xlu1 %1370  ;;  %1446 = vst.msk [vmem:[#allocation2 + $0x28] sm:$0xf] %vm1435_vm14, %v1387_v44  ;;  %v1603_v44 = vpack.c.bf16 %v1591_v30, %v1591_v30 }
 0x1f3   : > { %1438 = vst.msk [vmem:[#allocation2 + $0x8] sm:$0xf] %vm1435_vm14, %v1371_v1  ;;  %1649 = vrot.lane.b32.xlu0 %v1601_v47, %s3107_s17  ;;  %v1587_v47 = vsel %vm1575_vm15, %v1562_v37, %v1563_v28 }
 0x1f4   : > { %v1607_v34 = vpack.c.bf16 %v1587_v47, %v1587_v47 }
 0x1f5   : > { %v1379_v46 = vpop.permute.xlu0 %1378 }
 0x1f6   : > { %1442 = vst.msk [vmem:[#allocation2 + $0x18] sm:$0xf] %vm1435_vm14, %v1379_v46  ;;  %v1566_v46 = vrot.slane %v4176_v35, 3 }
 0x1f7   : > { %1645 = vrot.lane.b32.xlu2 %v1599_v42, %s3107_s17  ;;  %v1565_v42 = vrot.slane %v4187_v56, 3 }
 0x1f8   : > { %1647 = vrot.lane.b32.xlu1 %v1600_v2, %s3107_s17  ;;  %v1588_v2 = vsel %vm1575_vm15, %v1561_v9, %v1562_v37  ;;  %v1586_v37 = vsel %vm1575_vm15, %v1563_v28, %v1564_v32  ;;  %v1567_v28 = vrot.slane %v4180_v0, 3 }
 0x1f9   : > { %v1393_v33 = vpop.permute.xlu2 %1392  ;;  %v1608_v47 = vpack.c.bf16 %v1586_v37, %v1586_v37 }
 0x1fa   : > { %v1377_v20 = vpop.permute.xlu1 %1376  ;;  %1449 = vst.msk [vmem:[#allocation2 + $0x34] sm:$0xf] %vm1435_vm14, %v1393_v33  ;;  %v1606_v33 = vpack.c.bf16 %v1588_v2, %v1588_v2 }
 0x1fb   : > { %1441 = vst.msk [vmem:[#allocation2 + $0x14] sm:$0xf] %vm1435_vm14, %v1377_v20  ;;  %1655 = vrot.lane.b32.xlu0 %v1604_v22, %s3107_s17  ;;  %v1584_v22 = vsel %vm1575_vm15, %v1565_v42, %v1566_v46 }
 0x1fc   : > { %v1610_v48 = vpack.c.bf16 %v1584_v22, %v1584_v22 }
 0x1fd   : > { %v1385_v52 = vpop.permute.xlu0 %1384 }
 0x1fe   : > { %1445 = vst.msk [vmem:[#allocation2 + $0x24] sm:$0xf] %vm1435_vm14, %v1385_v52  ;;  %v1569_v52 = vrot.slane %v4201_v38, 3 }
 0x1ff   : > { %1651 = vrot.lane.b32.xlu2 %v1602_v14, %s3107_s17  ;;  %v1568_v14 = vrot.slane %v4218_v61, 3 }
 0x200   : > { %1653 = vrot.lane.b32.xlu1 %v1603_v44, %s3107_s17  ;;  %v1585_v44 = vsel %vm1575_vm15, %v1564_v32, %v1565_v42  ;;  %v1583_v42 = vsel %vm1575_vm15, %v1566_v46, %v1567_v28  ;;  %v1570_v46 = vrot.slane %v4204_v23, 3 }
 0x201   : > { %v1399_v1 = vpop.permute.xlu2 %1398  ;;  %v1611_v22 = vpack.c.bf16 %v1583_v42, %v1583_v42 }
 0x202   : > { %v1383_v54 = vpop.permute.xlu1 %1382  ;;  %1452 = vst.msk [vmem:[#allocation2 + $0x40] sm:$0xf] %vm1435_vm14, %v1399_v1  ;;  %v1609_v1 = vpack.c.bf16 %v1585_v44, %v1585_v44 }
 0x203   : > { %1444 = vst.msk [vmem:[#allocation2 + $0x20] sm:$0xf] %vm1435_vm14, %v1383_v54  ;;  %1661 = vrot.lane.b32.xlu0 %v1607_v34, %s3107_s17  ;;  %v1581_v34 = vsel %vm1575_vm15, %v1568_v14, %v1569_v52 }
 0x204   : > { %v1613_v29 = vpack.c.bf16 %v1581_v34, %v1581_v34 }
 0x205   : > { %v1391_v60 = vpop.permute.xlu0 %1390 }
 0x206   : > { %1448 = vst.msk [vmem:[#allocation2 + $0x30] sm:$0xf] %vm1435_vm14, %v1391_v60  ;;  %v1572_v60 = vrot.slane %v4228_v25, 3 }
 0x207   : > { %1657 = vrot.lane.b32.xlu2 %v1605_v55, %s3107_s17  ;;  %v1571_v55 = vrot.slane %v4238_v11, 3 }
 0x208   : > { %1659 = vrot.lane.b32.xlu1 %v1606_v33, %s3107_s17  ;;  %v1582_v33 = vsel %vm1575_vm15, %v1567_v28, %v1568_v14  ;;  %v1580_v14 = vsel %vm1575_vm15, %v1569_v52, %v1570_v46  ;;  %v1573_v52 = vrot.slane %v4235_v18, 3 }
 0x209   : > { %v1405_v20 = vpop.permute.xlu2 %1404  ;;  %v1614_v34 = vpack.c.bf16 %v1580_v14, %v1580_v14 }
 0x20a   : > { %v1389_v30 = vpop.permute.xlu1 %1388  ;;  %1455 = vst.msk [vmem:[#allocation2 + $0x4c] sm:$0xf] %vm1435_vm14, %v1405_v20  ;;  %v1612_v20 = vpack.c.bf16 %v1582_v33, %v1582_v33 }
 0x20b   : > { %1447 = vst.msk [vmem:[#allocation2 + $0x2c] sm:$0xf] %vm1435_vm14, %v1389_v30  ;;  %1667 = vrot.lane.b32.xlu0 %v1610_v48, %s3107_s17  ;;  %v1578_v48 = vsel %vm1575_vm15, %v1571_v55, %v1572_v60 }
 0x20c   : > { %v1616_v37 = vpack.c.bf16 %v1578_v48, %v1578_v48 }
 0x20d   : > { %v1397_v9 = vpop.permute.xlu0 %1396 }
 0x20e   : > { %1451 = vst.msk [vmem:[#allocation2 + $0x3c] sm:$0xf] %vm1435_vm14, %v1397_v9  ;;  %v1579_v9 = vsel %vm1575_vm15, %v1570_v46, %v1571_v55  ;;  %v1577_v55 = vsel %vm1575_vm15, %v1572_v60, %v1573_v52  ;;  %v1553_v60 = vrot.slane %v3993_v5, 3 }
 0x20f   : > { %1663 = vrot.lane.b32.xlu2 %v1608_v47, %s3107_s17  ;;  %v1574_v47 = vrot.slane %v4286_v16, 3 }
 0x210   : > { %1665 = vrot.lane.b32.xlu1 %v1609_v1, %s3107_s17  ;;  %v1552_v1 = vrot.slane %v3815_v43, 3 }
 0x211   : > { %v1411_v54 = vpop.permute.xlu2 %1410 }
 0x212   : > { %v1395_v2 = vpop.permute.xlu1 %1394  ;;  %1458 = vst.msk [vmem:[#allocation2 + $0x58] sm:$0xf] %vm1435_vm14, %v1411_v54  ;;  %v1615_v54 = vpack.c.bf16 %v1579_v9, %v1579_v9  ;;  %v1597_v9 = vsel %vm1575_vm15, %v1552_v1, %v1553_v60 }
 0x213   : > { %1450 = vst.msk [vmem:[#allocation2 + $0x38] sm:$0xf] %vm1435_vm14, %v1395_v2  ;;  %1673 = vrot.lane.b32.xlu0 %v1613_v29, %s3107_s17  ;;  %v1598_v29 = vsel %vm1575_vm15, %v1574_v47, %v1552_v1 }
 0x214   : > { %v1619_v42 = vpack.c.bf16 %v1598_v29, %v1598_v29  ;;  %v1620_v29 = vpack.c.bf16 %v1597_v9, %v1597_v9 }
 0x215   : > { %v1403_v32 = vpop.permute.xlu0 %1402 }
 0x216   : > { %1454 = vst.msk [vmem:[#allocation2 + $0x48] sm:$0xf] %vm1435_vm14, %v1403_v32  ;;  %v1576_v32 = vsel %vm1575_vm15, %v1573_v52, %v1574_v47 }
 0x217   : > { %1669 = vrot.lane.b32.xlu2 %v1611_v22, %s3107_s17  ;;  %v1741_v22 = vrot.slane %v3985_v62, 4  ;;  %v1618_v46 = vpack.c.bf16 %v1576_v32, %v1576_v32 }
 0x218   : > { %1671 = vrot.lane.b32.xlu1 %v1612_v20, %s3107_s17  ;;  %v1617_v20 = vpack.c.bf16 %v1577_v55, %v1577_v55 }
 0x219   : > { %v1464_v30 = vpop.permute.xlu2 %1463 }
 0x21a   : > { %v1401_v44 = vpop.permute.xlu1 %1400  ;;  %1531 = vst.msk [vmem:[#allocation2 + $0x8] sm:$0xf] %vm1528_vm0, %v1464_v30  ;;  %v5694_v30 = vrot.slane %v3975_v7, 4 }
 0x21b   : > { %1453 = vst.msk [vmem:[#allocation2 + $0x44] sm:$0xf] %vm1435_vm14, %v1401_v44  ;;  %1679 = vrot.lane.b32.xlu0 %v1616_v37, %s3107_s17 }
 0x21c   : > { %v1781_v37 = vsel %vm1761_vm11, %v5694_v30, %v1741_v22 }
 0x21d   : > { %v1409_v28 = vpop.permute.xlu0 %1408  ;;  %v4878_v14 = vpack.c.bf16 %v1781_v37, %v1781_v37 }
 0x21e   : > { %1457 = vst.msk [vmem:[#allocation2 + $0x54] sm:$0xf] %vm1435_vm14, %v1409_v28  ;;  %v1744_v28 = vrot.slane %v4001_v3, 4 }
 0x21f   : > { %1675 = vrot.lane.b32.xlu2 %v1614_v34, %s3107_s17  ;;  %v1743_v34 = vrot.slane %v3997_v51, 4 }
 0x220   : > { %1677 = vrot.lane.b32.xlu1 %v1615_v54, %s3107_s17  ;;  %v1596_v54 = vsel %vm1575_vm15, %v1553_v60, %v1554_v13 }
 0x221   : > { %v1470_v2 = vpop.permute.xlu2 %1469  ;;  %v1778_v1 = vsel %vm1761_vm11, %v1743_v34, %v1744_v28 }
 0x222   : > { %v1407_v33 = vpop.permute.xlu1 %1406  ;;  %1534 = vst.msk [vmem:[#allocation2 + $0x14] sm:$0xf] %vm1528_vm0, %v1470_v2  ;;  %v1621_v2 = vpack.c.bf16 %v1596_v54, %v1596_v54  ;;  %v4898_v55 = vpack.c.bf16 %v1778_v1, %v1778_v1  ;;  %v1749_v54 = vrot.slane %v4028_v12, 4 }
 0x223   : > { %1456 = vst.msk [vmem:[#allocation2 + $0x50] sm:$0xf] %vm1435_vm14, %v1407_v33  ;;  %1685 = vrot.lane.b32.xlu0 %v1619_v42, %s3107_s17  ;;  %v1742_v42 = vrot.slane %v4006_v26, 4 }
 0x225   : > { %v1462_v48 = vpop.permute.xlu0 %1461  ;;  %v1780_v13 = vsel %vm1761_vm11, %v1741_v22, %v1742_v42 }
 0x226   : > { %1530 = vst.msk [vmem:[#allocation2 + $0x4] sm:$0xf] %vm1528_vm0, %v1462_v48  ;;  %v1747_v48 = vrot.slane %v4021_v24, 4  ;;  %v4910_v30 = vpack.c.bf16 %v1780_v13, %v1780_v13  ;;  %v1745_v24 = vrot.slane %v4024_v41, 4 }
 0x227   : > { %1681 = vrot.lane.b32.xlu2 %v1617_v20, %s3107_s17  ;;  %v1746_v20 = vrot.slane %v4010_v50, 4 }
 0x228   : > { %1683 = vrot.lane.b32.xlu1 %v1618_v46, %s3107_s17  ;;  %v1779_v46 = vsel %vm1761_vm11, %v1742_v42, %v1743_v34  ;;  %v1777_v34 = vsel %vm1761_vm11, %v1744_v28, %v1745_v24 }
 0x229   : > { %v1476_v44 = vpop.permute.xlu2 %1475  ;;  %v4912_v60 = vpack.c.bf16 %v1779_v46, %v1779_v46  ;;  %v1775_v22 = vsel %vm1761_vm11, %v1746_v20, %v1747_v48 }
 0x22a   : > { %v1460_v47 = vpop.permute.xlu1 %1459  ;;  %1537 = vst.msk [vmem:[#allocation2 + $0x20] sm:$0xf] %vm1528_vm0, %v1476_v44 }
 0x22b   : > { %1529 = vst.msk [vmem:[#allocation2] sm:$0xf] %vm1528_vm0, %v1460_v47  ;;  %1831 = vrot.lane.b32.xlu0 %v4878_v14, %s3108_s25  ;;  %v4922_v47 = vpack.c.bf16 %v1775_v22, %v1775_v22  ;;  %v1753_v22 = vrot.slane %v4180_v0, 4 }
 0x22d   : > { %v1468_v52 = vpop.permute.xlu0 %1467 }
 0x22e   : > { %1533 = vst.msk [vmem:[#allocation2 + $0x10] sm:$0xf] %vm1528_vm0, %v1468_v52  ;;  %v1776_v52 = vsel %vm1761_vm11, %v1745_v24, %v1746_v20 }
 0x22f   : > { %1687 = vrot.lane.b32.xlu2 %v1620_v29, %s3107_s17  ;;  %v1750_v29 = vrot.slane %v4049_v53, 4  ;;  %v4936_v42 = vpack.c.bf16 %v1776_v52, %v1776_v52  ;;  %v1751_v52 = vrot.slane %v4187_v56, 4 }
 0x230   : > { %1689 = vrot.lane.b32.xlu1 %v1621_v2, %s3107_s17  ;;  %v4934_v2 = vpack.c.bf16 %v1777_v34, %v1777_v34 }
 0x231   : > { %v1482_v33 = vpop.permute.xlu2 %1481  ;;  %v1772_v28 = vsel %vm1761_vm11, %v1749_v54, %v1750_v29 }
 0x232   : > { %v1466_v32 = vpop.permute.xlu1 %1465  ;;  %1540 = vst.msk [vmem:[#allocation2 + $0x2c] sm:$0xf] %vm1528_vm0, %v1482_v33  ;;  %v1748_v33 = vrot.slane %v4158_v49, 4  ;;  %v4946_v13 = vpack.c.bf16 %v1772_v28, %v1772_v28 }
 0x233   : > { %1532 = vst.msk [vmem:[#allocation2 + $0xc] sm:$0xf] %vm1528_vm0, %v1466_v32  ;;  %1837 = vrot.lane.b32.xlu0 %v4898_v55, %s3108_s25 }
 0x234   : > { %v1774_v46 = vsel %vm1761_vm11, %v1747_v48, %v1748_v33  ;;  %v1773_v24 = vsel %vm1761_vm11, %v1748_v33, %v1749_v54  ;;  %v1771_v33 = vsel %vm1761_vm11, %v1750_v29, %v1751_v52 }
 0x235   : > { %v1474_v37 = vpop.permute.xlu0 %1473  ;;  %v4960_v34 = vpack.c.bf16 %v1773_v24, %v1773_v24  ;;  %v4982_v24 = vpack.c.bf16 %v1771_v33, %v1771_v33 }
 0x236   : > { %1536 = vst.msk [vmem:[#allocation2 + $0x1c] sm:$0xf] %vm1528_vm0, %v1474_v37  ;;  %v1752_v37 = vrot.slane %v4176_v35, 4 }
 0x237   : > { %1833 = vrot.lane.b32.xlu2 %v4910_v30, %s3108_s25 }
 0x238   : > { %1835 = vrot.lane.b32.xlu1 %v4912_v60, %s3108_s25  ;;  %v1769_v48 = vsel %vm1761_vm11, %v1752_v37, %v1753_v22 }
 0x239   : > { %v1488_v44 = vpop.permute.xlu2 %1487  ;;  %v4970_v54 = vpack.c.bf16 %v1769_v48, %v1769_v48 }
 0x23a   : > { %v1472_v9 = vpop.permute.xlu1 %1471  ;;  %1543 = vst.msk [vmem:[#allocation2 + $0x38] sm:$0xf] %vm1528_vm0, %v1488_v44  ;;  %v4958_v44 = vpack.c.bf16 %v1774_v46, %v1774_v46  ;;  %v1770_v46 = vsel %vm1761_vm11, %v1751_v52, %v1752_v37 }
 0x23b   : > { %1535 = vst.msk [vmem:[#allocation2 + $0x18] sm:$0xf] %vm1528_vm0, %v1472_v9  ;;  %1843 = vrot.lane.b32.xlu0 %v4922_v47, %s3108_s25  ;;  %v4984_v48 = vpack.c.bf16 %v1770_v46, %v1770_v46 }
 0x23d   : > { %v1480_v1 = vpop.permute.xlu0 %1479 }
 0x23e   : > { %1539 = vst.msk [vmem:[#allocation2 + $0x28] sm:$0xf] %vm1528_vm0, %v1480_v1 }
 0x23f   : > { %1839 = vrot.lane.b32.xlu2 %v4934_v2, %s3108_s25 }
 0x240   : > { %1841 = vrot.lane.b32.xlu1 %v4936_v42, %s3108_s25 }
 0x241   : > { %v1494_v32 = vpop.permute.xlu2 %1493 }
 0x242   : > { %v1478_v20 = vpop.permute.xlu1 %1477  ;;  %1546 = vst.msk [vmem:[#allocation2 + $0x44] sm:$0xf] %vm1528_vm0, %v1494_v32  ;;  %v1755_v32 = vrot.slane %v4201_v38, 4 }
 0x243   : > { %1538 = vst.msk [vmem:[#allocation2 + $0x24] sm:$0xf] %vm1528_vm0, %v1478_v20  ;;  %1849 = vrot.lane.b32.xlu0 %v4946_v13, %s3108_s25  ;;  %v1756_v20 = vrot.slane %v4204_v23, 4 }
 0x245   : > { %v1486_v9 = vpop.permute.xlu0 %1485  ;;  %v1766_v29 = vsel %vm1761_vm11, %v1755_v32, %v1756_v20 }
 0x246   : > { %1542 = vst.msk [vmem:[#allocation2 + $0x34] sm:$0xf] %vm1528_vm0, %v1486_v9  ;;  %v1800_v52 = vpack.c.bf16 %v1766_v29, %v1766_v29 }
 0x247   : > { %1845 = vrot.lane.b32.xlu2 %v4958_v44, %s3108_s25 }
 0x248   : > { %1847 = vrot.lane.b32.xlu1 %v4960_v34, %s3108_s25 }
 0x249   : > { %v1500_v1 = vpop.permute.xlu2 %1499 }
 0x24a   : > { %v1484_v28 = vpop.permute.xlu1 %1483  ;;  %1549 = vst.msk [vmem:[#allocation2 + $0x50] sm:$0xf] %vm1528_vm0, %v1500_v1  ;;  %v1754_v1 = vrot.slane %v4218_v61, 4 }
 0x24b   : > { %1541 = vst.msk [vmem:[#allocation2 + $0x30] sm:$0xf] %vm1528_vm0, %v1484_v28  ;;  %1855 = vrot.lane.b32.xlu0 %v4970_v54, %s3108_s25 }
 0x24c   : > { %v1768_v33 = vsel %vm1761_vm11, %v1753_v22, %v1754_v1  ;;  %v1767_v46 = vsel %vm1761_vm11, %v1754_v1, %v1755_v32  ;;  %v2220_v1 = vrot.slane %v4201_v38, 6 }
 0x24d   : > { %v1492_v9 = vpop.permute.xlu0 %1491  ;;  %v1799_v63 = vpack.c.bf16 %v1767_v46, %v1767_v46 }
 0x24e   : > { %1545 = vst.msk [vmem:[#allocation2 + $0x40] sm:$0xf] %vm1528_vm0, %v1492_v9  ;;  %v5001_v9 = vpack.c.bf16 %v1768_v33, %v1768_v33  ;;  %v5696_v33 = vrot.slane %v4218_v61, 6 }
 0x24f   : > { %1851 = vrot.lane.b32.xlu2 %v4982_v24, %s3108_s25 }
 0x250   : > { %1853 = vrot.lane.b32.xlu1 %v4984_v48, %s3108_s25  ;;  %v2232_v46 = vsel %vm2226_vm13, %v5696_v33, %v2220_v1  ;;  %v1760_v33 = vrot.slane %v4286_v16, 4 }
 0x251   : > { %v1646_v37 = vpop.permute.xlu2 %1645 }
 0x252   : > { %v1490_v28 = vpop.permute.xlu1 %1489  ;;  %1715 = vst.msk [vmem:[#allocation2] sm:$0xf] %vm1714_vm1, %v1646_v37  ;;  %v5695_v37 = vrot.slane %v4238_v11, 4 }
 0x253   : > { %1544 = vst.msk [vmem:[#allocation2 + $0x3c] sm:$0xf] %vm1528_vm0, %v1490_v28  ;;  %1861 = vrot.lane.b32.xlu0 %v1800_v52, %s3108_s25 }
 0x254   : > { %v1765_v32 = vsel %vm1761_vm11, %v1756_v20, %v5695_v37  ;;  %v2035_v20 = vrot.slane %v4204_v23, 5 }
 0x255   : > { %v1498_v31 = vpop.permute.xlu0 %1497 }
 0x256   : > { %1548 = vst.msk [vmem:[#allocation2 + $0x4c] sm:$0xf] %vm1528_vm0, %v1498_v31  ;;  %v5015_v31 = vpack.c.bf16 %v1765_v32, %v1765_v32  ;;  %v5697_v32 = vrot.slane %v4218_v61, 5 }
 0x257   : > { %1857 = vrot.lane.b32.xlu2 %v5001_v9, %s3108_s25 }
 0x258   : > { %1859 = vrot.lane.b32.xlu1 %v1799_v63, %s3108_s25 }
 0x259   : > { %v1652_v29 = vpop.permute.xlu2 %1651 }
 0x25a   : > { %v1496_v22 = vpop.permute.xlu1 %1495  ;;  %1718 = vst.msk [vmem:[#allocation2 + $0xc] sm:$0xf] %vm1714_vm1, %v1652_v29  ;;  %v2034_v29 = vrot.slane %v4201_v38, 5 }
 0x25b   : > { %1547 = vst.msk [vmem:[#allocation2 + $0x48] sm:$0xf] %vm1528_vm0, %v1496_v22  ;;  %1950 = vrot.lane.b32.xlu0 %v1800_v52, %s3109_s26  ;;  %v2262_v22 = vpack.c.bf16 %v2232_v46, %v2232_v46 }
 0x25c   : > { %v2045_v38 = vsel %vm2040_vm12, %v2034_v29, %v2035_v20 }
 0x25d   : > { %v1504_v28 = vpop.permute.xlu0 %1503  ;;  %v2077_v61 = vpack.c.bf16 %v2045_v38, %v2045_v38  ;;  %v5699_v38 = vrot.slane %v4228_v25, 4 }
 0x25e   : > { %1551 = vst.msk [vmem:[#allocation2 + $0x58] sm:$0xf] %vm1528_vm0, %v1504_v28  ;;  %v2046_v28 = vsel %vm2040_vm12, %v5697_v32, %v2034_v29  ;;  %v5698_v29 = vrot.slane %v4204_v23, 6  ;;  %v5184_v23 = vpack.c.bf16 %v4660_v39, %v4660_v39 }
 0x25f   : > { %1863 = vrot.lane.b32.xlu2 %v5015_v31, %s3108_s25  ;;  %v2076_v46 = vpack.c.bf16 %v2046_v28, %v2046_v28 }
 0x260   : > { %1948 = vrot.lane.b32.xlu1 %v1799_v63, %s3109_s26  ;;  %v1759_v63 = vrot.slane %v4235_v18, 4  ;;  %v2231_v28 = vsel %vm2226_vm13, %v2220_v1, %v5698_v29  ;;  %v5700_v29 = vrot.slane %v3993_v5, 4 }
 0x261   : > { %v1658_v52 = vpop.permute.xlu2 %1657 }
 0x262   : > { %v1502_v37 = vpop.permute.xlu1 %1501  ;;  %1721 = vst.msk [vmem:[#allocation2 + $0x18] sm:$0xf] %vm1714_vm1, %v1658_v52  ;;  %v1762_v32 = vsel %vm1761_vm11, %v1759_v63, %v1760_v33 }
 0x263   : > { %1550 = vst.msk [vmem:[#allocation2 + $0x54] sm:$0xf] %vm1528_vm0, %v1502_v37  ;;  %2320 = vrot.lane.b32.xlu0 %v2262_v22, %s3110_s27  ;;  %v5045_v37 = vpack.c.bf16 %v1762_v32, %v1762_v32 }
 0x265   : > { %v1650_v52 = vpop.permute.xlu0 %1649 }
 0x266   : > { %1717 = vst.msk [vmem:[#allocation2 + $0x8] sm:$0xf] %vm1714_vm1, %v1650_v52  ;;  %v2263_v52 = vpack.c.bf16 %v2231_v28, %v2231_v28 }
 0x267   : > { %2134 = vrot.lane.b32.xlu2 %v2076_v46, %s3111_s28  ;;  %v1763_v46 = vsel %vm1761_vm11, %v5699_v38, %v1759_v63 }
 0x268   : > { %2136 = vrot.lane.b32.xlu1 %v2077_v61, %s3111_s28  ;;  %v5059_v32 = vpack.c.bf16 %v1763_v46, %v1763_v46 }
 0x269   : > { %v1664_v22 = vpop.permute.xlu2 %1663 }
 0x26a   : > { %v1648_v36 = vpop.permute.xlu1 %1647  ;;  %1724 = vst.msk [vmem:[#allocation2 + $0x24] sm:$0xf] %vm1714_vm1, %v1664_v22 }
 0x26b   : > { %1716 = vst.msk [vmem:[#allocation2 + $0x4] sm:$0xf] %vm1714_vm1, %v1648_v36  ;;  %1869 = vrot.lane.b32.xlu0 %v5045_v37, %s3108_s25  ;;  %v1738_v36 = vrot.slane %v3815_v43, 4 }
 0x26d   : > { %v1656_v61 = vpop.permute.xlu0 %1655  ;;  %v1784_v63 = vsel %vm1761_vm11, %v1760_v33, %v1738_v36  ;;  %v1783_v28 = vsel %vm1761_vm11, %v1738_v36, %v5700_v29  ;;  %v2017_v29 = vrot.slane %v3815_v43, 5 }
 0x26e   : > { %1720 = vst.msk [vmem:[#allocation2 + $0x14] sm:$0xf] %vm1714_vm1, %v1656_v61  ;;  %v5076_v38 = vpack.c.bf16 %v1784_v63, %v1784_v63  ;;  %v2022_v61 = vrot.slane %v3997_v51, 5  ;;  %v2018_v63 = vrot.slane %v3993_v5, 5 }
 0x26f   : > { %2322 = vrot.lane.b32.xlu2 %v2263_v52, %s3110_s27  ;;  %v5078_v52 = vpack.c.bf16 %v1783_v28, %v1783_v28 }
 0x270   : > { %1867 = vrot.lane.b32.xlu1 %v5059_v32, %s3108_s25 }
 0x271   : > { %v1670_v1 = vpop.permute.xlu2 %1669 }
 0x272   : > { %v1654_v22 = vpop.permute.xlu1 %1653  ;;  %1727 = vst.msk [vmem:[#allocation2 + $0x30] sm:$0xf] %vm1714_vm1, %v1670_v1  ;;  %v5701_v1 = vrot.slane %v4006_v26, 5 }
 0x273   : > { %1719 = vst.msk [vmem:[#allocation2 + $0x10] sm:$0xf] %vm1714_vm1, %v1654_v22  ;;  %1924 = vrot.lane.b32.xlu0 %v4912_v60, %s3109_s26 }
 0x274   : > { %v2058_v22 = vsel %vm2040_vm12, %v5701_v1, %v2022_v61 }
 0x275   : > { %v1662_v46 = vpop.permute.xlu0 %1661 }
 0x276   : > { %1723 = vst.msk [vmem:[#allocation2 + $0x20] sm:$0xf] %vm1714_vm1, %v1662_v46 }
 0x277   : > { %1960 = vrot.lane.b32.xlu2 %v5076_v38, %s3109_s26 }
 0x278   : > { %1962 = vrot.lane.b32.xlu1 %v5078_v52, %s3109_s26 }
 0x279   : > { %v1676_v33 = vpop.permute.xlu2 %1675 }
 0x27a   : > { %v1660_v60 = vpop.permute.xlu1 %1659  ;;  %1730 = vst.msk [vmem:[#allocation2 + $0x3c] sm:$0xf] %vm1714_vm1, %v1676_v33  ;;  %v2063_v33 = vsel %vm2040_vm12, %v2039_v58, %v2017_v29 }
 0x27b   : > { %1722 = vst.msk [vmem:[#allocation2 + $0x1c] sm:$0xf] %vm1714_vm1, %v1660_v60  ;;  %1938 = vrot.lane.b32.xlu0 %v4946_v13, %s3109_s26  ;;  %v2064_v13 = vpack.c.bf16 %v2058_v22, %v2058_v22  ;;  %v2028_v60 = vrot.slane %v4028_v12, 5  ;;  %v5702_v22 = vrot.slane %v4049_v53, 5 }
 0x27d   : > { %v1668_v36 = vpop.permute.xlu0 %1667  ;;  %v2051_v58 = vsel %vm2040_vm12, %v2028_v60, %v5702_v22 }
 0x27e   : > { %1726 = vst.msk [vmem:[#allocation2 + $0x2c] sm:$0xf] %vm1714_vm1, %v1668_v36 }
 0x27f   : > { %1926 = vrot.lane.b32.xlu2 %v4898_v55, %s3109_s26  ;;  %v2062_v55 = vsel %vm2040_vm12, %v2017_v29, %v2018_v63  ;;  %v5703_v29 = vrot.slane %v4001_v3, 5 }
 0x280   : > { %1936 = vrot.lane.b32.xlu1 %v4960_v34, %s3109_s26  ;;  %v2082_v34 = vpack.c.bf16 %v2063_v33, %v2063_v33  ;;  %v2083_v1 = vpack.c.bf16 %v2062_v55, %v2062_v55  ;;  %v2208_v55 = vrot.slane %v3997_v51, 6  ;;  %v2204_v51 = vrot.slane %v3993_v5, 6 }
 0x281   : > { %v1682_v28 = vpop.permute.xlu2 %1681  ;;  %v2057_v33 = vsel %vm2040_vm12, %v2022_v61, %v5703_v29 }
 0x282   : > { %v1666_v46 = vpop.permute.xlu1 %1665  ;;  %1733 = vst.msk [vmem:[#allocation2 + $0x48] sm:$0xf] %vm1714_vm1, %v1682_v28 }
 0x283   : > { %1725 = vst.msk [vmem:[#allocation2 + $0x28] sm:$0xf] %vm1714_vm1, %v1666_v46  ;;  %2110 = vrot.lane.b32.xlu0 %v2064_v13, %s3111_s28  ;;  %v2071_v13 = vpack.c.bf16 %v2051_v58, %v2051_v58 }
 0x285   : > { %v1674_v36 = vpop.permute.xlu0 %1673 }
 0x286   : > { %1729 = vst.msk [vmem:[#allocation2 + $0x38] sm:$0xf] %vm1714_vm1, %v1674_v36 }
 0x287   : > { %2146 = vrot.lane.b32.xlu2 %v2082_v34, %s3111_s28  ;;  %v5704_v34 = vrot.slane %v4158_v49, 5 }
 0x288   : > { %2148 = vrot.lane.b32.xlu1 %v2083_v1, %s3111_s28  ;;  %v2065_v1 = vpack.c.bf16 %v2057_v33, %v2057_v33  ;;  %v5706_v33 = vrot.slane %v4286_v16, 6  ;;  %v5707_v16 = vrot.slane %v4049_v53, 6  ;;  %v5709_v53 = vrot.slane %v4158_v49, 6 }
 0x289   : > { %v1688_v28 = vpop.permute.xlu2 %1687  ;;  %v2052_v36 = vsel %vm2040_vm12, %v5704_v34, %v2028_v60  ;;  %v2214_v34 = vrot.slane %v4028_v12, 6 }
 0x28a   : > { %v1672_v46 = vpop.permute.xlu1 %1671  ;;  %1736 = vst.msk [vmem:[#allocation2 + $0x54] sm:$0xf] %vm1714_vm1, %v1688_v28  ;;  %v2070_v58 = vpack.c.bf16 %v2052_v36, %v2052_v36  ;;  %v5705_v28 = vrot.slane %v4006_v26, 6 }
 0x28b   : > { %1728 = vst.msk [vmem:[#allocation2 + $0x34] sm:$0xf] %vm1714_vm1, %v1672_v46  ;;  %2124 = vrot.lane.b32.xlu0 %v2071_v13, %s3111_s28  ;;  %v2203_v13 = vrot.slane %v3815_v43, 6 }
 0x28c   : > { %v2244_v61 = vsel %vm2226_vm13, %v5705_v28, %v2208_v55 }
 0x28d   : > { %v1680_v22 = vpop.permute.xlu0 %1679  ;;  %v2250_v46 = vpack.c.bf16 %v2244_v61, %v2244_v61  ;;  %v2249_v26 = vsel %vm2226_vm13, %v5706_v33, %v2203_v13  ;;  %v2248_v43 = vsel %vm2226_vm13, %v2203_v13, %v2204_v51  ;;  %v5708_v13 = vrot.slane %v4001_v3, 6 }
 0x28e   : > { %1732 = vst.msk [vmem:[#allocation2 + $0x44] sm:$0xf] %vm1714_vm1, %v1680_v22  ;;  %v2268_v36 = vpack.c.bf16 %v2249_v26, %v2249_v26  ;;  %v2269_v22 = vpack.c.bf16 %v2248_v43, %v2248_v43 }
 0x28f   : > { %2112 = vrot.lane.b32.xlu2 %v2065_v1, %s3111_s28 }
 0x290   : > { %2122 = vrot.lane.b32.xlu1 %v2070_v58, %s3111_s28  ;;  %v2237_v58 = vsel %vm2226_vm13, %v2214_v34, %v5707_v16  ;;  %v2037_v16 = vrot.slane %v4228_v25, 5 }
 0x291   : > { %v1834_v60 = vpop.permute.xlu2 %1833  ;;  %v2257_v28 = vpack.c.bf16 %v2237_v58, %v2237_v58 }
 0x292   : > { %v1678_v29 = vpop.permute.xlu1 %1677  ;;  %1902 = vst.msk [vmem:[#allocation2 + $0x4] sm:$0xf] %vm1900_vm2, %v1834_v60  ;;  %v2243_v60 = vsel %vm2226_vm13, %v2208_v55, %v5708_v13 }
 0x293   : > { %1731 = vst.msk [vmem:[#allocation2 + $0x40] sm:$0xf] %vm1714_vm1, %v1678_v29  ;;  %2296 = vrot.lane.b32.xlu0 %v2250_v46, %s3110_s27  ;;  %v2036_v46 = vrot.slane %v4238_v11, 5  ;;  %v2238_v29 = vsel %vm2226_vm13, %v5709_v53, %v2214_v34  ;;  %v2251_v33 = vpack.c.bf16 %v2243_v60, %v2243_v60  ;;  %v5212_v60 = vpack.c.bf16 %v4474_v4, %v4474_v4 }
 0x294   : > { %v2256_v43 = vpack.c.bf16 %v2238_v29, %v2238_v29  ;;  %v2019_v29 = vrot.slane %v3975_v7, 5 }
 0x295   : > { %v1686_v1 = vpop.permute.xlu0 %1685  ;;  %v2044_v3 = vsel %vm2040_vm12, %v2035_v20, %v2036_v46  ;;  %v5710_v20 = vrot.slane %v4228_v25, 6 }
 0x296   : > { %1735 = vst.msk [vmem:[#allocation2 + $0x50] sm:$0xf] %vm1714_vm1, %v1686_v1  ;;  %v5711_v1 = vrot.slane %v4238_v11, 6  ;;  %v2043_v11 = vsel %vm2040_vm12, %v2036_v46, %v2037_v16 }
 0x297   : > { %2332 = vrot.lane.b32.xlu2 %v2268_v36, %s3110_s27  ;;  %v2078_v36 = vpack.c.bf16 %v2044_v3, %v2044_v3 }
 0x298   : > { %2334 = vrot.lane.b32.xlu1 %v2269_v22, %s3110_s27  ;;  %v2229_v22 = vsel %vm2226_vm13, %v5711_v1, %v5710_v20  ;;  %v2855_v20 = vld [vmem:[%s5575_s2] sm:$0xff] }
 0x299   : > { %v1840_v12 = vpop.permute.xlu2 %1839  ;;  %v2265_v39 = vpack.c.bf16 %v2229_v22, %v2229_v22 }
 0x29a   : > { %v1684_v61 = vpop.permute.xlu1 %1683  ;;  %1905 = vst.msk [vmem:[#allocation2 + $0x10] sm:$0xf] %vm1900_vm2, %v1840_v12 }
 0x29b   : > { %1734 = vst.msk [vmem:[#allocation2 + $0x4c] sm:$0xf] %vm1714_vm1, %v1684_v61  ;;  %2310 = vrot.lane.b32.xlu0 %v2257_v28, %s3110_s27  ;;  %v2079_v28 = vpack.c.bf16 %v2043_v11, %v2043_v11  ;;  %v2205_v11 = vrot.slane %v3975_v7, 6 }
 0x29d   : > { %v1832_v26 = vpop.permute.xlu0 %1831  ;;  %v2247_v7 = vsel %vm2226_vm13, %v2204_v51, %v2205_v11  ;;  %v2072_v51 = vpack.c.bf16 %v4523_v40, %v4523_v40  ;;  %v5719_v40 = vrot.slane %v3985_v62, 6 }
 0x29e   : > { %1901 = vst.msk [vmem:[#allocation2] sm:$0xf] %vm1900_vm2, %v1832_v26 }
 0x29f   : > { %2298 = vrot.lane.b32.xlu2 %v2251_v33, %s3110_s27  ;;  %v2416_v33 = vld [vmem:[%s5575_s2 + $0x10] sm:$0x3] }
 0x2a0   : > { %2308 = vrot.lane.b32.xlu1 %v2256_v43, %s3110_s27 }
 0x2a1   : > { %v1846_v55 = vpop.permute.xlu2 %1845 }
 0x2a2   : > { %v1690_v49 = vpop.permute.xlu1 %1689  ;;  %1908 = vst.msk [vmem:[#allocation2 + $0x1c] sm:$0xf] %vm1900_vm2, %v1846_v55 }
 0x2a3   : > { %1737 = vst.msk [vmem:[#allocation2 + $0x58] sm:$0xf] %vm1714_vm1, %v1690_v49  ;;  %2138 = vrot.lane.b32.xlu0 %v2078_v36, %s3111_s28  ;;  %v2856_v49 = vld [vmem:[%s5575_s2 + $0x8] sm:$0xff] }
 0x2a5   : > { %v1838_v34 = vpop.permute.xlu0 %1837 }
 0x2a6   : > { %1904 = vst.msk [vmem:[#allocation2 + $0xc] sm:$0xf] %vm1900_vm2, %v1838_v34 }
 0x2a7   : > { %1952 = vrot.lane.b32.xlu2 %v5015_v31, %s3109_s26  ;;  %v2264_v31 = vpack.c.bf16 %v4669_v21, %v4669_v21 }
 0x2a8   : > { %1954 = vrot.lane.b32.xlu1 %v5184_v23, %s3109_s26 }
 0x2a9   : > { %v1852_v58 = vpop.permute.xlu2 %1851 }
 0x2aa   : > { %v1836_v12 = vpop.permute.xlu1 %1835  ;;  %1911 = vst.msk [vmem:[#allocation2 + $0x28] sm:$0xf] %vm1900_vm2, %v1852_v58 }
 0x2ab   : > { %1903 = vst.msk [vmem:[#allocation2 + $0x8] sm:$0xf] %vm1900_vm2, %v1836_v12  ;;  %2326 = vrot.lane.b32.xlu0 %v2265_v39, %s3110_s27  ;;  %v5714_v39 = vrot.slane %v3985_v62, 5  ;;  %v2217_v62 = vrot.slane %v4176_v35, 6 }
 0x2ad   : > { %v1844_v61 = vpop.permute.xlu0 %1843  ;;  %v2060_v12 = vsel %vm2040_vm12, %v2019_v29, %v5714_v39 }
 0x2ae   : > { %1907 = vst.msk [vmem:[#allocation2 + $0x18] sm:$0xf] %vm1900_vm2, %v1844_v61 }
 0x2af   : > { %2140 = vrot.lane.b32.xlu2 %v2079_v28, %s3111_s28  ;;  %v2066_v28 = vpack.c.bf16 %v4500_v10, %v4500_v10  ;;  %v5716_v10 = vrot.slane %v4187_v56, 5 }
 0x2b0   : > { %2324 = vrot.lane.b32.xlu1 %v2264_v31, %s3110_s27  ;;  %v2270_v31 = vpack.c.bf16 %v2247_v7, %v2247_v7 }
 0x2b1   : > { %v1858_v13 = vpop.permute.xlu2 %1857 }
 0x2b2   : > { %v1842_v46 = vpop.permute.xlu1 %1841  ;;  %1914 = vst.msk [vmem:[#allocation2 + $0x34] sm:$0xf] %vm1900_vm2, %v1858_v13 }
 0x2b3   : > { %1906 = vst.msk [vmem:[#allocation2 + $0x14] sm:$0xf] %vm1900_vm2, %v1842_v46  ;;  %1964 = vrot.lane.b32.xlu0 %v5212_v60, %s3109_s26  ;;  %v5715_v46 = vrot.slane %v4176_v35, 5  ;;  %v5726_v35 = vld [vmem:[#allocation13_spill] sm:$0xff] }
 0x2b4   : > { %v2254_v8 = vpack.c.bf16 %v5726_v35, %v5726_v35 }
 0x2b5   : > { %v1850_v21 = vpop.permute.xlu0 %1849  ;;  %v2049_v5 = vsel %vm2040_vm12, %v5716_v10, %v5715_v46 }
 0x2b6   : > { %1910 = vst.msk [vmem:[#allocation2 + $0x24] sm:$0xf] %vm1900_vm2, %v1850_v21 }
 0x2b7   : > { %1871 = vrot.lane.b32.xlu2 %v5076_v38, %s3108_s25  ;;  %v2484_v38 = vunpack.c.l.b16 %v2416_v33 }
 0x2b8   : > { %1873 = vrot.lane.b32.xlu1 %v5078_v52, %s3108_s25  ;;  %v2061_v52 = vsel %vm2040_vm12, %v2018_v63, %v2019_v29  ;;  %v5713_v63 = vrot.slane %v4024_v41, 5  ;;  %v5718_v29 = vrot.slane %v4024_v41, 6 }
 0x2b9   : > { %v1864_v53 = vpop.permute.xlu2 %1863  ;;  %v2487_v43 = vpack.c.b16 %v2484_v38, %v2484_v38  ;;  %v2084_v3 = vpack.c.bf16 %v2061_v52, %v2061_v52 }
 0x2ba   : > { %v1848_v4 = vpop.permute.xlu1 %1847  ;;  %1917 = vst.msk [vmem:[#allocation2 + $0x40] sm:$0xf] %vm1900_vm2, %v1864_v53  ;;  %v2073_v53 = vpack.c.bf16 %v2049_v5, %v2049_v5 }
 0x2bb   : > { %1909 = vst.msk [vmem:[#allocation2 + $0x20] sm:$0xf] %vm1900_vm2, %v1848_v4  ;;  %1930 = vrot.lane.b32.xlu0 %v4936_v42, %s3109_s26  ;;  %v2529_v55 = vsel %vm2527_vm3, %v2487_v43, 0  ;;  %v5717_v4 = vrot.slane %v4010_v50, 6  ;;  %v2246_v43 = vsel %vm2226_vm13, %v2205_v11, %v5719_v40 }
 0x2bc   : > { %2858 = vmatpush.bf16.msra.mxu2 %v2529_v55  ;;  %2536 = vmatpush.bf16.msra.mxu0 %v2529_v55 }
 0x2bd   : > { %v1856_v26 = vpop.permute.xlu0 %1855  ;;  %2859 = vmatpush.bf16.msra.mxu3 %v2529_v55  ;;  %2857 = vmatpush.bf16.msra.mxu1 %v2529_v55  ;;  %v2241_v33 = vsel %vm2226_vm13, %v5718_v29, %v5717_v4 }
 0x2be   : > { %1913 = vst.msk [vmem:[#allocation2 + $0x30] sm:$0xf] %vm1900_vm2, %v1856_v26  ;;  %v2253_v38 = vpack.c.bf16 %v2241_v33, %v2241_v33 }
 0x2bf   : > { %1966 = vrot.lane.b32.xlu2 %v4878_v14, %s3109_s26 }
 0x2c0   : > { %1928 = vrot.lane.b32.xlu1 %v4934_v2, %s3109_s26  ;;  %v5712_v2 = vrot.slane %v4010_v50, 5  ;;  %2861 = vmatpush.bf16.msra.mxu2 %v2856_v49  ;;  %v2271_v50 = vpack.c.bf16 %v2246_v43, %v2246_v43 }
 0x2c1   : > { %v2135_v42 = vpop.permute.xlu2 %2134  ;;  %2537 = vmatpush.bf16.msra.mxu0 %v2856_v49  ;;  %2862 = vmatpush.bf16.msra.mxu3 %v2856_v49 }
 0x2c2   : > { %v1854_v36 = vpop.permute.xlu1 %1853  ;;  %v2055_v34 = vsel %vm2040_vm12, %v5713_v63, %v5712_v2  ;;  %2860 = vmatpush.bf16.msra.mxu1 %v2856_v49  ;;  %v5720_v49 = vrot.slane %v4187_v56, 6  ;;  %v5721_v56 = vrot.slane %v4235_v18, 5  ;;  %v2266_v18 = vpack.c.bf16 %v4681_v19, %v4681_v19  ;;  %v5722_v19 = vld [vmem:[#allocation11_spill] sm:$0xff] }
 0x2c3   : > { %1912 = vst.msk [vmem:[#allocation2 + $0x2c] sm:$0xf] %vm1900_vm2, %v1854_v36  ;;  %2150 = vrot.lane.b32.xlu0 %v2084_v3, %s3111_s28  ;;  %v2067_v22 = vpack.c.bf16 %v2055_v34, %v2055_v34 }
 0x2c4   : > { %2864 = vmatpush.bf16.msra.mxu2 %v2855_v20 }
 0x2c5   : > { %v1862_v14 = vpop.permute.xlu0 %1861  ;;  %2538 = vmatpush.bf16.msra.mxu0 %v2855_v20  ;;  %2865 = vmatpush.bf16.msra.mxu3 %v2855_v20 }
 0x2c6   : > { %1916 = vst.msk [vmem:[#allocation2 + $0x3c] sm:$0xf] %vm1900_vm2, %v1862_v14  ;;  %2863 = vmatpush.bf16.msra.mxu1 %v2855_v20  ;;  %v2258_v14 = vpack.c.bf16 %v4571_v57, %v4571_v57 }
 0x2c7   : > { %1940 = vrot.lane.b32.xlu2 %v4982_v24, %s3109_s26  ;;  %v2085_v24 = vpack.c.bf16 %v2060_v12, %v2060_v12 }
 0x2c8   : > { %1942 = vrot.lane.b32.xlu1 %v4984_v48, %s3109_s26 }
 0x2c9   : > { %v2323_v1 = vpop.permute.xlu2 %2322 }
 0x2ca   : > { %v1860_v58 = vpop.permute.xlu1 %1859 }
 0x2cb   : > { %1915 = vst.msk [vmem:[#allocation2 + $0x38] sm:$0xf] %vm1900_vm2, %v1860_v58  ;;  %2116 = vrot.lane.b32.xlu0 %v2067_v22, %s3111_s28  ;;  %v2081_v22 = vpack.c.bf16 %v4701_v45, %v4701_v45  ;;  %v2267_v45 = vpack.c.bf16 %v4707_v17, %v4707_v17 }
 0x2cd   : > { %v1951_v48 = vpop.permute.xlu0 %1950 }
 0x2ce   : > { %2007 = vst.msk [vmem:[#allocation2 + $0x34] sm:$0xf] %vm1993_vm4, %v1951_v48 }
 0x2cf   : > { %2152 = vrot.lane.b32.xlu2 %v2085_v24, %s3111_s28  ;;  %v5723_v24 = vld [vmem:[#allocation3_spill] sm:$0xff] }
 0x2d0   : > { %2114 = vrot.lane.b32.xlu1 %v2066_v28, %s3111_s28  ;;  %v2272_v17 = vpack.c.bf16 %v5723_v24, %v5723_v24  ;;  %v5724_v28 = vld [vmem:[#allocation12_spill] sm:$0xff] }
 0x2d1   : > { %v1961_v61 = vpop.permute.xlu2 %1960  ;;  %v2068_v7 = vpack.c.bf16 %v5724_v28, %v5724_v28 }
 0x2d2   : > { %v1949_v13 = vpop.permute.xlu1 %1948 }
 0x2d3   : > { %2006 = vst.msk [vmem:[#allocation2 + $0x30] sm:$0xf] %vm1993_vm4, %v1949_v13  ;;  %2336 = vrot.lane.b32.xlu0 %v2270_v31, %s3110_s27  ;;  %v2075_v13 = vpack.c.bf16 %v4633_v27, %v4633_v27  ;;  %v5725_v27 = vrot.slane %v4180_v0, 6 }
 0x2d4   : > { %2192 = vst.msk [vmem:[#allocation2 + $0x30] sm:$0xf] %vm2179_vm5, %v2135_v42  ;;  %v2252_v42 = vpack.c.bf16 %v4536_v6, %v4536_v6  ;;  %v2235_v6 = vsel %vm2226_vm13, %v5720_v49, %v2217_v62 }
 0x2d5   : > { %v2321_v21 = vpop.permute.xlu0 %2320  ;;  %v2259_v63 = vpack.c.bf16 %v2235_v6, %v2235_v6 }
 0x2d6   : > { %2378 = vst.msk [vmem:[#allocation2 + $0x30] sm:$0xf] %vm2365_vm6, %v2321_v21 }
 0x2d7   : > { %2126 = vrot.lane.b32.xlu2 %v2072_v51, %s3111_s28  ;;  %v2234_v51 = vsel %vm2226_vm13, %v2217_v62, %v5725_v27 }
 0x2d8   : > { %2128 = vrot.lane.b32.xlu1 %v2073_v53, %s3111_s28  ;;  %v2260_v53 = vpack.c.bf16 %v2234_v51, %v2234_v51 }
 0x2d9   : > { %v1927_v26 = vpop.permute.xlu2 %1926 }
 0x2da   : > { %v2137_v52 = vpop.permute.xlu1 %2136  ;;  %1995 = vst.msk [vmem:[#allocation2 + $0x4] sm:$0xf] %vm1993_vm4, %v1927_v26 }
 0x2db   : > { %2193 = vst.msk [vmem:[#allocation2 + $0x34] sm:$0xf] %vm2179_vm5, %v2137_v52  ;;  %2302 = vrot.lane.b32.xlu0 %v2253_v38, %s3110_s27  ;;  %v5728_v38 = vld [vmem:[#allocation5_spill] sm:$0xff] }
 0x2dc   : > { %2379 = vst.msk [vmem:[#allocation2 + $0x34] sm:$0xf] %vm2365_vm6, %v2323_v1  ;;  %v2261_v52 = vpack.c.bf16 %v5728_v38, %v5728_v38 }
 0x2dd   : > { %v1870_v41 = vpop.permute.xlu0 %1869 }
 0x2de   : > { %1920 = vst.msk [vmem:[#allocation2 + $0x4c] sm:$0xf] %vm1900_vm2, %v1870_v41 }
 0x2df   : > { %2338 = vrot.lane.b32.xlu2 %v2271_v50, %s3110_s27 }
 0x2e0   : > { %2300 = vrot.lane.b32.xlu1 %v2252_v42, %s3110_s27 }
 0x2e1   : > { %v2147_v3 = vpop.permute.xlu2 %2146 }
 0x2e2   : > { %v1868_v55 = vpop.permute.xlu1 %1867 }
 0x2e3   : > { %1919 = vst.msk [vmem:[#allocation2 + $0x48] sm:$0xf] %vm1900_vm2, %v1868_v55  ;;  %v2850_v36 = vld [vmem:[#allocation2 + $0x30] sm:$0xff]  ;;  %1865 = vrot.lane.b32.xlu0 %v5184_v23, %s3108_s25  ;;  %v2042_v23 = vsel %vm2040_vm12, %v2037_v16, %v5721_v56 }
 0x2e4   : > { %2012 = vst.msk [vmem:[#allocation2 + $0x48] sm:$0xf] %vm1993_vm4, %v1961_v61  ;;  %2836 = vmatmul.msk.bf16.vlgmr.msra.gmra.mxu2 %vm2490_vm7, %v2850_v36  ;;  %v2080_v20 = vpack.c.bf16 %v2042_v23, %v2042_v23 }
 0x2e5   : > { %2198 = vst.msk [vmem:[#allocation2 + $0x48] sm:$0xf] %vm2179_vm5, %v2147_v3  ;;  %v1925_v2 = vpop.permute.xlu0 %1924 }
 0x2e6   : > { %1994 = vst.msk [vmem:[#allocation2] sm:$0xf] %vm1993_vm4, %v1925_v2 }
 0x2e7   : > { %2312 = vrot.lane.b32.xlu2 %v2258_v14, %s3110_s27 }
 0x2e8   : > { %2314 = vrot.lane.b32.xlu1 %v2259_v63, %s3110_s27 }
 0x2e9   : > { %v2113_v34 = vpop.permute.xlu2 %2112 }
 0x2ea   : > { %v1963_v1 = vpop.permute.xlu1 %1962  ;;  %2181 = vst.msk [vmem:[#allocation2 + $0x4] sm:$0xf] %vm2179_vm5, %v2113_v34 }
 0x2eb   : > { %2013 = vst.msk [vmem:[#allocation2 + $0x4c] sm:$0xf] %vm1993_vm4, %v1963_v1  ;;  %2142 = vrot.lane.b32.xlu0 %v2080_v20, %s3111_s28 }
 0x2ed   : > { %v1939_v57 = vpop.permute.xlu0 %1938 }
 0x2ee   : > { %2001 = vst.msk [vmem:[#allocation2 + $0x1c] sm:$0xf] %vm1993_vm4, %v1939_v57 }
 0x2ef   : > { %1956 = vrot.lane.b32.xlu2 %v5059_v32, %s3109_s26  ;;  %v2086_v32 = vpack.c.bf16 %v5722_v19, %v5722_v19 }
 0x2f0   : > { %1958 = vrot.lane.b32.xlu1 %v5045_v37, %s3109_s26 }
 0x2f1   : > { %v2333_v25 = vpop.permute.xlu2 %2332 }
 0x2f2   : > { %v1937_v16 = vpop.permute.xlu1 %1936  ;;  %2384 = vst.msk [vmem:[#allocation2 + $0x48] sm:$0xf] %vm2365_vm6, %v2333_v25 }
 0x2f3   : > { %2000 = vst.msk [vmem:[#allocation2 + $0x18] sm:$0xf] %vm1993_vm4, %v1937_v16  ;;  %2328 = vrot.lane.b32.xlu0 %v2266_v18, %s3110_s27 }
 0x2f5   : > { %v2111_v58 = vpop.permute.xlu0 %2110 }
 0x2f6   : > { %2180 = vst.msk [vmem:[#allocation2] sm:$0xf] %vm2179_vm5, %v2111_v58 }
 0x2f7   : > { %2144 = vrot.lane.b32.xlu2 %v2081_v22, %s3111_s28 }
 0x2f8   : > { %1875 = vrot.lane.b32.xlu1 %v5212_v60, %s3108_s25  ;;  %s2777_s25 = sshll.u32 %s286_s16, 3 }
 0x2f9   : > { %v2299_v37 = vpop.permute.xlu2 %2298 }
 0x2fa   : > { %v2149_v39 = vpop.permute.xlu1 %2148  ;;  %2367 = vst.msk [vmem:[#allocation2 + $0x4] sm:$0xf] %vm2365_vm6, %v2299_v37  ;;  %v2594_v37 = vld [vmem:[%s276_s13] sm:$0x1] }
 0x2fb   : > { %2199 = vst.msk [vmem:[#allocation2 + $0x4c] sm:$0xf] %vm2179_vm5, %v2149_v39  ;;  %2154 = vrot.lane.b32.xlu0 %v2086_v32, %s3111_s28  ;;  %v2595_v19 = vadd.f32 1.0, %v2594_v37 }
 0x2fd   : > { %v2125_v12 = vpop.permute.xlu0 %2124 }
 0x2fe   : > { %2187 = vst.msk [vmem:[#allocation2 + $0x1c] sm:$0xf] %vm2179_vm5, %v2125_v12  ;;  %v5450_v12 = vperm.slane %v2595_v19, 0 }
 0x2ff   : > { %2330 = vrot.lane.b32.xlu2 %v2267_v45, %s3110_s27 }
 0x300   : > { %1968 = vrot.lane.b32.xlu1 %v4910_v30, %s3109_s26 }
 0x301   : > { %v1953_v60 = vpop.permute.xlu2 %1952 }
 0x302   : > { %v2123_v11 = vpop.permute.xlu1 %2122  ;;  %2008 = vst.msk [vmem:[#allocation2 + $0x38] sm:$0xf] %vm1993_vm4, %v1953_v60 }
 0x303   : > { %2186 = vst.msk [vmem:[#allocation2 + $0x18] sm:$0xf] %vm2179_vm5, %v2123_v11  ;;  %1934 = vrot.lane.b32.xlu0 %v4958_v44, %s3109_s26  ;;  %v5459_v11 = vld [vmem:[%s279_s29] ss:$0 sm:$0xff] }
 0x305   : > { %v2297_v48 = vpop.permute.xlu0 %2296 }
 0x306   : > { %2366 = vst.msk [vmem:[#allocation2] sm:$0xf] %vm2365_vm6, %v2297_v48 }
 0x307   : > { %2340 = vrot.lane.b32.xlu2 %v2272_v17, %s3110_s27 }
 0x308   : > { %1932 = vrot.lane.b32.xlu1 %v4922_v47, %s3109_s26 }
 0x309   : > { %v2141_v30 = vpop.permute.xlu2 %2140 }
 0x30a   : > { %v2335_v61 = vpop.permute.xlu1 %2334 }
 0x30b   : > { %2385 = vst.msk [vmem:[#allocation2 + $0x4c] sm:$0xf] %vm2365_vm6, %v2335_v61  ;;  %2118 = vrot.lane.b32.xlu0 %v2068_v7, %s3111_s28 }
 0x30d   : > { %v2311_v44 = vpop.permute.xlu0 %2310  ;;  %v2844_v31 = vld [vmem:[#allocation2] sm:$0xff] }
 0x30e   : > { %2373 = vst.msk [vmem:[#allocation2 + $0x1c] sm:$0xf] %vm2365_vm6, %v2311_v44  ;;  %2830 = vmatmul.msk.bf16.vlgmr.msra.gmra.mxu0 %vm2490_vm7, %v2844_v31 }
 0x30f   : > { %1944 = vrot.lane.b32.xlu2 %v4970_v54, %s3109_s26  ;;  %v2069_v54 = vpack.c.bf16 %v4601_v15, %v4601_v15 }
 0x310   : > { %1946 = vrot.lane.b32.xlu1 %v5001_v9, %s3109_s26  ;;  %v2074_v9 = vpack.c.bf16 %v4609_v59, %v4609_v59  ;;  %v5727_v59 = vld [vmem:[#allocation4_spill] sm:$0xff] }
 0x311   : > { %v1872_v47 = vpop.permute.xlu2 %1871  ;;  %v2255_v29 = vpack.c.bf16 %v5727_v59, %v5727_v59 }
 0x312   : > { %v2309_v46 = vpop.permute.xlu1 %2308  ;;  %1921 = vst.msk [vmem:[#allocation2 + $0x50] sm:$0xf] %vm1900_vm2, %v1872_v47  ;;  %v2853_v10 = vld [vmem:[#allocation2 + $0x48] sm:$0xff] }
 0x313   : > { %2372 = vst.msk [vmem:[#allocation2 + $0x18] sm:$0xf] %vm2365_vm6, %v2309_v46  ;;  %2132 = vrot.lane.b32.xlu0 %v2075_v13, %s3111_s28  ;;  %2839 = vmatmul.msk.bf16.vlgmr.msra.gmra.mxu3 %vm2490_vm7, %v2853_v10 }
 0x315   : > { %v2139_v5 = vpop.permute.xlu0 %2138 }
 0x316   : > { %2194 = vst.msk [vmem:[#allocation2 + $0x38] sm:$0xf] %vm2179_vm5, %v2139_v5 }
 0x317   : > { %2120 = vrot.lane.b32.xlu2 %v2069_v54, %s3111_s28 }
 0x318   : > { %2130 = vrot.lane.b32.xlu1 %v2074_v9, %s3111_s28  ;;  %s5465_s28 = scalar_lea.vmem %s5578_s5, %s2777_s25 }
 0x319   : > { %v1967_v21 = vpop.permute.xlu2 %1966 }
 0x31a   : > { %v1955_v15 = vpop.permute.xlu1 %1954  ;;  %v2847_v4 = vld [vmem:[#allocation2 + $0x18] sm:$0xff] }
 0x31b   : > { %2009 = vst.msk [vmem:[#allocation2 + $0x3c] sm:$0xf] %vm1993_vm4, %v1955_v15  ;;  %2316 = vrot.lane.b32.xlu0 %v2260_v53, %s3110_s27  ;;  %2833 = vmatmul.msk.bf16.vlgmr.msra.gmra.mxu1 %vm2490_vm7, %v2847_v4 }
 0x31c   : > { %2195 = vst.msk [vmem:[#allocation2 + $0x3c] sm:$0xf] %vm2179_vm5, %v2141_v30 }
 0x31d   : > { %v2327_v0 = vpop.permute.xlu0 %2326 }
 0x31e   : > { %2381 = vst.msk [vmem:[#allocation2 + $0x3c] sm:$0xf] %vm2365_vm6, %v2327_v0 }
 0x31f   : > { %2304 = vrot.lane.b32.xlu2 %v2254_v8, %s3110_s27 }
 0x320   : > { %2306 = vrot.lane.b32.xlu1 %v2255_v29, %s3110_s27 }
 0x321   : > { %v1941_v33 = vpop.permute.xlu2 %1940 }
 0x322   : > { %v2325_v26 = vpop.permute.xlu1 %2324  ;;  %2002 = vst.msk [vmem:[#allocation2 + $0x20] sm:$0xf] %vm1993_vm4, %v1941_v33 }
 0x323   : > { %2380 = vst.msk [vmem:[#allocation2 + $0x38] sm:$0xf] %vm2365_vm6, %v2325_v26 }
 0x325   : > { %v1965_v40 = vpop.permute.xlu0 %1964 }
 0x326   : > { %2014 = vst.msk [vmem:[#allocation2 + $0x50] sm:$0xf] %vm1993_vm4, %v1965_v40 }
 0x327   : > { %2318 = vrot.lane.b32.xlu2 %v2261_v52, %s3110_s27 }
 0x329   : > { %v2153_v43 = vpop.permute.xlu2 %2152 }
 0x32a   : > { %v1874_v50 = vpop.permute.xlu1 %1873  ;;  %v2851_v41 = vld [vmem:[#allocation2 + $0x38] sm:$0xff] }
 0x32b   : > { %1922 = vst.msk [vmem:[#allocation2 + $0x54] sm:$0xf] %vm1900_vm2, %v1874_v50  ;;  %2837 = vmatmul.msk.bf16.gmra.mxu2 %vm2490_vm7, %v2851_v41 }
 0x32c   : > { %2015 = vst.msk [vmem:[#allocation2 + $0x54] sm:$0xf] %vm1993_vm4, %v1967_v21 }
 0x32d   : > { %2201 = vst.msk [vmem:[#allocation2 + $0x54] sm:$0xf] %vm2179_vm5, %v2153_v43  ;;  %v1931_v42 = vpop.permute.xlu0 %1930 }
 0x32e   : > { %1997 = vst.msk [vmem:[#allocation2 + $0xc] sm:$0xf] %vm1993_vm4, %v1931_v42 }
 0x331   : > { %v2127_v62 = vpop.permute.xlu2 %2126 }
 0x332   : > { %v1929_v3 = vpop.permute.xlu1 %1928  ;;  %2188 = vst.msk [vmem:[#allocation2 + $0x20] sm:$0xf] %vm2179_vm5, %v2127_v62 }
 0x333   : > { %1996 = vst.msk [vmem:[#allocation2 + $0x8] sm:$0xf] %vm1993_vm4, %v1929_v3 }
 0x335   : > { %v2151_v55 = vpop.permute.xlu0 %2150 }
 0x336   : > { %2200 = vst.msk [vmem:[#allocation2 + $0x50] sm:$0xf] %vm2179_vm5, %v2151_v55 }
 0x339   : > { %v2339_v36 = vpop.permute.xlu2 %2338 }
 0x33a   : > { %v1943_v49 = vpop.permute.xlu1 %1942  ;;  %2387 = vst.msk [vmem:[#allocation2 + $0x54] sm:$0xf] %vm2365_vm6, %v2339_v36 }
 0x33b   : > { %2003 = vst.msk [vmem:[#allocation2 + $0x24] sm:$0xf] %vm1993_vm4, %v1943_v49 }
 0x33d   : > { %v2117_v6 = vpop.permute.xlu0 %2116 }
 0x33e   : > { %2183 = vst.msk [vmem:[#allocation2 + $0xc] sm:$0xf] %vm2179_vm5, %v2117_v6 }
 0x341   : > { %v2313_v14 = vpop.permute.xlu2 %2312 }
 0x342   : > { %v2115_v2 = vpop.permute.xlu1 %2114  ;;  %2374 = vst.msk [vmem:[#allocation2 + $0x20] sm:$0xf] %vm2365_vm6, %v2313_v14 }
 0x343   : > { %2182 = vst.msk [vmem:[#allocation2 + $0x8] sm:$0xf] %vm2179_vm5, %v2115_v2 }
 0x345   : > { %v2337_v63 = vpop.permute.xlu0 %2336 }
 0x346   : > { %2386 = vst.msk [vmem:[#allocation2 + $0x50] sm:$0xf] %vm2365_vm6, %v2337_v63 }
 0x349   : > { %v1957_v56 = vpop.permute.xlu2 %1956 }
 0x34a   : > { %v2129_v23 = vpop.permute.xlu1 %2128  ;;  %2010 = vst.msk [vmem:[#allocation2 + $0x40] sm:$0xf] %vm1993_vm4, %v1957_v56 }
 0x34b   : > { %2189 = vst.msk [vmem:[#allocation2 + $0x24] sm:$0xf] %vm2179_vm5, %v2129_v23 }
 0x34d   : > { %v2303_v34 = vpop.permute.xlu0 %2302  ;;  %v2854_v20 = vld [vmem:[#allocation2 + $0x50] sm:$0xff] }
 0x34e   : > { %2369 = vst.msk [vmem:[#allocation2 + $0xc] sm:$0xf] %vm2365_vm6, %v2303_v34  ;;  %2840 = vmatmul.msk.bf16.gmra.mxu3 %vm2490_vm7, %v2854_v20 }
 0x351   : > { %v2145_v1 = vpop.permute.xlu2 %2144 }
 0x352   : > { %v2301_v57 = vpop.permute.xlu1 %2300 }
 0x353   : > { %2368 = vst.msk [vmem:[#allocation2 + $0x8] sm:$0xf] %vm2365_vm6, %v2301_v57 }
 0x355   : > { %v1866_v25 = vpop.permute.xlu0 %1865 }
 0x356   : > { %1918 = vst.msk [vmem:[#allocation2 + $0x44] sm:$0xf] %vm1900_vm2, %v1866_v25 }
 0x359   : > { %v2331_v18 = vpop.permute.xlu2 %2330 }
 0x35a   : > { %v2315_v16 = vpop.permute.xlu1 %2314  ;;  %v2845_v22 = vld [vmem:[#allocation2 + $0x8] sm:$0xff] }
 0x35b   : > { %2375 = vst.msk [vmem:[#allocation2 + $0x24] sm:$0xf] %vm2365_vm6, %v2315_v16  ;;  %2831 = vmatmul.msk.bf16.gmra.mxu0 %vm2490_vm7, %v2845_v22 }
 0x35d   : > { %v2143_v58 = vpop.permute.xlu0 %2142 }
 0x35e   : > { %2196 = vst.msk [vmem:[#allocation2 + $0x40] sm:$0xf] %vm2179_vm5, %v2143_v58 }
 0x361   : > { %v2341_v32 = vpop.permute.xlu2 %2340 }
 0x362   : > { %v1959_v39 = vpop.permute.xlu1 %1958  ;;  %v2848_v45 = vld [vmem:[#allocation2 + $0x20] sm:$0xff] }
 0x363   : > { %2011 = vst.msk [vmem:[#allocation2 + $0x44] sm:$0xf] %vm1993_vm4, %v1959_v39  ;;  %2834 = vmatmul.msk.bf16.gmra.mxu1 %vm2490_vm7, %v2848_v45 }
 0x364   : > { %2197 = vst.msk [vmem:[#allocation2 + $0x44] sm:$0xf] %vm2179_vm5, %v2145_v1 }
 0x365   : > { %2383 = vst.msk [vmem:[#allocation2 + $0x44] sm:$0xf] %vm2365_vm6, %v2331_v18  ;;  %v2329_v60 = vpop.permute.xlu0 %2328 }
 0x366   : > { %2382 = vst.msk [vmem:[#allocation2 + $0x40] sm:$0xf] %vm2365_vm6, %v2329_v60 }
 0x367   : > { %v2570_v24 = vpop.f32.mrf.mxu2 }
 0x368   : > { %v2611_v17 = vmul.f32 %v5450_v12, %v2570_v24 }
 0x369   : > { %v1945_v48 = vpop.permute.xlu2 %1944 }
 0x36a   : > { %v1876_v30 = vpop.permute.xlu1 %1875  ;;  %2004 = vst.msk [vmem:[#allocation2 + $0x28] sm:$0xf] %vm1993_vm4, %v1945_v48  ;;  %v2633_v28 = vadd.f32 %v5459_v11, %v2611_v17 }
 0x36b   : > { %1923 = vst.msk [vmem:[#allocation2 + $0x58] sm:$0xf] %vm1900_vm2, %v1876_v30 }
 0x36c   : > { %2652 = vst.msk [vmem:[%s5465_s28 + $0x60] sm:$0xff] %vm2639_vm8, %v2633_v28 }
 0x36d   : > { %v2155_v7 = vpop.permute.xlu0 %2154  ;;  %v2852_v61 = vld [vmem:[#allocation2 + $0x40] sm:$0xff] }
 0x36e   : > { %2838 = vmatmul.msk.bf16.gmra.mxu2 %vm2490_vm7, %v2852_v61 }
 0x36f   : > { %v2572_v44 = vpop.f32.mrf.mxu2 }
 0x370   : > { %v2612_v31 = vmul.f32 %v5450_v12, %v2572_v44 }
 0x371   : > { %v2121_v13 = vpop.permute.xlu2 %2120 }
 0x372   : > { %v1969_v47 = vpop.permute.xlu1 %1968  ;;  %v2634_v46 = vadd.f32 %v5459_v11, %v2612_v31 }
 0x373   : > { %2016 = vst.msk [vmem:[#allocation2 + $0x58] sm:$0xf] %vm1993_vm4, %v1969_v47 }
 0x374   : > { %2202 = vst.msk [vmem:[#allocation2 + $0x58] sm:$0xf] %vm2179_vm5, %v2155_v7 }
 0x375   : > { %2653 = vst.msk [vmem:[%s5465_s28 + $0x68] sm:$0xff] %vm2639_vm8, %v2634_v46  ;;  %v1935_v10 = vpop.permute.xlu0 %1934 }
 0x376   : > { %2388 = vst.msk [vmem:[#allocation2 + $0x58] sm:$0xf] %vm2365_vm6, %v2341_v32 }
 0x377   : > { %1999 = vst.msk [vmem:[#allocation2 + $0x14] sm:$0xf] %vm1993_vm4, %v1935_v10 }
 0x378   : > { %2185 = vst.msk [vmem:[#allocation2 + $0x14] sm:$0xf] %vm2179_vm5, %v2121_v13 }
 0x379   : > { %v2305_v5 = vpop.permute.xlu2 %2304 }
 0x37a   : > { %v1933_v54 = vpop.permute.xlu1 %1932 }
 0x37b   : > { %1998 = vst.msk [vmem:[#allocation2 + $0x10] sm:$0xf] %vm1993_vm4, %v1933_v54 }
 0x37d   : > { %v2411_v9 = vld [vmem:[#allocation2 + $0x58] sm:$0xf]  ;;  %v2119_v27 = vpop.permute.xlu0 %2118 }
 0x37e   : > { %v2462_v51 = vunpack.c.l.b16 %v2411_v9  ;;  %2184 = vst.msk [vmem:[#allocation2 + $0x10] sm:$0xf] %vm2179_vm5, %v2119_v27 }
 0x37f   : > { %2370 = vst.msk [vmem:[#allocation2 + $0x10] sm:$0xf] %vm2365_vm6, %v2305_v5 }
 0x380   : > { %v2474_v21 = vpack.c.b16 %v2462_v51, %v2462_v51 }
 0x381   : > { %v2319_v4 = vpop.permute.xlu2 %2318 }
 0x382   : > { %2841 = vmatmul.msk.bf16.gmra.mxu3 %vm2490_vm7, %v2474_v21  ;;  %v1947_v53 = vpop.permute.xlu1 %1946 }
 0x383   : > { %2005 = vst.msk [vmem:[#allocation2 + $0x2c] sm:$0xf] %vm1993_vm4, %v1947_v53 }
 0x385   : > { %v2133_v15 = vpop.permute.xlu0 %2132 }
 0x386   : > { %2191 = vst.msk [vmem:[#allocation2 + $0x2c] sm:$0xf] %vm2179_vm5, %v2133_v15 }
 0x387   : > { %2377 = vst.msk [vmem:[#allocation2 + $0x2c] sm:$0xf] %vm2365_vm6, %v2319_v4 }
 0x38a   : > { %v2131_v35 = vpop.permute.xlu1 %2130 }
 0x38b   : > { %2190 = vst.msk [vmem:[#allocation2 + $0x28] sm:$0xf] %vm2179_vm5, %v2131_v35  ;;  %v2540_v8 = vpop.f32.mrf.mxu0 }
 0x38c   : > { %v2599_v0 = vmul.f32 %v5450_v12, %v2540_v8 }
 0x38d   : > { %v2317_v59 = vpop.permute.xlu0 %2316 }
 0x38e   : > { %2376 = vst.msk [vmem:[#allocation2 + $0x28] sm:$0xf] %vm2365_vm6, %v2317_v59  ;;  %v2621_v29 = vadd.f32 %v5459_v11, %v2599_v0 }
 0x390   : > { %2640 = vst.msk [vmem:[%s5465_s28] sm:$0xff] %vm2639_vm8, %v2621_v29 }
 0x392   : > { %v2307_v33 = vpop.permute.xlu1 %2306 }
 0x393   : > { %2371 = vst.msk [vmem:[#allocation2 + $0x14] sm:$0xf] %vm2365_vm6, %v2307_v33  ;;  %v2542_v26 = vpop.f32.mrf.mxu0 }
 0x394   : > { %v2600_v38 = vmul.f32 %v5450_v12, %v2542_v26 }
 0x395   : > { %v2849_v52 = vld [vmem:[#allocation2 + $0x28] sm:$0xff] }
 0x396   : > { %v2585_v40 = vpop.f32.mrf.mxu3  ;;  %v2622_v43 = vadd.f32 %v5459_v11, %v2600_v38  ;;  %2835 = vmatmul.msk.bf16.gmra.mxu1 %vm2490_vm7, %v2849_v52 }
 0x398   : > { %2641 = vst.msk [vmem:[%s5465_s28 + $0x8] sm:$0xff] %vm2639_vm8, %v2622_v43  ;;  %v2555_v50 = vpop.f32.mrf.mxu1 }
 0x399   : > { %v2605_v41 = vmul.f32 %v5450_v12, %v2555_v50 }
 0x39a   : > { %v2846_v42 = vld [vmem:[#allocation2 + $0x10] sm:$0xff] }
 0x39b   : > { %v2627_v62 = vadd.f32 %v5459_v11, %v2605_v41  ;;  %2832 = vmatmul.msk.bf16.gmra.mxu0 %vm2490_vm7, %v2846_v42 }
 0x39d   : > { %2646 = vst.msk [vmem:[%s5465_s28 + $0x30] sm:$0xff] %vm2639_vm8, %v2627_v62 }
 0x39e   : > { %v2586_v3 = vpop.f32.mrf.mxu3 }
 0x3a0   : > { %v2557_v55 = vpop.f32.mrf.mxu1 }
 0x3a1   : > { %v2606_v36 = vmul.f32 %v5450_v12, %v2557_v55 }
 0x3a3   : > { %v2628_v49 = vadd.f32 %v5459_v11, %v2606_v36 }
 0x3a5   : > { %2647 = vst.msk [vmem:[%s5465_s28 + $0x38] sm:$0xff] %vm2639_vm8, %v2628_v49 }
 0x3ae   : > { %v2575_v6 = vpop.f32.mrf.mxu2 }
 0x3af   : > { %v2613_v14 = vmul.f32 %v5450_v12, %v2575_v6 }
 0x3b1   : > { %v2635_v2 = vadd.f32 %v5459_v11, %v2613_v14 }
 0x3b3   : > { %2654 = vst.msk [vmem:[%s5465_s28 + $0x70] sm:$0xff] %vm2639_vm8, %v2635_v2 }
 0x3b6   : > { %v2577_v63 = vpop.f32.mrf.mxu2 }
 0x3b7   : > { %v2614_v56 = vmul.f32 %v5450_v12, %v2577_v63 }
 0x3b9   : > { %v2636_v23 = vadd.f32 %v5459_v11, %v2614_v56 }
 0x3bb   : > { %2655 = vst.msk [vmem:[%s5465_s28 + $0x78] sm:$0xff] %vm2639_vm8, %v2636_v23 }
 0x3d1   : > { %v2588_v34 = vpop.f32.mrf.mxu3 }
 0x3d8   : > { %v2545_v20 = vpop.f32.mrf.mxu0 }
 0x3d9   : > { %v2601_v1 = vmul.f32 %v5450_v12, %v2545_v20  ;;  %v2589_v57 = vpop.f32.mrf.mxu3 }
 0x3db   : > { %v2623_v25 = vadd.f32 %v5459_v11, %v2601_v1 }
 0x3dd   : > { %2642 = vst.msk [vmem:[%s5465_s28 + $0x10] sm:$0xff] %vm2639_vm8, %v2623_v25 }
 0x3e0   : > { %v2547_v18 = vpop.f32.mrf.mxu0  ;;  %v2560_v16 = vpop.f32.mrf.mxu1 }
 0x3e1   : > { %v2602_v22 = vmul.f32 %v5450_v12, %v2547_v18  ;;  %v2607_v58 = vmul.f32 %v5450_v12, %v2560_v16 }
 0x3e3   : > { %v2624_v37 = vadd.f32 %v5459_v11, %v2602_v22  ;;  %v2629_v19 = vadd.f32 %v5459_v11, %v2607_v58 }
 0x3e5   : > { %2643 = vst.msk [vmem:[%s5465_s28 + $0x18] sm:$0xff] %vm2639_vm8, %v2624_v37 }
 0x3e6   : > { %2648 = vst.msk [vmem:[%s5465_s28 + $0x40] sm:$0xff] %vm2639_vm8, %v2629_v19 }
 0x3e8   : > { %v2562_v32 = vpop.f32.mrf.mxu1 }
 0x3e9   : > { %v2608_v39 = vmul.f32 %v5450_v12, %v2562_v32 }
 0x3eb   : > { %v2630_v45 = vadd.f32 %v5459_v11, %v2608_v39 }
 0x3ed   : > { %2649 = vst.msk [vmem:[%s5465_s28 + $0x48] sm:$0xff] %vm2639_vm8, %v2630_v45 }
 0x3f1   : > { %v2580_v60 = vpop.f32.mrf.mxu2 }
 0x3f2   : > { %v2615_v24 = vmul.f32 %v5450_v12, %v2580_v60 }
 0x3f4   : > { %v2637_v17 = vadd.f32 %v5459_v11, %v2615_v24 }
 0x3f6   : > { %2656 = vst.msk [vmem:[%s5465_s28 + $0x80] sm:$0xff] %vm2639_vm8, %v2637_v17 }
 0x3f9   : > { %v2582_v48 = vpop.f32.mrf.mxu2 }
 0x3fa   : > { %v2616_v30 = vmul.f32 %v5450_v12, %v2582_v48 }
 0x3fc   : > { %v2638_v28 = vadd.f32 %v5459_v11, %v2616_v30 }
 0x3fe   : > { %2657 = vst.msk [vmem:[%s5465_s28 + $0x88] sm:$0xff] %vm2639_vm8, %v2638_v28 }
 0x405   : > { %v2591_v7 = vpop.f32.mrf.mxu3 }
 0x40d   : > { %v2592_v61 = vpop.f32.mrf.mxu3 }
 0x413   : > { %v2565_v44 = vpop.f32.mrf.mxu1 }
 0x414   : > { %v2609_v31 = vmul.f32 %v5450_v12, %v2565_v44 }
 0x416   : > { %v2631_v47 = vadd.f32 %v5459_v11, %v2609_v31 }
 0x418   : > { %v2550_v13 = vpop.f32.mrf.mxu0  ;;  %2650 = vst.msk [vmem:[%s5465_s28 + $0x50] sm:$0xff] %vm2639_vm8, %v2631_v47 }
 0x419   : > { %v2603_v46 = vmul.f32 %v5450_v12, %v2550_v13 }
 0x41b   : > { %v2625_v10 = vadd.f32 %v5459_v11, %v2603_v46  ;;  %v2567_v54 = vpop.f32.mrf.mxu1 }
 0x41c   : > { %v2610_v5 = vmul.f32 %v5450_v12, %v2567_v54 }
 0x41d   : > { %2644 = vst.msk [vmem:[%s5465_s28 + $0x20] sm:$0xff] %vm2639_vm8, %v2625_v10 }
 0x41e   : > { %v2632_v9 = vadd.f32 %v5459_v11, %v2610_v5 }
 0x420   : > { %v2552_v27 = vpop.f32.mrf.mxu0  ;;  %2651 = vst.msk [vmem:[%s5465_s28 + $0x58] sm:$0xff] %vm2639_vm8, %v2632_v9 }
 0x421   : > { %v2604_v51 = vmul.f32 %v5450_v12, %v2552_v27 }
 0x423   : > { %v2626_v21 = vadd.f32 %v5459_v11, %v2604_v51 }
 0x425   : > { %2645 = vst.msk [vmem:[%s5465_s28 + $0x28] sm:$0xff] %vm2639_vm8, %v2626_v21 }
 0x426 PF: > { %s15_s22 = sadd.s32 1, %s3101_s22   ;;  %s5729_s18 = smov %s3093_s20 }
 0x427   : > { %p12_p7 = scmp.ge.s32.totalorder %s15_s22, 6   ;;  %s5730_s19 = smov %s3097_s21 }
 0x428   : > { %s5731_s20 = smov %s5734_s23  ;;  %s5732_s21 = smov %s5738_s24 }
 0x429   :  { %14 = sbr.rel (!%p12_p7) target bundleno = 3 (0x3), region = 76 }

</bundles_post_ra>
